<compile_context>
chip_gen: v7x
topology: tpu7x:2x2x1
jax: 0.10.0
libtpu: 0.0.40
codegen_flags: <defaults>
</compile_context>

<pallas_src>
import math
import numpy as np
import jax
import jax.numpy as jnp
from jax import lax
from jax.experimental import pallas as pl
from jax.experimental.pallas import tpu as pltpu

K = 4            # kernel size
S = 2            # stride
P = 1            # PyTorch padding = kernel_size // 2 - 1
EPS = 1e-5       # InstanceNorm2d default eps
_INV_SQRT2 = 1.0 / math.sqrt(2.0)


def _upscale_kernel(x_ref, w_ref, o_ref, xpad_ref):
    # x_ref:    (B, Cin, H, W)       VMEM  unpadded input block
    # w_ref:    (16*Cin*Cout,)       SMEM  per-phase 2x2 sub-kernel scalars, index
    #           ((((py*2+px)*2+dy)*2+dx)*Cin+ci)*Cout+co == w_pt[ci,co,3-py-2dy,3-px-2dx]
    # o_ref:    (B, Cout, 2H, 2W)    VMEM  final NCHW output (already de-interleaved)
    # xpad_ref: (Cin, H+2, W+2)      VMEM  scratch: input + 1-px zero halo
    B, Cin, H, W = x_ref.shape
    _, Cout, H2, W2 = o_ref.shape
    inv_m = 1.0 / float(4 * H * W)

    # Zero the halo scratch once per grid step; the interior is rewritten per sample and the
    # halo stays zero.  (Replaces the wrapper jnp.pad -> one fewer HBM pass over the input.)
    xpad_ref[...] = jnp.zeros_like(xpad_ref)

    # Constant 0/1 phase-spreading matrices built from iota:
    #   E[py][Y, oy] = (Y == 2*oy + py)   -> (2H, H)
    #   F[px][ox, X] = (X == 2*ox + px)   -> (W, 2W)
    # so  sum_{py,px} E[py] @ plane[py,px] @ F[px]  is the fully de-interleaved (2H, 2W) image.
    iy = lax.broadcasted_iota(jnp.int32, (H2, H), 0)
    io = lax.broadcasted_iota(jnp.int32, (H2, H), 1)
    E = [(iy == 2 * io + py).astype(jnp.float32) for py in range(2)]
    jo = lax.broadcasted_iota(jnp.int32, (W, W2), 0)
    jx = lax.broadcasted_iota(jnp.int32, (W, W2), 1)
    F = [(jx == 2 * jo + px).astype(jnp.float32) for px in range(2)]

    def widx(py, px, dy, dx, ci, co):
        return ((((py * 2 + px) * 2 + dy) * 2 + dx) * Cin + ci) * Cout + co

    for b in range(B):
        # In-kernel 1-px halo pad (interior store; halo rows/cols remain zero).
        xpad_ref[:, 1:1 + H, 1:1 + W] = x_ref[b].astype(jnp.float32)

        # Polyphase transposed conv:
        #   y[co, 2oy+py, 2ox+px] = sum_{ci,dy,dx} xpad[ci, oy+py+dy, ox+px+dx]
        #                                          * w[ci, co, 3-py-2dy, 3-px-2dx]
        # The 3x3 window offset (r,c) = (py+dy, px+dx) is the OUTERMOST loop so only one
        # (Cin,H,W) window is live at a time; all 4*Cout accumulators are updated from it.
        acc = [[[jnp.zeros((H, W), jnp.float32) for _ in range(2)]
                for _ in range(2)] for _ in range(Cout)]
        for r in range(3):
            for c in range(3):
                win = xpad_ref[:, r:r + H, c:c + W]          # (Cin, H, W)
                for py in range(2):
                    dy = r - py
                    if dy < 0 or dy > 1:
                        continue
                    for px in range(2):
                        dx = c - px
                        if dx < 0 or dx > 1:
                            continue
                        for co in range(Cout):
                            a = acc[co][py][px]
                            for ci in range(Cin):
                                a = a + w_ref[widx(py, px, dy, dx, ci, co)] * win[ci]
                            acc[co][py][px] = a

        # Fused InstanceNorm2d (affine=False, biased variance, two-pass in f32) + exact
        # erf-GELU, then in-register phase de-interleave and direct NCHW store.
        for co in range(Cout):
            planes = [acc[co][py][px] for py in range(2) for px in range(2)]
            s1 = planes[0]
            for p in planes[1:]:
                s1 = s1 + p
            mean = jnp.sum(s1, axis=(0, 1), keepdims=True) * inv_m          # (1, 1)
            s2 = jnp.zeros((1, 1), jnp.float32)
            for p in planes:
                d = p - mean
                s2 = s2 + jnp.sum(d * d, axis=(0, 1), keepdims=True)
            scale = lax.rsqrt(s2 * inv_m + EPS)                             # (1, 1)

            full = jnp.zeros((H2, W2), jnp.float32)
            for py in range(2):
                row = jnp.zeros((H, W2), jnp.float32)
                for px in range(2):
                    yn = (acc[co][py][px] - mean) * scale
                    g = 0.5 * yn * (1.0 + lax.erf(yn * _INV_SQRT2))         # exact GELU
                    row = row + jnp.dot(g, F[px], preferred_element_type=jnp.float32)
                full = full + jnp.dot(E[py], row, preferred_element_type=jnp.float32)
            o_ref[b, co] = full.astype(o_ref.dtype)


def _samples_per_block(n, max_b=8):
    # Keep >=2 grid programs when possible (v7x: 2 TensorCores per chip) while batching
    # samples per step to amortize the ~0.35us per-grid-step overhead on single-TC v5e/v6e.
    if n <= 1:
        return 1
    target = max(1, min(max_b, n // 2))
    for b in range(target, 0, -1):
        if n % b == 0:
            return b
    return 1


def up_scale(x_nchw, w_pt):
    """x_nchw: (N, Cin, H, W); w_pt: PyTorch ConvTranspose2d weight (Cin, Cout, K, K)."""
    N, Cin, H, W = x_nchw.shape
    Cout = w_pt.shape[1]
    H2, W2 = S * H, S * W

    # Per-phase 2x2 sub-kernels, flattened for SMEM scalar reads.
    kr = np.array([[3 - p - 2 * d for d in range(2)] for p in range(2)], dtype=np.int32)
    # w_sub[ci, co, py, px, dy, dx] = w_pt[ci, co, kr[py, dy], kr[px, dx]]
    w_sub = w_pt[:, :, kr[:, None, :, None], kr[None, :, None, :]]
    w_flat = jnp.transpose(w_sub, (2, 3, 4, 5, 0, 1)).reshape(-1).astype(jnp.float32)

    B = _samples_per_block(N)
    grid = (N // B,)

    out = pl.pallas_call(
        _upscale_kernel,
        out_shape=jax.ShapeDtypeStruct((N, Cout, H2, W2), x_nchw.dtype),
        grid=grid,
        in_specs=[
            pl.BlockSpec((B, Cin, H, W), lambda n: (n, 0, 0, 0)),
            pl.BlockSpec(memory_space=pltpu.MemorySpace.SMEM),
        ],
        out_specs=pl.BlockSpec((B, Cout, H2, W2), lambda n: (n, 0, 0, 0)),
        scratch_shapes=[pltpu.VMEM((Cin, H + 2, W + 2), jnp.float32)],
        compiler_params=pltpu.CompilerParams(
            dimension_semantics=("parallel",),
        ),
    )(x_nchw, w_flat)
    return out


def _reference(x_nchw, w_pt):
    """Pure-JAX reference (same math via XLA conv) for validation."""
    x = jnp.transpose(x_nchw, (0, 2, 3, 1))
    w_eff = jnp.transpose(w_pt[:, :, ::-1, ::-1], (2, 3, 0, 1))
    y = jax.lax.conv_general_dilated(
        x, w_eff, window_strides=(1, 1),
        padding=[(K - 1 - P, K - 1 - P)] * 2,
        lhs_dilation=(S, S),
        dimension_numbers=("NHWC", "HWIO", "NHWC"))
    mean = jnp.mean(y, axis=(1, 2), keepdims=True)
    var = jnp.mean((y - mean) ** 2, axis=(1, 2), keepdims=True)
    yn = (y - mean) * jax.lax.rsqrt(var + EPS)
    out = 0.5 * yn * (1.0 + jax.lax.erf(yn * _INV_SQRT2))
    return jnp.transpose(out, (0, 3, 1, 2))


if __name__ == "__main__":
    key = jax.random.PRNGKey(0)
    kx, kw = jax.random.split(key)

    N, Cin, H, W = 2, 4, 16, 16
    Cout = Cin // 2

    x = jax.random.normal(kx, (N, Cin, H, W), dtype=jnp.float32)
    # ConvTranspose2d weight (Cin, Cout, K, K); bias disabled because norm=True in BasicConv.
    w = 0.1 * jax.random.normal(kw, (Cin, Cout, K, K), dtype=jnp.float32)

    out = jax.block_until_ready(up_scale(x, w))
    ref = jax.block_until_ready(_reference(x, w))

    np.testing.assert_allclose(np.asarray(out), np.asarray(ref), rtol=1e-3, atol=1e-3)
    assert out.shape == (N, Cout, 2 * H, 2 * W)

    print("KERNEL_OK")
</pallas_src>

<mosaic_0001>
module attributes {stable_mosaic.version = 11 : i64} {
  func.func @_upscale_kernel(%arg0: i32, %arg1: memref<1x4x16x16xf32, #tpu.memory_space<vmem>>, %arg2: memref<128xf32, #tpu.memory_space<smem>>, %arg3: memref<1x2x32x32xf32, #tpu.memory_space<vmem>>, %arg4: memref<4x18x18xf32, #tpu.memory_space<vmem>>) attributes {dimension_semantics = [#tpu.dimension_semantics<parallel>], iteration_bounds = array<i64: 2>, scalar_prefetch = 0 : i64, scratch_operands = 1 : i64, tpu.core_type = #tpu.core_type<tc>, window_params = [{transform_indices = @transform_0, window_bounds = array<i64: 1, 4, 16, 16>}, {transform_indices = @transform_1, window_bounds = array<i64: 128>}, {transform_indices = @transform_2, window_bounds = array<i64: 1, 2, 32, 32>}]} {
    %cst = arith.constant 0.000000e+00 : f32
    %0 = vector.broadcast %cst : f32 to vector<4x18x18xf32>
    %c0 = arith.constant 0 : index
    %c0_0 = arith.constant 0 : index
    %c0_1 = arith.constant 0 : index
    %1 = vector.load %arg4[%c0, %c0_0, %c0_1] : memref<4x18x18xf32, #tpu.memory_space<vmem>>, vector<4x18x18xf32>
    tpu.vector_store %arg4[%c0, %c0_0, %c0_1], %0 {strides = array<i32>} : memref<4x18x18xf32, #tpu.memory_space<vmem>>, vector<4x18x18xf32>,
    %2 = tpu.iota {dimensions = array<i32: 0>} : vector<32x16xi32>
    %3 = tpu.iota {dimensions = array<i32: 1>} : vector<32x16xi32>
    %c2_i32 = arith.constant 2 : i32
    %4 = vector.broadcast %c2_i32 : i32 to vector<32x16xi32>
    %5 = arith.muli %4, %3 : vector<32x16xi32>
    %c0_i32 = arith.constant 0 : i32
    %6 = vector.broadcast %c0_i32 : i32 to vector<32x16xi32>
    %7 = arith.addi %5, %6 : vector<32x16xi32>
    %8 = arith.cmpi eq, %2, %7 : vector<32x16xi32>
    %9 = arith.extui %8 : vector<32x16xi1> to vector<32x16xi32>
    %10 = arith.sitofp %9 : vector<32x16xi32> to vector<32x16xf32>
    %c2_i32_2 = arith.constant 2 : i32
    %11 = vector.broadcast %c2_i32_2 : i32 to vector<32x16xi32>
    %12 = arith.muli %11, %3 : vector<32x16xi32>
    %c1_i32 = arith.constant 1 : i32
    %13 = vector.broadcast %c1_i32 : i32 to vector<32x16xi32>
    %14 = arith.addi %12, %13 : vector<32x16xi32>
    %15 = arith.cmpi eq, %2, %14 : vector<32x16xi32>
    %16 = arith.extui %15 : vector<32x16xi1> to vector<32x16xi32>
    %17 = arith.sitofp %16 : vector<32x16xi32> to vector<32x16xf32>
    %18 = tpu.iota {dimensions = array<i32: 0>} : vector<16x32xi32>
    %19 = tpu.iota {dimensions = array<i32: 1>} : vector<16x32xi32>
    %c2_i32_3 = arith.constant 2 : i32
    %20 = vector.broadcast %c2_i32_3 : i32 to vector<16x32xi32>
    %21 = arith.muli %20, %18 : vector<16x32xi32>
    %c0_i32_4 = arith.constant 0 : i32
    %22 = vector.broadcast %c0_i32_4 : i32 to vector<16x32xi32>
    %23 = arith.addi %21, %22 : vector<16x32xi32>
    %24 = arith.cmpi eq, %19, %23 : vector<16x32xi32>
    %25 = arith.extui %24 : vector<16x32xi1> to vector<16x32xi32>
    %26 = arith.sitofp %25 : vector<16x32xi32> to vector<16x32xf32>
    %c2_i32_5 = arith.constant 2 : i32
    %27 = vector.broadcast %c2_i32_5 : i32 to vector<16x32xi32>
    %28 = arith.muli %27, %18 : vector<16x32xi32>
    %c1_i32_6 = arith.constant 1 : i32
    %29 = vector.broadcast %c1_i32_6 : i32 to vector<16x32xi32>
    %30 = arith.addi %28, %29 : vector<16x32xi32>
    %31 = arith.cmpi eq, %19, %30 : vector<16x32xi32>
    %32 = arith.extui %31 : vector<16x32xi1> to vector<16x32xi32>
    %33 = arith.sitofp %32 : vector<16x32xi32> to vector<16x32xf32>
    %c0_7 = arith.constant 0 : index
    %c0_8 = arith.constant 0 : index
    %c0_9 = arith.constant 0 : index
    %c0_10 = arith.constant 0 : index
    %34 = vector.load %arg1[%c0_7, %c0_8, %c0_9, %c0_10] : memref<1x4x16x16xf32, #tpu.memory_space<vmem>>, vector<1x4x16x16xf32>
    %35 = vector.shape_cast %34 : vector<1x4x16x16xf32> to vector<4x16x16xf32>
    %c0_11 = arith.constant 0 : index
    %c1 = arith.constant 1 : index
    %c1_12 = arith.constant 1 : index
    %36 = vector.load %arg4[%c0_11, %c1, %c1_12] : memref<4x18x18xf32, #tpu.memory_space<vmem>>, vector<4x16x16xf32>
    tpu.vector_store %arg4[%c0_11, %c1, %c1_12], %35 {strides = array<i32>} : memref<4x18x18xf32, #tpu.memory_space<vmem>>, vector<4x16x16xf32>,
    %cst_13 = arith.constant 0.000000e+00 : f32
    %37 = vector.broadcast %cst_13 : f32 to vector<16x16xf32>
    %cst_14 = arith.constant 0.000000e+00 : f32
    %38 = vector.broadcast %cst_14 : f32 to vector<16x16xf32>
    %cst_15 = arith.constant 0.000000e+00 : f32
    %39 = vector.broadcast %cst_15 : f32 to vector<16x16xf32>
    %cst_16 = arith.constant 0.000000e+00 : f32
    %40 = vector.broadcast %cst_16 : f32 to vector<16x16xf32>
    %cst_17 = arith.constant 0.000000e+00 : f32
    %41 = vector.broadcast %cst_17 : f32 to vector<16x16xf32>
    %cst_18 = arith.constant 0.000000e+00 : f32
    %42 = vector.broadcast %cst_18 : f32 to vector<16x16xf32>
    %cst_19 = arith.constant 0.000000e+00 : f32
    %43 = vector.broadcast %cst_19 : f32 to vector<16x16xf32>
    %cst_20 = arith.constant 0.000000e+00 : f32
    %44 = vector.broadcast %cst_20 : f32 to vector<16x16xf32>
    %c0_21 = arith.constant 0 : index
    %c0_22 = arith.constant 0 : index
    %c0_23 = arith.constant 0 : index
    %45 = vector.load %arg4[%c0_21, %c0_22, %c0_23] : memref<4x18x18xf32, #tpu.memory_space<vmem>>, vector<4x16x16xf32>
    %c0_24 = arith.constant 0 : index
    %46 = memref.load %arg2[%c0_24] : memref<128xf32, #tpu.memory_space<smem>>
    %47 = vector.extract_strided_slice %45 {offsets = [0, 0, 0], sizes = [1, 16, 16], strides = [1, 1, 1]} : vector<4x16x16xf32> to vector<1x16x16xf32>
    %48 = vector.shape_cast %47 : vector<1x16x16xf32> to vector<16x16xf32>
    %49 = vector.broadcast %46 : f32 to vector<16x16xf32>
    %50 = arith.mulf %49, %48 : vector<16x16xf32>
    %51 = arith.addf %37, %50 : vector<16x16xf32>
    %c2 = arith.constant 2 : index
    %52 = memref.load %arg2[%c2] : memref<128xf32, #tpu.memory_space<smem>>
    %53 = vector.extract_strided_slice %45 {offsets = [1, 0, 0], sizes = [1, 16, 16], strides = [1, 1, 1]} : vector<4x16x16xf32> to vector<1x16x16xf32>
    %54 = vector.shape_cast %53 : vector<1x16x16xf32> to vector<16x16xf32>
    %55 = vector.broadcast %52 : f32 to vector<16x16xf32>
    %56 = arith.mulf %55, %54 : vector<16x16xf32>
    %57 = arith.addf %51, %56 : vector<16x16xf32>
    %c4 = arith.constant 4 : index
    %58 = memref.load %arg2[%c4] : memref<128xf32, #tpu.memory_space<smem>>
    %59 = vector.extract_strided_slice %45 {offsets = [2, 0, 0], sizes = [1, 16, 16], strides = [1, 1, 1]} : vector<4x16x16xf32> to vector<1x16x16xf32>
    %60 = vector.shape_cast %59 : vector<1x16x16xf32> to vector<16x16xf32>
    %61 = vector.broadcast %58 : f32 to vector<16x16xf32>
    %62 = arith.mulf %61, %60 : vector<16x16xf32>
    %63 = arith.addf %57, %62 : vector<16x16xf32>
    %c6 = arith.constant 6 : index
    %64 = memref.load %arg2[%c6] : memref<128xf32, #tpu.memory_space<smem>>
    %65 = vector.extract_strided_slice %45 {offsets = [3, 0, 0], sizes = [1, 16, 16], strides = [1, 1, 1]} : vector<4x16x16xf32> to vector<1x16x16xf32>
    %66 = vector.shape_cast %65 : vector<1x16x16xf32> to vector<16x16xf32>
    %67 = vector.broadcast %64 : f32 to vector<16x16xf32>
    %68 = arith.mulf %67, %66 : vector<16x16xf32>
    %69 = arith.addf %63, %68 : vector<16x16xf32>
    %c1_25 = arith.constant 1 : index
    %70 = memref.load %arg2[%c1_25] : memref<128xf32, #tpu.memory_space<smem>>
    %71 = vector.extract_strided_slice %45 {offsets = [0, 0, 0], sizes = [1, 16, 16], strides = [1, 1, 1]} : vector<4x16x16xf32> to vector<1x16x16xf32>
    %72 = vector.shape_cast %71 : vector<1x16x16xf32> to vector<16x16xf32>
    %73 = vector.broadcast %70 : f32 to vector<16x16xf32>
    %74 = arith.mulf %73, %72 : vector<16x16xf32>
    %75 = arith.addf %41, %74 : vector<16x16xf32>
    %c3 = arith.constant 3 : index
    %76 = memref.load %arg2[%c3] : memref<128xf32, #tpu.memory_space<smem>>
    %77 = vector.extract_strided_slice %45 {offsets = [1, 0, 0], sizes = [1, 16, 16], strides = [1, 1, 1]} : vector<4x16x16xf32> to vector<1x16x16xf32>
    %78 = vector.shape_cast %77 : vector<1x16x16xf32> to vector<16x16xf32>
    %79 = vector.broadcast %76 : f32 to vector<16x16xf32>
    %80 = arith.mulf %79, %78 : vector<16x16xf32>
    %81 = arith.addf %75, %80 : vector<16x16xf32>
    %c5 = arith.constant 5 : index
    %82 = memref.load %arg2[%c5] : memref<128xf32, #tpu.memory_space<smem>>
    %83 = vector.extract_strided_slice %45 {offsets = [2, 0, 0], sizes = [1, 16, 16], strides = [1, 1, 1]} : vector<4x16x16xf32> to vector<1x16x16xf32>
    %84 = vector.shape_cast %83 : vector<1x16x16xf32> to vector<16x16xf32>
    %85 = vector.broadcast %82 : f32 to vector<16x16xf32>
    %86 = arith.mulf %85, %84 : vector<16x16xf32>
    %87 = arith.addf %81, %86 : vector<16x16xf32>
    %c7 = arith.constant 7 : index
    %88 = memref.load %arg2[%c7] : memref<128xf32, #tpu.memory_space<smem>>
    %89 = vector.extract_strided_slice %45 {offsets = [3, 0, 0], sizes = [1, 16, 16], strides = [1, 1, 1]} : vector<4x16x16xf32> to vector<1x16x16xf32>
    %90 = vector.shape_cast %89 : vector<1x16x16xf32> to vector<16x16xf32>
    %91 = vector.broadcast %88 : f32 to vector<16x16xf32>
    %92 = arith.mulf %91, %90 : vector<16x16xf32>
    %93 = arith.addf %87, %92 : vector<16x16xf32>
    %c0_26 = arith.constant 0 : index
    %c0_27 = arith.constant 0 : index
    %c1_28 = arith.constant 1 : index
    %94 = vector.load %arg4[%c0_26, %c0_27, %c1_28] : memref<4x18x18xf32, #tpu.memory_space<vmem>>, vector<4x16x16xf32>
    %c8 = arith.constant 8 : index
    %95 = memref.load %arg2[%c8] : memref<128xf32, #tpu.memory_space<smem>>
    %96 = vector.extract_strided_slice %94 {offsets = [0, 0, 0], sizes = [1, 16, 16], strides = [1, 1, 1]} : vector<4x16x16xf32> to vector<1x16x16xf32>
    %97 = vector.shape_cast %96 : vector<1x16x16xf32> to vector<16x16xf32>
    %98 = vector.broadcast %95 : f32 to vector<16x16xf32>
    %99 = arith.mulf %98, %97 : vector<16x16xf32>
    %100 = arith.addf %69, %99 : vector<16x16xf32>
    %c10 = arith.constant 10 : index
    %101 = memref.load %arg2[%c10] : memref<128xf32, #tpu.memory_space<smem>>
    %102 = vector.extract_strided_slice %94 {offsets = [1, 0, 0], sizes = [1, 16, 16], strides = [1, 1, 1]} : vector<4x16x16xf32> to vector<1x16x16xf32>
    %103 = vector.shape_cast %102 : vector<1x16x16xf32> to vector<16x16xf32>
    %104 = vector.broadcast %101 : f32 to vector<16x16xf32>
    %105 = arith.mulf %104, %103 : vector<16x16xf32>
    %106 = arith.addf %100, %105 : vector<16x16xf32>
    %c12 = arith.constant 12 : index
    %107 = memref.load %arg2[%c12] : memref<128xf32, #tpu.memory_space<smem>>
    %108 = vector.extract_strided_slice %94 {offsets = [2, 0, 0], sizes = [1, 16, 16], strides = [1, 1, 1]} : vector<4x16x16xf32> to vector<1x16x16xf32>
    %109 = vector.shape_cast %108 : vector<1x16x16xf32> to vector<16x16xf32>
    %110 = vector.broadcast %107 : f32 to vector<16x16xf32>
    %111 = arith.mulf %110, %109 : vector<16x16xf32>
    %112 = arith.addf %106, %111 : vector<16x16xf32>
    %c14 = arith.constant 14 : index
    %113 = memref.load %arg2[%c14] : memref<128xf32, #tpu.memory_space<smem>>
    %114 = vector.extract_strided_slice %94 {offsets = [3, 0, 0], sizes = [1, 16, 16], strides = [1, 1, 1]} : vector<4x16x16xf32> to vector<1x16x16xf32>
    %115 = vector.shape_cast %114 : vector<1x16x16xf32> to vector<16x16xf32>
    %116 = vector.broadcast %113 : f32 to vector<16x16xf32>
    %117 = arith.mulf %116, %115 : vector<16x16xf32>
    %118 = arith.addf %112, %117 : vector<16x16xf32>
    %c9 = arith.constant 9 : index
    %119 = memref.load %arg2[%c9] : memref<128xf32, #tpu.memory_space<smem>>
    %120 = vector.extract_strided_slice %94 {offsets = [0, 0, 0], sizes = [1, 16, 16], strides = [1, 1, 1]} : vector<4x16x16xf32> to vector<1x16x16xf32>
    %121 = vector.shape_cast %120 : vector<1x16x16xf32> to vector<16x16xf32>
    %122 = vector.broadcast %119 : f32 to vector<16x16xf32>
    %123 = arith.mulf %122, %121 : vector<16x16xf32>
    %124 = arith.addf %93, %123 : vector<16x16xf32>
    %c11 = arith.constant 11 : index
    %125 = memref.load %arg2[%c11] : memref<128xf32, #tpu.memory_space<smem>>
    %126 = vector.extract_strided_slice %94 {offsets = [1, 0, 0], sizes = [1, 16, 16], strides = [1, 1, 1]} : vector<4x16x16xf32> to vector<1x16x16xf32>
    %127 = vector.shape_cast %126 : vector<1x16x16xf32> to vector<16x16xf32>
    %128 = vector.broadcast %125 : f32 to vector<16x16xf32>
    %129 = arith.mulf %128, %127 : vector<16x16xf32>
    %130 = arith.addf %124, %129 : vector<16x16xf32>
    %c13 = arith.constant 13 : index
    %131 = memref.load %arg2[%c13] : memref<128xf32, #tpu.memory_space<smem>>
    %132 = vector.extract_strided_slice %94 {offsets = [2, 0, 0], sizes = [1, 16, 16], strides = [1, 1, 1]} : vector<4x16x16xf32> to vector<1x16x16xf32>
    %133 = vector.shape_cast %132 : vector<1x16x16xf32> to vector<16x16xf32>
    %134 = vector.broadcast %131 : f32 to vector<16x16xf32>
    %135 = arith.mulf %134, %133 : vector<16x16xf32>
    %136 = arith.addf %130, %135 : vector<16x16xf32>
    %c15 = arith.constant 15 : index
    %137 = memref.load %arg2[%c15] : memref<128xf32, #tpu.memory_space<smem>>
    %138 = vector.extract_strided_slice %94 {offsets = [3, 0, 0], sizes = [1, 16, 16], strides = [1, 1, 1]} : vector<4x16x16xf32> to vector<1x16x16xf32>
    %139 = vector.shape_cast %138 : vector<1x16x16xf32> to vector<16x16xf32>
    %140 = vector.broadcast %137 : f32 to vector<16x16xf32>
    %141 = arith.mulf %140, %139 : vector<16x16xf32>
    %142 = arith.addf %136, %141 : vector<16x16xf32>
    %c32 = arith.constant 32 : index
    %143 = memref.load %arg2[%c32] : memref<128xf32, #tpu.memory_space<smem>>
    %144 = vector.extract_strided_slice %94 {offsets = [0, 0, 0], sizes = [1, 16, 16], strides = [1, 1, 1]} : vector<4x16x16xf32> to vector<1x16x16xf32>
    %145 = vector.shape_cast %144 : vector<1x16x16xf32> to vector<16x16xf32>
    %146 = vector.broadcast %143 : f32 to vector<16x16xf32>
    %147 = arith.mulf %146, %145 : vector<16x16xf32>
    %148 = arith.addf %38, %147 : vector<16x16xf32>
    %c34 = arith.constant 34 : index
    %149 = memref.load %arg2[%c34] : memref<128xf32, #tpu.memory_space<smem>>
    %150 = vector.extract_strided_slice %94 {offsets = [1, 0, 0], sizes = [1, 16, 16], strides = [1, 1, 1]} : vector<4x16x16xf32> to vector<1x16x16xf32>
    %151 = vector.shape_cast %150 : vector<1x16x16xf32> to vector<16x16xf32>
    %152 = vector.broadcast %149 : f32 to vector<16x16xf32>
    %153 = arith.mulf %152, %151 : vector<16x16xf32>
    %154 = arith.addf %148, %153 : vector<16x16xf32>
    %c36 = arith.constant 36 : index
    %155 = memref.load %arg2[%c36] : memref<128xf32, #tpu.memory_space<smem>>
    %156 = vector.extract_strided_slice %94 {offsets = [2, 0, 0], sizes = [1, 16, 16], strides = [1, 1, 1]} : vector<4x16x16xf32> to vector<1x16x16xf32>
    %157 = vector.shape_cast %156 : vector<1x16x16xf32> to vector<16x16xf32>
    %158 = vector.broadcast %155 : f32 to vector<16x16xf32>
    %159 = arith.mulf %158, %157 : vector<16x16xf32>
    %160 = arith.addf %154, %159 : vector<16x16xf32>
    %c38 = arith.constant 38 : index
    %161 = memref.load %arg2[%c38] : memref<128xf32, #tpu.memory_space<smem>>
    %162 = vector.extract_strided_slice %94 {offsets = [3, 0, 0], sizes = [1, 16, 16], strides = [1, 1, 1]} : vector<4x16x16xf32> to vector<1x16x16xf32>
    %163 = vector.shape_cast %162 : vector<1x16x16xf32> to vector<16x16xf32>
    %164 = vector.broadcast %161 : f32 to vector<16x16xf32>
    %165 = arith.mulf %164, %163 : vector<16x16xf32>
    %166 = arith.addf %160, %165 : vector<16x16xf32>
    %c33 = arith.constant 33 : index
    %167 = memref.load %arg2[%c33] : memref<128xf32, #tpu.memory_space<smem>>
    %168 = vector.extract_strided_slice %94 {offsets = [0, 0, 0], sizes = [1, 16, 16], strides = [1, 1, 1]} : vector<4x16x16xf32> to vector<1x16x16xf32>
    %169 = vector.shape_cast %168 : vector<1x16x16xf32> to vector<16x16xf32>
    %170 = vector.broadcast %167 : f32 to vector<16x16xf32>
    %171 = arith.mulf %170, %169 : vector<16x16xf32>
    %172 = arith.addf %42, %171 : vector<16x16xf32>
    %c35 = arith.constant 35 : index
    %173 = memref.load %arg2[%c35] : memref<128xf32, #tpu.memory_space<smem>>
    %174 = vector.extract_strided_slice %94 {offsets = [1, 0, 0], sizes = [1, 16, 16], strides = [1, 1, 1]} : vector<4x16x16xf32> to vector<1x16x16xf32>
    %175 = vector.shape_cast %174 : vector<1x16x16xf32> to vector<16x16xf32>
    %176 = vector.broadcast %173 : f32 to vector<16x16xf32>
    %177 = arith.mulf %176, %175 : vector<16x16xf32>
    %178 = arith.addf %172, %177 : vector<16x16xf32>
    %c37 = arith.constant 37 : index
    %179 = memref.load %arg2[%c37] : memref<128xf32, #tpu.memory_space<smem>>
    %180 = vector.extract_strided_slice %94 {offsets = [2, 0, 0], sizes = [1, 16, 16], strides = [1, 1, 1]} : vector<4x16x16xf32> to vector<1x16x16xf32>
    %181 = vector.shape_cast %180 : vector<1x16x16xf32> to vector<16x16xf32>
    %182 = vector.broadcast %179 : f32 to vector<16x16xf32>
    %183 = arith.mulf %182, %181 : vector<16x16xf32>
    %184 = arith.addf %178, %183 : vector<16x16xf32>
    %c39 = arith.constant 39 : index
    %185 = memref.load %arg2[%c39] : memref<128xf32, #tpu.memory_space<smem>>
    %186 = vector.extract_strided_slice %94 {offsets = [3, 0, 0], sizes = [1, 16, 16], strides = [1, 1, 1]} : vector<4x16x16xf32> to vector<1x16x16xf32>
    %187 = vector.shape_cast %186 : vector<1x16x16xf32> to vector<16x16xf32>
    %188 = vector.broadcast %185 : f32 to vector<16x16xf32>
    %189 = arith.mulf %188, %187 : vector<16x16xf32>
    %190 = arith.addf %184, %189 : vector<16x16xf32>
    %c0_29 = arith.constant 0 : index
    %c0_30 = arith.constant 0 : index
    %c2_31 = arith.constant 2 : index
    %191 = vector.load %arg4[%c0_29, %c0_30, %c2_31] : memref<4x18x18xf32, #tpu.memory_space<vmem>>, vector<4x16x16xf32>
    %c40 = arith.constant 40 : index
    %192 = memref.load %arg2[%c40] : memref<128xf32, #tpu.memory_space<smem>>
    %193 = vector.extract_strided_slice %191 {offsets = [0, 0, 0], sizes = [1, 16, 16], strides = [1, 1, 1]} : vector<4x16x16xf32> to vector<1x16x16xf32>
    %194 = vector.shape_cast %193 : vector<1x16x16xf32> to vector<16x16xf32>
    %195 = vector.broadcast %192 : f32 to vector<16x16xf32>
    %196 = arith.mulf %195, %194 : vector<16x16xf32>
    %197 = arith.addf %166, %196 : vector<16x16xf32>
    %c42 = arith.constant 42 : index
    %198 = memref.load %arg2[%c42] : memref<128xf32, #tpu.memory_space<smem>>
    %199 = vector.extract_strided_slice %191 {offsets = [1, 0, 0], sizes = [1, 16, 16], strides = [1, 1, 1]} : vector<4x16x16xf32> to vector<1x16x16xf32>
    %200 = vector.shape_cast %199 : vector<1x16x16xf32> to vector<16x16xf32>
    %201 = vector.broadcast %198 : f32 to vector<16x16xf32>
    %202 = arith.mulf %201, %200 : vector<16x16xf32>
    %203 = arith.addf %197, %202 : vector<16x16xf32>
    %c44 = arith.constant 44 : index
    %204 = memref.load %arg2[%c44] : memref<128xf32, #tpu.memory_space<smem>>
    %205 = vector.extract_strided_slice %191 {offsets = [2, 0, 0], sizes = [1, 16, 16], strides = [1, 1, 1]} : vector<4x16x16xf32> to vector<1x16x16xf32>
    %206 = vector.shape_cast %205 : vector<1x16x16xf32> to vector<16x16xf32>
    %207 = vector.broadcast %204 : f32 to vector<16x16xf32>
    %208 = arith.mulf %207, %206 : vector<16x16xf32>
    %209 = arith.addf %203, %208 : vector<16x16xf32>
    %c46 = arith.constant 46 : index
    %210 = memref.load %arg2[%c46] : memref<128xf32, #tpu.memory_space<smem>>
    %211 = vector.extract_strided_slice %191 {offsets = [3, 0, 0], sizes = [1, 16, 16], strides = [1, 1, 1]} : vector<4x16x16xf32> to vector<1x16x16xf32>
    %212 = vector.shape_cast %211 : vector<1x16x16xf32> to vector<16x16xf32>
    %213 = vector.broadcast %210 : f32 to vector<16x16xf32>
    %214 = arith.mulf %213, %212 : vector<16x16xf32>
    %215 = arith.addf %209, %214 : vector<16x16xf32>
    %c41 = arith.constant 41 : index
    %216 = memref.load %arg2[%c41] : memref<128xf32, #tpu.memory_space<smem>>
    %217 = vector.extract_strided_slice %191 {offsets = [0, 0, 0], sizes = [1, 16, 16], strides = [1, 1, 1]} : vector<4x16x16xf32> to vector<1x16x16xf32>
    %218 = vector.shape_cast %217 : vector<1x16x16xf32> to vector<16x16xf32>
    %219 = vector.broadcast %216 : f32 to vector<16x16xf32>
    %220 = arith.mulf %219, %218 : vector<16x16xf32>
    %221 = arith.addf %190, %220 : vector<16x16xf32>
    %c43 = arith.constant 43 : index
    %222 = memref.load %arg2[%c43] : memref<128xf32, #tpu.memory_space<smem>>
    %223 = vector.extract_strided_slice %191 {offsets = [1, 0, 0], sizes = [1, 16, 16], strides = [1, 1, 1]} : vector<4x16x16xf32> to vector<1x16x16xf32>
    %224 = vector.shape_cast %223 : vector<1x16x16xf32> to vector<16x16xf32>
    %225 = vector.broadcast %222 : f32 to vector<16x16xf32>
    %226 = arith.mulf %225, %224 : vector<16x16xf32>
    %227 = arith.addf %221, %226 : vector<16x16xf32>
    %c45 = arith.constant 45 : index
    %228 = memref.load %arg2[%c45] : memref<128xf32, #tpu.memory_space<smem>>
    %229 = vector.extract_strided_slice %191 {offsets = [2, 0, 0], sizes = [1, 16, 16], strides = [1, 1, 1]} : vector<4x16x16xf32> to vector<1x16x16xf32>
    %230 = vector.shape_cast %229 : vector<1x16x16xf32> to vector<16x16xf32>
    %231 = vector.broadcast %228 : f32 to vector<16x16xf32>
    %232 = arith.mulf %231, %230 : vector<16x16xf32>
    %233 = arith.addf %227, %232 : vector<16x16xf32>
    %c47 = arith.constant 47 : index
    %234 = memref.load %arg2[%c47] : memref<128xf32, #tpu.memory_space<smem>>
    %235 = vector.extract_strided_slice %191 {offsets = [3, 0, 0], sizes = [1, 16, 16], strides = [1, 1, 1]} : vector<4x16x16xf32> to vector<1x16x16xf32>
    %236 = vector.shape_cast %235 : vector<1x16x16xf32> to vector<16x16xf32>
    %237 = vector.broadcast %234 : f32 to vector<16x16xf32>
    %238 = arith.mulf %237, %236 : vector<16x16xf32>
    %239 = arith.addf %233, %238 : vector<16x16xf32>
    %c0_32 = arith.constant 0 : index
    %c1_33 = arith.constant 1 : index
    %c0_34 = arith.constant 0 : index
    %240 = vector.load %arg4[%c0_32, %c1_33, %c0_34] : memref<4x18x18xf32, #tpu.memory_space<vmem>>, vector<4x16x16xf32>
    %c16 = arith.constant 16 : index
    %241 = memref.load %arg2[%c16] : memref<128xf32, #tpu.memory_space<smem>>
    %242 = vector.extract_strided_slice %240 {offsets = [0, 0, 0], sizes = [1, 16, 16], strides = [1, 1, 1]} : vector<4x16x16xf32> to vector<1x16x16xf32>
    %243 = vector.shape_cast %242 : vector<1x16x16xf32> to vector<16x16xf32>
    %244 = vector.broadcast %241 : f32 to vector<16x16xf32>
    %245 = arith.mulf %244, %243 : vector<16x16xf32>
    %246 = arith.addf %118, %245 : vector<16x16xf32>
    %c18 = arith.constant 18 : index
    %247 = memref.load %arg2[%c18] : memref<128xf32, #tpu.memory_space<smem>>
    %248 = vector.extract_strided_slice %240 {offsets = [1, 0, 0], sizes = [1, 16, 16], strides = [1, 1, 1]} : vector<4x16x16xf32> to vector<1x16x16xf32>
    %249 = vector.shape_cast %248 : vector<1x16x16xf32> to vector<16x16xf32>
    %250 = vector.broadcast %247 : f32 to vector<16x16xf32>
    %251 = arith.mulf %250, %249 : vector<16x16xf32>
    %252 = arith.addf %246, %251 : vector<16x16xf32>
    %c20 = arith.constant 20 : index
    %253 = memref.load %arg2[%c20] : memref<128xf32, #tpu.memory_space<smem>>
    %254 = vector.extract_strided_slice %240 {offsets = [2, 0, 0], sizes = [1, 16, 16], strides = [1, 1, 1]} : vector<4x16x16xf32> to vector<1x16x16xf32>
    %255 = vector.shape_cast %254 : vector<1x16x16xf32> to vector<16x16xf32>
    %256 = vector.broadcast %253 : f32 to vector<16x16xf32>
    %257 = arith.mulf %256, %255 : vector<16x16xf32>
    %258 = arith.addf %252, %257 : vector<16x16xf32>
    %c22 = arith.constant 22 : index
    %259 = memref.load %arg2[%c22] : memref<128xf32, #tpu.memory_space<smem>>
    %260 = vector.extract_strided_slice %240 {offsets = [3, 0, 0], sizes = [1, 16, 16], strides = [1, 1, 1]} : vector<4x16x16xf32> to vector<1x16x16xf32>
    %261 = vector.shape_cast %260 : vector<1x16x16xf32> to vector<16x16xf32>
    %262 = vector.broadcast %259 : f32 to vector<16x16xf32>
    %263 = arith.mulf %262, %261 : vector<16x16xf32>
    %264 = arith.addf %258, %263 : vector<16x16xf32>
    %c17 = arith.constant 17 : index
    %265 = memref.load %arg2[%c17] : memref<128xf32, #tpu.memory_space<smem>>
    %266 = vector.extract_strided_slice %240 {offsets = [0, 0, 0], sizes = [1, 16, 16], strides = [1, 1, 1]} : vector<4x16x16xf32> to vector<1x16x16xf32>
    %267 = vector.shape_cast %266 : vector<1x16x16xf32> to vector<16x16xf32>
    %268 = vector.broadcast %265 : f32 to vector<16x16xf32>
    %269 = arith.mulf %268, %267 : vector<16x16xf32>
    %270 = arith.addf %142, %269 : vector<16x16xf32>
    %c19 = arith.constant 19 : index
    %271 = memref.load %arg2[%c19] : memref<128xf32, #tpu.memory_space<smem>>
    %272 = vector.extract_strided_slice %240 {offsets = [1, 0, 0], sizes = [1, 16, 16], strides = [1, 1, 1]} : vector<4x16x16xf32> to vector<1x16x16xf32>
    %273 = vector.shape_cast %272 : vector<1x16x16xf32> to vector<16x16xf32>
    %274 = vector.broadcast %271 : f32 to vector<16x16xf32>
    %275 = arith.mulf %274, %273 : vector<16x16xf32>
    %276 = arith.addf %270, %275 : vector<16x16xf32>
    %c21 = arith.constant 21 : index
    %277 = memref.load %arg2[%c21] : memref<128xf32, #tpu.memory_space<smem>>
    %278 = vector.extract_strided_slice %240 {offsets = [2, 0, 0], sizes = [1, 16, 16], strides = [1, 1, 1]} : vector<4x16x16xf32> to vector<1x16x16xf32>
    %279 = vector.shape_cast %278 : vector<1x16x16xf32> to vector<16x16xf32>
    %280 = vector.broadcast %277 : f32 to vector<16x16xf32>
    %281 = arith.mulf %280, %279 : vector<16x16xf32>
    %282 = arith.addf %276, %281 : vector<16x16xf32>
    %c23 = arith.constant 23 : index
    %283 = memref.load %arg2[%c23] : memref<128xf32, #tpu.memory_space<smem>>
    %284 = vector.extract_strided_slice %240 {offsets = [3, 0, 0], sizes = [1, 16, 16], strides = [1, 1, 1]} : vector<4x16x16xf32> to vector<1x16x16xf32>
    %285 = vector.shape_cast %284 : vector<1x16x16xf32> to vector<16x16xf32>
    %286 = vector.broadcast %283 : f32 to vector<16x16xf32>
    %287 = arith.mulf %286, %285 : vector<16x16xf32>
    %288 = arith.addf %282, %287 : vector<16x16xf32>
    %c64 = arith.constant 64 : index
    %289 = memref.load %arg2[%c64] : memref<128xf32, #tpu.memory_space<smem>>
    %290 = vector.extract_strided_slice %240 {offsets = [0, 0, 0], sizes = [1, 16, 16], strides = [1, 1, 1]} : vector<4x16x16xf32> to vector<1x16x16xf32>
    %291 = vector.shape_cast %290 : vector<1x16x16xf32> to vector<16x16xf32>
    %292 = vector.broadcast %289 : f32 to vector<16x16xf32>
    %293 = arith.mulf %292, %291 : vector<16x16xf32>
    %294 = arith.addf %39, %293 : vector<16x16xf32>
    %c66 = arith.constant 66 : index
    %295 = memref.load %arg2[%c66] : memref<128xf32, #tpu.memory_space<smem>>
    %296 = vector.extract_strided_slice %240 {offsets = [1, 0, 0], sizes = [1, 16, 16], strides = [1, 1, 1]} : vector<4x16x16xf32> to vector<1x16x16xf32>
    %297 = vector.shape_cast %296 : vector<1x16x16xf32> to vector<16x16xf32>
    %298 = vector.broadcast %295 : f32 to vector<16x16xf32>
    %299 = arith.mulf %298, %297 : vector<16x16xf32>
    %300 = arith.addf %294, %299 : vector<16x16xf32>
    %c68 = arith.constant 68 : index
    %301 = memref.load %arg2[%c68] : memref<128xf32, #tpu.memory_space<smem>>
    %302 = vector.extract_strided_slice %240 {offsets = [2, 0, 0], sizes = [1, 16, 16], strides = [1, 1, 1]} : vector<4x16x16xf32> to vector<1x16x16xf32>
    %303 = vector.shape_cast %302 : vector<1x16x16xf32> to vector<16x16xf32>
    %304 = vector.broadcast %301 : f32 to vector<16x16xf32>
    %305 = arith.mulf %304, %303 : vector<16x16xf32>
    %306 = arith.addf %300, %305 : vector<16x16xf32>
    %c70 = arith.constant 70 : index
    %307 = memref.load %arg2[%c70] : memref<128xf32, #tpu.memory_space<smem>>
    %308 = vector.extract_strided_slice %240 {offsets = [3, 0, 0], sizes = [1, 16, 16], strides = [1, 1, 1]} : vector<4x16x16xf32> to vector<1x16x16xf32>
    %309 = vector.shape_cast %308 : vector<1x16x16xf32> to vector<16x16xf32>
    %310 = vector.broadcast %307 : f32 to vector<16x16xf32>
    %311 = arith.mulf %310, %309 : vector<16x16xf32>
    %312 = arith.addf %306, %311 : vector<16x16xf32>
    %c65 = arith.constant 65 : index
    %313 = memref.load %arg2[%c65] : memref<128xf32, #tpu.memory_space<smem>>
    %314 = vector.extract_strided_slice %240 {offsets = [0, 0, 0], sizes = [1, 16, 16], strides = [1, 1, 1]} : vector<4x16x16xf32> to vector<1x16x16xf32>
    %315 = vector.shape_cast %314 : vector<1x16x16xf32> to vector<16x16xf32>
    %316 = vector.broadcast %313 : f32 to vector<16x16xf32>
    %317 = arith.mulf %316, %315 : vector<16x16xf32>
    %318 = arith.addf %43, %317 : vector<16x16xf32>
    %c67 = arith.constant 67 : index
    %319 = memref.load %arg2[%c67] : memref<128xf32, #tpu.memory_space<smem>>
    %320 = vector.extract_strided_slice %240 {offsets = [1, 0, 0], sizes = [1, 16, 16], strides = [1, 1, 1]} : vector<4x16x16xf32> to vector<1x16x16xf32>
    %321 = vector.shape_cast %320 : vector<1x16x16xf32> to vector<16x16xf32>
    %322 = vector.broadcast %319 : f32 to vector<16x16xf32>
    %323 = arith.mulf %322, %321 : vector<16x16xf32>
    %324 = arith.addf %318, %323 : vector<16x16xf32>
    %c69 = arith.constant 69 : index
    %325 = memref.load %arg2[%c69] : memref<128xf32, #tpu.memory_space<smem>>
    %326 = vector.extract_strided_slice %240 {offsets = [2, 0, 0], sizes = [1, 16, 16], strides = [1, 1, 1]} : vector<4x16x16xf32> to vector<1x16x16xf32>
    %327 = vector.shape_cast %326 : vector<1x16x16xf32> to vector<16x16xf32>
    %328 = vector.broadcast %325 : f32 to vector<16x16xf32>
    %329 = arith.mulf %328, %327 : vector<16x16xf32>
    %330 = arith.addf %324, %329 : vector<16x16xf32>
    %c71 = arith.constant 71 : index
    %331 = memref.load %arg2[%c71] : memref<128xf32, #tpu.memory_space<smem>>
    %332 = vector.extract_strided_slice %240 {offsets = [3, 0, 0], sizes = [1, 16, 16], strides = [1, 1, 1]} : vector<4x16x16xf32> to vector<1x16x16xf32>
    %333 = vector.shape_cast %332 : vector<1x16x16xf32> to vector<16x16xf32>
    %334 = vector.broadcast %331 : f32 to vector<16x16xf32>
    %335 = arith.mulf %334, %333 : vector<16x16xf32>
    %336 = arith.addf %330, %335 : vector<16x16xf32>
    %c0_35 = arith.constant 0 : index
    %c1_36 = arith.constant 1 : index
    %c1_37 = arith.constant 1 : index
    %337 = vector.load %arg4[%c0_35, %c1_36, %c1_37] : memref<4x18x18xf32, #tpu.memory_space<vmem>>, vector<4x16x16xf32>
    %c24 = arith.constant 24 : index
    %338 = memref.load %arg2[%c24] : memref<128xf32, #tpu.memory_space<smem>>
    %339 = vector.extract_strided_slice %337 {offsets = [0, 0, 0], sizes = [1, 16, 16], strides = [1, 1, 1]} : vector<4x16x16xf32> to vector<1x16x16xf32>
    %340 = vector.shape_cast %339 : vector<1x16x16xf32> to vector<16x16xf32>
    %341 = vector.broadcast %338 : f32 to vector<16x16xf32>
    %342 = arith.mulf %341, %340 : vector<16x16xf32>
    %343 = arith.addf %264, %342 : vector<16x16xf32>
    %c26 = arith.constant 26 : index
    %344 = memref.load %arg2[%c26] : memref<128xf32, #tpu.memory_space<smem>>
    %345 = vector.extract_strided_slice %337 {offsets = [1, 0, 0], sizes = [1, 16, 16], strides = [1, 1, 1]} : vector<4x16x16xf32> to vector<1x16x16xf32>
    %346 = vector.shape_cast %345 : vector<1x16x16xf32> to vector<16x16xf32>
    %347 = vector.broadcast %344 : f32 to vector<16x16xf32>
    %348 = arith.mulf %347, %346 : vector<16x16xf32>
    %349 = arith.addf %343, %348 : vector<16x16xf32>
    %c28 = arith.constant 28 : index
    %350 = memref.load %arg2[%c28] : memref<128xf32, #tpu.memory_space<smem>>
    %351 = vector.extract_strided_slice %337 {offsets = [2, 0, 0], sizes = [1, 16, 16], strides = [1, 1, 1]} : vector<4x16x16xf32> to vector<1x16x16xf32>
    %352 = vector.shape_cast %351 : vector<1x16x16xf32> to vector<16x16xf32>
    %353 = vector.broadcast %350 : f32 to vector<16x16xf32>
    %354 = arith.mulf %353, %352 : vector<16x16xf32>
    %355 = arith.addf %349, %354 : vector<16x16xf32>
    %c30 = arith.constant 30 : index
    %356 = memref.load %arg2[%c30] : memref<128xf32, #tpu.memory_space<smem>>
    %357 = vector.extract_strided_slice %337 {offsets = [3, 0, 0], sizes = [1, 16, 16], strides = [1, 1, 1]} : vector<4x16x16xf32> to vector<1x16x16xf32>
    %358 = vector.shape_cast %357 : vector<1x16x16xf32> to vector<16x16xf32>
    %359 = vector.broadcast %356 : f32 to vector<16x16xf32>
    %360 = arith.mulf %359, %358 : vector<16x16xf32>
    %361 = arith.addf %355, %360 : vector<16x16xf32>
    %c25 = arith.constant 25 : index
    %362 = memref.load %arg2[%c25] : memref<128xf32, #tpu.memory_space<smem>>
    %363 = vector.extract_strided_slice %337 {offsets = [0, 0, 0], sizes = [1, 16, 16], strides = [1, 1, 1]} : vector<4x16x16xf32> to vector<1x16x16xf32>
    %364 = vector.shape_cast %363 : vector<1x16x16xf32> to vector<16x16xf32>
    %365 = vector.broadcast %362 : f32 to vector<16x16xf32>
    %366 = arith.mulf %365, %364 : vector<16x16xf32>
    %367 = arith.addf %288, %366 : vector<16x16xf32>
    %c27 = arith.constant 27 : index
    %368 = memref.load %arg2[%c27] : memref<128xf32, #tpu.memory_space<smem>>
    %369 = vector.extract_strided_slice %337 {offsets = [1, 0, 0], sizes = [1, 16, 16], strides = [1, 1, 1]} : vector<4x16x16xf32> to vector<1x16x16xf32>
    %370 = vector.shape_cast %369 : vector<1x16x16xf32> to vector<16x16xf32>
    %371 = vector.broadcast %368 : f32 to vector<16x16xf32>
    %372 = arith.mulf %371, %370 : vector<16x16xf32>
    %373 = arith.addf %367, %372 : vector<16x16xf32>
    %c29 = arith.constant 29 : index
    %374 = memref.load %arg2[%c29] : memref<128xf32, #tpu.memory_space<smem>>
    %375 = vector.extract_strided_slice %337 {offsets = [2, 0, 0], sizes = [1, 16, 16], strides = [1, 1, 1]} : vector<4x16x16xf32> to vector<1x16x16xf32>
    %376 = vector.shape_cast %375 : vector<1x16x16xf32> to vector<16x16xf32>
    %377 = vector.broadcast %374 : f32 to vector<16x16xf32>
    %378 = arith.mulf %377, %376 : vector<16x16xf32>
    %379 = arith.addf %373, %378 : vector<16x16xf32>
    %c31 = arith.constant 31 : index
    %380 = memref.load %arg2[%c31] : memref<128xf32, #tpu.memory_space<smem>>
    %381 = vector.extract_strided_slice %337 {offsets = [3, 0, 0], sizes = [1, 16, 16], strides = [1, 1, 1]} : vector<4x16x16xf32> to vector<1x16x16xf32>
    %382 = vector.shape_cast %381 : vector<1x16x16xf32> to vector<16x16xf32>
    %383 = vector.broadcast %380 : f32 to vector<16x16xf32>
    %384 = arith.mulf %383, %382 : vector<16x16xf32>
    %385 = arith.addf %379, %384 : vector<16x16xf32>
    %c48 = arith.constant 48 : index
    %386 = memref.load %arg2[%c48] : memref<128xf32, #tpu.memory_space<smem>>
    %387 = vector.extract_strided_slice %337 {offsets = [0, 0, 0], sizes = [1, 16, 16], strides = [1, 1, 1]} : vector<4x16x16xf32> to vector<1x16x16xf32>
    %388 = vector.shape_cast %387 : vector<1x16x16xf32> to vector<16x16xf32>
    %389 = vector.broadcast %386 : f32 to vector<16x16xf32>
    %390 = arith.mulf %389, %388 : vector<16x16xf32>
    %391 = arith.addf %215, %390 : vector<16x16xf32>
    %c50 = arith.constant 50 : index
    %392 = memref.load %arg2[%c50] : memref<128xf32, #tpu.memory_space<smem>>
    %393 = vector.extract_strided_slice %337 {offsets = [1, 0, 0], sizes = [1, 16, 16], strides = [1, 1, 1]} : vector<4x16x16xf32> to vector<1x16x16xf32>
    %394 = vector.shape_cast %393 : vector<1x16x16xf32> to vector<16x16xf32>
    %395 = vector.broadcast %392 : f32 to vector<16x16xf32>
    %396 = arith.mulf %395, %394 : vector<16x16xf32>
    %397 = arith.addf %391, %396 : vector<16x16xf32>
    %c52 = arith.constant 52 : index
    %398 = memref.load %arg2[%c52] : memref<128xf32, #tpu.memory_space<smem>>
    %399 = vector.extract_strided_slice %337 {offsets = [2, 0, 0], sizes = [1, 16, 16], strides = [1, 1, 1]} : vector<4x16x16xf32> to vector<1x16x16xf32>
    %400 = vector.shape_cast %399 : vector<1x16x16xf32> to vector<16x16xf32>
    %401 = vector.broadcast %398 : f32 to vector<16x16xf32>
    %402 = arith.mulf %401, %400 : vector<16x16xf32>
    %403 = arith.addf %397, %402 : vector<16x16xf32>
    %c54 = arith.constant 54 : index
    %404 = memref.load %arg2[%c54] : memref<128xf32, #tpu.memory_space<smem>>
    %405 = vector.extract_strided_slice %337 {offsets = [3, 0, 0], sizes = [1, 16, 16], strides = [1, 1, 1]} : vector<4x16x16xf32> to vector<1x16x16xf32>
    %406 = vector.shape_cast %405 : vector<1x16x16xf32> to vector<16x16xf32>
    %407 = vector.broadcast %404 : f32 to vector<16x16xf32>
    %408 = arith.mulf %407, %406 : vector<16x16xf32>
    %409 = arith.addf %403, %408 : vector<16x16xf32>
    %c49 = arith.constant 49 : index
    %410 = memref.load %arg2[%c49] : memref<128xf32, #tpu.memory_space<smem>>
    %411 = vector.extract_strided_slice %337 {offsets = [0, 0, 0], sizes = [1, 16, 16], strides = [1, 1, 1]} : vector<4x16x16xf32> to vector<1x16x16xf32>
    %412 = vector.shape_cast %411 : vector<1x16x16xf32> to vector<16x16xf32>
    %413 = vector.broadcast %410 : f32 to vector<16x16xf32>
    %414 = arith.mulf %413, %412 : vector<16x16xf32>
    %415 = arith.addf %239, %414 : vector<16x16xf32>
    %c51 = arith.constant 51 : index
    %416 = memref.load %arg2[%c51] : memref<128xf32, #tpu.memory_space<smem>>
    %417 = vector.extract_strided_slice %337 {offsets = [1, 0, 0], sizes = [1, 16, 16], strides = [1, 1, 1]} : vector<4x16x16xf32> to vector<1x16x16xf32>
    %418 = vector.shape_cast %417 : vector<1x16x16xf32> to vector<16x16xf32>
    %419 = vector.broadcast %416 : f32 to vector<16x16xf32>
    %420 = arith.mulf %419, %418 : vector<16x16xf32>
    %421 = arith.addf %415, %420 : vector<16x16xf32>
    %c53 = arith.constant 53 : index
    %422 = memref.load %arg2[%c53] : memref<128xf32, #tpu.memory_space<smem>>
    %423 = vector.extract_strided_slice %337 {offsets = [2, 0, 0], sizes = [1, 16, 16], strides = [1, 1, 1]} : vector<4x16x16xf32> to vector<1x16x16xf32>
    %424 = vector.shape_cast %423 : vector<1x16x16xf32> to vector<16x16xf32>
    %425 = vector.broadcast %422 : f32 to vector<16x16xf32>
    %426 = arith.mulf %425, %424 : vector<16x16xf32>
    %427 = arith.addf %421, %426 : vector<16x16xf32>
    %c55 = arith.constant 55 : index
    %428 = memref.load %arg2[%c55] : memref<128xf32, #tpu.memory_space<smem>>
    %429 = vector.extract_strided_slice %337 {offsets = [3, 0, 0], sizes = [1, 16, 16], strides = [1, 1, 1]} : vector<4x16x16xf32> to vector<1x16x16xf32>
    %430 = vector.shape_cast %429 : vector<1x16x16xf32> to vector<16x16xf32>
    %431 = vector.broadcast %428 : f32 to vector<16x16xf32>
    %432 = arith.mulf %431, %430 : vector<16x16xf32>
    %433 = arith.addf %427, %432 : vector<16x16xf32>
    %c72 = arith.constant 72 : index
    %434 = memref.load %arg2[%c72] : memref<128xf32, #tpu.memory_space<smem>>
    %435 = vector.extract_strided_slice %337 {offsets = [0, 0, 0], sizes = [1, 16, 16], strides = [1, 1, 1]} : vector<4x16x16xf32> to vector<1x16x16xf32>
    %436 = vector.shape_cast %435 : vector<1x16x16xf32> to vector<16x16xf32>
    %437 = vector.broadcast %434 : f32 to vector<16x16xf32>
    %438 = arith.mulf %437, %436 : vector<16x16xf32>
    %439 = arith.addf %312, %438 : vector<16x16xf32>
    %c74 = arith.constant 74 : index
    %440 = memref.load %arg2[%c74] : memref<128xf32, #tpu.memory_space<smem>>
    %441 = vector.extract_strided_slice %337 {offsets = [1, 0, 0], sizes = [1, 16, 16], strides = [1, 1, 1]} : vector<4x16x16xf32> to vector<1x16x16xf32>
    %442 = vector.shape_cast %441 : vector<1x16x16xf32> to vector<16x16xf32>
    %443 = vector.broadcast %440 : f32 to vector<16x16xf32>
    %444 = arith.mulf %443, %442 : vector<16x16xf32>
    %445 = arith.addf %439, %444 : vector<16x16xf32>
    %c76 = arith.constant 76 : index
    %446 = memref.load %arg2[%c76] : memref<128xf32, #tpu.memory_space<smem>>
    %447 = vector.extract_strided_slice %337 {offsets = [2, 0, 0], sizes = [1, 16, 16], strides = [1, 1, 1]} : vector<4x16x16xf32> to vector<1x16x16xf32>
    %448 = vector.shape_cast %447 : vector<1x16x16xf32> to vector<16x16xf32>
    %449 = vector.broadcast %446 : f32 to vector<16x16xf32>
    %450 = arith.mulf %449, %448 : vector<16x16xf32>
    %451 = arith.addf %445, %450 : vector<16x16xf32>
    %c78 = arith.constant 78 : index
    %452 = memref.load %arg2[%c78] : memref<128xf32, #tpu.memory_space<smem>>
    %453 = vector.extract_strided_slice %337 {offsets = [3, 0, 0], sizes = [1, 16, 16], strides = [1, 1, 1]} : vector<4x16x16xf32> to vector<1x16x16xf32>
    %454 = vector.shape_cast %453 : vector<1x16x16xf32> to vector<16x16xf32>
    %455 = vector.broadcast %452 : f32 to vector<16x16xf32>
    %456 = arith.mulf %455, %454 : vector<16x16xf32>
    %457 = arith.addf %451, %456 : vector<16x16xf32>
    %c73 = arith.constant 73 : index
    %458 = memref.load %arg2[%c73] : memref<128xf32, #tpu.memory_space<smem>>
    %459 = vector.extract_strided_slice %337 {offsets = [0, 0, 0], sizes = [1, 16, 16], strides = [1, 1, 1]} : vector<4x16x16xf32> to vector<1x16x16xf32>
    %460 = vector.shape_cast %459 : vector<1x16x16xf32> to vector<16x16xf32>
    %461 = vector.broadcast %458 : f32 to vector<16x16xf32>
    %462 = arith.mulf %461, %460 : vector<16x16xf32>
    %463 = arith.addf %336, %462 : vector<16x16xf32>
    %c75 = arith.constant 75 : index
    %464 = memref.load %arg2[%c75] : memref<128xf32, #tpu.memory_space<smem>>
    %465 = vector.extract_strided_slice %337 {offsets = [1, 0, 0], sizes = [1, 16, 16], strides = [1, 1, 1]} : vector<4x16x16xf32> to vector<1x16x16xf32>
    %466 = vector.shape_cast %465 : vector<1x16x16xf32> to vector<16x16xf32>
    %467 = vector.broadcast %464 : f32 to vector<16x16xf32>
    %468 = arith.mulf %467, %466 : vector<16x16xf32>
    %469 = arith.addf %463, %468 : vector<16x16xf32>
    %c77 = arith.constant 77 : index
    %470 = memref.load %arg2[%c77] : memref<128xf32, #tpu.memory_space<smem>>
    %471 = vector.extract_strided_slice %337 {offsets = [2, 0, 0], sizes = [1, 16, 16], strides = [1, 1, 1]} : vector<4x16x16xf32> to vector<1x16x16xf32>
    %472 = vector.shape_cast %471 : vector<1x16x16xf32> to vector<16x16xf32>
    %473 = vector.broadcast %470 : f32 to vector<16x16xf32>
    %474 = arith.mulf %473, %472 : vector<16x16xf32>
    %475 = arith.addf %469, %474 : vector<16x16xf32>
    %c79 = arith.constant 79 : index
    %476 = memref.load %arg2[%c79] : memref<128xf32, #tpu.memory_space<smem>>
    %477 = vector.extract_strided_slice %337 {offsets = [3, 0, 0], sizes = [1, 16, 16], strides = [1, 1, 1]} : vector<4x16x16xf32> to vector<1x16x16xf32>
    %478 = vector.shape_cast %477 : vector<1x16x16xf32> to vector<16x16xf32>
    %479 = vector.broadcast %476 : f32 to vector<16x16xf32>
    %480 = arith.mulf %479, %478 : vector<16x16xf32>
    %481 = arith.addf %475, %480 : vector<16x16xf32>
    %c96 = arith.constant 96 : index
    %482 = memref.load %arg2[%c96] : memref<128xf32, #tpu.memory_space<smem>>
    %483 = vector.extract_strided_slice %337 {offsets = [0, 0, 0], sizes = [1, 16, 16], strides = [1, 1, 1]} : vector<4x16x16xf32> to vector<1x16x16xf32>
    %484 = vector.shape_cast %483 : vector<1x16x16xf32> to vector<16x16xf32>
    %485 = vector.broadcast %482 : f32 to vector<16x16xf32>
    %486 = arith.mulf %485, %484 : vector<16x16xf32>
    %487 = arith.addf %40, %486 : vector<16x16xf32>
    %c98 = arith.constant 98 : index
    %488 = memref.load %arg2[%c98] : memref<128xf32, #tpu.memory_space<smem>>
    %489 = vector.extract_strided_slice %337 {offsets = [1, 0, 0], sizes = [1, 16, 16], strides = [1, 1, 1]} : vector<4x16x16xf32> to vector<1x16x16xf32>
    %490 = vector.shape_cast %489 : vector<1x16x16xf32> to vector<16x16xf32>
    %491 = vector.broadcast %488 : f32 to vector<16x16xf32>
    %492 = arith.mulf %491, %490 : vector<16x16xf32>
    %493 = arith.addf %487, %492 : vector<16x16xf32>
    %c100 = arith.constant 100 : index
    %494 = memref.load %arg2[%c100] : memref<128xf32, #tpu.memory_space<smem>>
    %495 = vector.extract_strided_slice %337 {offsets = [2, 0, 0], sizes = [1, 16, 16], strides = [1, 1, 1]} : vector<4x16x16xf32> to vector<1x16x16xf32>
    %496 = vector.shape_cast %495 : vector<1x16x16xf32> to vector<16x16xf32>
    %497 = vector.broadcast %494 : f32 to vector<16x16xf32>
    %498 = arith.mulf %497, %496 : vector<16x16xf32>
    %499 = arith.addf %493, %498 : vector<16x16xf32>
    %c102 = arith.constant 102 : index
    %500 = memref.load %arg2[%c102] : memref<128xf32, #tpu.memory_space<smem>>
    %501 = vector.extract_strided_slice %337 {offsets = [3, 0, 0], sizes = [1, 16, 16], strides = [1, 1, 1]} : vector<4x16x16xf32> to vector<1x16x16xf32>
    %502 = vector.shape_cast %501 : vector<1x16x16xf32> to vector<16x16xf32>
    %503 = vector.broadcast %500 : f32 to vector<16x16xf32>
    %504 = arith.mulf %503, %502 : vector<16x16xf32>
    %505 = arith.addf %499, %504 : vector<16x16xf32>
    %c97 = arith.constant 97 : index
    %506 = memref.load %arg2[%c97] : memref<128xf32, #tpu.memory_space<smem>>
    %507 = vector.extract_strided_slice %337 {offsets = [0, 0, 0], sizes = [1, 16, 16], strides = [1, 1, 1]} : vector<4x16x16xf32> to vector<1x16x16xf32>
    %508 = vector.shape_cast %507 : vector<1x16x16xf32> to vector<16x16xf32>
    %509 = vector.broadcast %506 : f32 to vector<16x16xf32>
    %510 = arith.mulf %509, %508 : vector<16x16xf32>
    %511 = arith.addf %44, %510 : vector<16x16xf32>
    %c99 = arith.constant 99 : index
    %512 = memref.load %arg2[%c99] : memref<128xf32, #tpu.memory_space<smem>>
    %513 = vector.extract_strided_slice %337 {offsets = [1, 0, 0], sizes = [1, 16, 16], strides = [1, 1, 1]} : vector<4x16x16xf32> to vector<1x16x16xf32>
    %514 = vector.shape_cast %513 : vector<1x16x16xf32> to vector<16x16xf32>
    %515 = vector.broadcast %512 : f32 to vector<16x16xf32>
    %516 = arith.mulf %515, %514 : vector<16x16xf32>
    %517 = arith.addf %511, %516 : vector<16x16xf32>
    %c101 = arith.constant 101 : index
    %518 = memref.load %arg2[%c101] : memref<128xf32, #tpu.memory_space<smem>>
    %519 = vector.extract_strided_slice %337 {offsets = [2, 0, 0], sizes = [1, 16, 16], strides = [1, 1, 1]} : vector<4x16x16xf32> to vector<1x16x16xf32>
    %520 = vector.shape_cast %519 : vector<1x16x16xf32> to vector<16x16xf32>
    %521 = vector.broadcast %518 : f32 to vector<16x16xf32>
    %522 = arith.mulf %521, %520 : vector<16x16xf32>
    %523 = arith.addf %517, %522 : vector<16x16xf32>
    %c103 = arith.constant 103 : index
    %524 = memref.load %arg2[%c103] : memref<128xf32, #tpu.memory_space<smem>>
    %525 = vector.extract_strided_slice %337 {offsets = [3, 0, 0], sizes = [1, 16, 16], strides = [1, 1, 1]} : vector<4x16x16xf32> to vector<1x16x16xf32>
    %526 = vector.shape_cast %525 : vector<1x16x16xf32> to vector<16x16xf32>
    %527 = vector.broadcast %524 : f32 to vector<16x16xf32>
    %528 = arith.mulf %527, %526 : vector<16x16xf32>
    %529 = arith.addf %523, %528 : vector<16x16xf32>
    %c0_38 = arith.constant 0 : index
    %c1_39 = arith.constant 1 : index
    %c2_40 = arith.constant 2 : index
    %530 = vector.load %arg4[%c0_38, %c1_39, %c2_40] : memref<4x18x18xf32, #tpu.memory_space<vmem>>, vector<4x16x16xf32>
    %c56 = arith.constant 56 : index
    %531 = memref.load %arg2[%c56] : memref<128xf32, #tpu.memory_space<smem>>
    %532 = vector.extract_strided_slice %530 {offsets = [0, 0, 0], sizes = [1, 16, 16], strides = [1, 1, 1]} : vector<4x16x16xf32> to vector<1x16x16xf32>
    %533 = vector.shape_cast %532 : vector<1x16x16xf32> to vector<16x16xf32>
    %534 = vector.broadcast %531 : f32 to vector<16x16xf32>
    %535 = arith.mulf %534, %533 : vector<16x16xf32>
    %536 = arith.addf %409, %535 : vector<16x16xf32>
    %c58 = arith.constant 58 : index
    %537 = memref.load %arg2[%c58] : memref<128xf32, #tpu.memory_space<smem>>
    %538 = vector.extract_strided_slice %530 {offsets = [1, 0, 0], sizes = [1, 16, 16], strides = [1, 1, 1]} : vector<4x16x16xf32> to vector<1x16x16xf32>
    %539 = vector.shape_cast %538 : vector<1x16x16xf32> to vector<16x16xf32>
    %540 = vector.broadcast %537 : f32 to vector<16x16xf32>
    %541 = arith.mulf %540, %539 : vector<16x16xf32>
    %542 = arith.addf %536, %541 : vector<16x16xf32>
    %c60 = arith.constant 60 : index
    %543 = memref.load %arg2[%c60] : memref<128xf32, #tpu.memory_space<smem>>
    %544 = vector.extract_strided_slice %530 {offsets = [2, 0, 0], sizes = [1, 16, 16], strides = [1, 1, 1]} : vector<4x16x16xf32> to vector<1x16x16xf32>
    %545 = vector.shape_cast %544 : vector<1x16x16xf32> to vector<16x16xf32>
    %546 = vector.broadcast %543 : f32 to vector<16x16xf32>
    %547 = arith.mulf %546, %545 : vector<16x16xf32>
    %548 = arith.addf %542, %547 : vector<16x16xf32>
    %c62 = arith.constant 62 : index
    %549 = memref.load %arg2[%c62] : memref<128xf32, #tpu.memory_space<smem>>
    %550 = vector.extract_strided_slice %530 {offsets = [3, 0, 0], sizes = [1, 16, 16], strides = [1, 1, 1]} : vector<4x16x16xf32> to vector<1x16x16xf32>
    %551 = vector.shape_cast %550 : vector<1x16x16xf32> to vector<16x16xf32>
    %552 = vector.broadcast %549 : f32 to vector<16x16xf32>
    %553 = arith.mulf %552, %551 : vector<16x16xf32>
    %554 = arith.addf %548, %553 : vector<16x16xf32>
    %c57 = arith.constant 57 : index
    %555 = memref.load %arg2[%c57] : memref<128xf32, #tpu.memory_space<smem>>
    %556 = vector.extract_strided_slice %530 {offsets = [0, 0, 0], sizes = [1, 16, 16], strides = [1, 1, 1]} : vector<4x16x16xf32> to vector<1x16x16xf32>
    %557 = vector.shape_cast %556 : vector<1x16x16xf32> to vector<16x16xf32>
    %558 = vector.broadcast %555 : f32 to vector<16x16xf32>
    %559 = arith.mulf %558, %557 : vector<16x16xf32>
    %560 = arith.addf %433, %559 : vector<16x16xf32>
    %c59 = arith.constant 59 : index
    %561 = memref.load %arg2[%c59] : memref<128xf32, #tpu.memory_space<smem>>
    %562 = vector.extract_strided_slice %530 {offsets = [1, 0, 0], sizes = [1, 16, 16], strides = [1, 1, 1]} : vector<4x16x16xf32> to vector<1x16x16xf32>
    %563 = vector.shape_cast %562 : vector<1x16x16xf32> to vector<16x16xf32>
    %564 = vector.broadcast %561 : f32 to vector<16x16xf32>
    %565 = arith.mulf %564, %563 : vector<16x16xf32>
    %566 = arith.addf %560, %565 : vector<16x16xf32>
    %c61 = arith.constant 61 : index
    %567 = memref.load %arg2[%c61] : memref<128xf32, #tpu.memory_space<smem>>
    %568 = vector.extract_strided_slice %530 {offsets = [2, 0, 0], sizes = [1, 16, 16], strides = [1, 1, 1]} : vector<4x16x16xf32> to vector<1x16x16xf32>
    %569 = vector.shape_cast %568 : vector<1x16x16xf32> to vector<16x16xf32>
    %570 = vector.broadcast %567 : f32 to vector<16x16xf32>
    %571 = arith.mulf %570, %569 : vector<16x16xf32>
    %572 = arith.addf %566, %571 : vector<16x16xf32>
    %c63 = arith.constant 63 : index
    %573 = memref.load %arg2[%c63] : memref<128xf32, #tpu.memory_space<smem>>
    %574 = vector.extract_strided_slice %530 {offsets = [3, 0, 0], sizes = [1, 16, 16], strides = [1, 1, 1]} : vector<4x16x16xf32> to vector<1x16x16xf32>
    %575 = vector.shape_cast %574 : vector<1x16x16xf32> to vector<16x16xf32>
    %576 = vector.broadcast %573 : f32 to vector<16x16xf32>
    %577 = arith.mulf %576, %575 : vector<16x16xf32>
    %578 = arith.addf %572, %577 : vector<16x16xf32>
    %c104 = arith.constant 104 : index
    %579 = memref.load %arg2[%c104] : memref<128xf32, #tpu.memory_space<smem>>
    %580 = vector.extract_strided_slice %530 {offsets = [0, 0, 0], sizes = [1, 16, 16], strides = [1, 1, 1]} : vector<4x16x16xf32> to vector<1x16x16xf32>
    %581 = vector.shape_cast %580 : vector<1x16x16xf32> to vector<16x16xf32>
    %582 = vector.broadcast %579 : f32 to vector<16x16xf32>
    %583 = arith.mulf %582, %581 : vector<16x16xf32>
    %584 = arith.addf %505, %583 : vector<16x16xf32>
    %c106 = arith.constant 106 : index
    %585 = memref.load %arg2[%c106] : memref<128xf32, #tpu.memory_space<smem>>
    %586 = vector.extract_strided_slice %530 {offsets = [1, 0, 0], sizes = [1, 16, 16], strides = [1, 1, 1]} : vector<4x16x16xf32> to vector<1x16x16xf32>
    %587 = vector.shape_cast %586 : vector<1x16x16xf32> to vector<16x16xf32>
    %588 = vector.broadcast %585 : f32 to vector<16x16xf32>
    %589 = arith.mulf %588, %587 : vector<16x16xf32>
    %590 = arith.addf %584, %589 : vector<16x16xf32>
    %c108 = arith.constant 108 : index
    %591 = memref.load %arg2[%c108] : memref<128xf32, #tpu.memory_space<smem>>
    %592 = vector.extract_strided_slice %530 {offsets = [2, 0, 0], sizes = [1, 16, 16], strides = [1, 1, 1]} : vector<4x16x16xf32> to vector<1x16x16xf32>
    %593 = vector.shape_cast %592 : vector<1x16x16xf32> to vector<16x16xf32>
    %594 = vector.broadcast %591 : f32 to vector<16x16xf32>
    %595 = arith.mulf %594, %593 : vector<16x16xf32>
    %596 = arith.addf %590, %595 : vector<16x16xf32>
    %c110 = arith.constant 110 : index
    %597 = memref.load %arg2[%c110] : memref<128xf32, #tpu.memory_space<smem>>
    %598 = vector.extract_strided_slice %530 {offsets = [3, 0, 0], sizes = [1, 16, 16], strides = [1, 1, 1]} : vector<4x16x16xf32> to vector<1x16x16xf32>
    %599 = vector.shape_cast %598 : vector<1x16x16xf32> to vector<16x16xf32>
    %600 = vector.broadcast %597 : f32 to vector<16x16xf32>
    %601 = arith.mulf %600, %599 : vector<16x16xf32>
    %602 = arith.addf %596, %601 : vector<16x16xf32>
    %c105 = arith.constant 105 : index
    %603 = memref.load %arg2[%c105] : memref<128xf32, #tpu.memory_space<smem>>
    %604 = vector.extract_strided_slice %530 {offsets = [0, 0, 0], sizes = [1, 16, 16], strides = [1, 1, 1]} : vector<4x16x16xf32> to vector<1x16x16xf32>
    %605 = vector.shape_cast %604 : vector<1x16x16xf32> to vector<16x16xf32>
    %606 = vector.broadcast %603 : f32 to vector<16x16xf32>
    %607 = arith.mulf %606, %605 : vector<16x16xf32>
    %608 = arith.addf %529, %607 : vector<16x16xf32>
    %c107 = arith.constant 107 : index
    %609 = memref.load %arg2[%c107] : memref<128xf32, #tpu.memory_space<smem>>
    %610 = vector.extract_strided_slice %530 {offsets = [1, 0, 0], sizes = [1, 16, 16], strides = [1, 1, 1]} : vector<4x16x16xf32> to vector<1x16x16xf32>
    %611 = vector.shape_cast %610 : vector<1x16x16xf32> to vector<16x16xf32>
    %612 = vector.broadcast %609 : f32 to vector<16x16xf32>
    %613 = arith.mulf %612, %611 : vector<16x16xf32>
    %614 = arith.addf %608, %613 : vector<16x16xf32>
    %c109 = arith.constant 109 : index
    %615 = memref.load %arg2[%c109] : memref<128xf32, #tpu.memory_space<smem>>
    %616 = vector.extract_strided_slice %530 {offsets = [2, 0, 0], sizes = [1, 16, 16], strides = [1, 1, 1]} : vector<4x16x16xf32> to vector<1x16x16xf32>
    %617 = vector.shape_cast %616 : vector<1x16x16xf32> to vector<16x16xf32>
    %618 = vector.broadcast %615 : f32 to vector<16x16xf32>
    %619 = arith.mulf %618, %617 : vector<16x16xf32>
    %620 = arith.addf %614, %619 : vector<16x16xf32>
    %c111 = arith.constant 111 : index
    %621 = memref.load %arg2[%c111] : memref<128xf32, #tpu.memory_space<smem>>
    %622 = vector.extract_strided_slice %530 {offsets = [3, 0, 0], sizes = [1, 16, 16], strides = [1, 1, 1]} : vector<4x16x16xf32> to vector<1x16x16xf32>
    %623 = vector.shape_cast %622 : vector<1x16x16xf32> to vector<16x16xf32>
    %624 = vector.broadcast %621 : f32 to vector<16x16xf32>
    %625 = arith.mulf %624, %623 : vector<16x16xf32>
    %626 = arith.addf %620, %625 : vector<16x16xf32>
    %c0_41 = arith.constant 0 : index
    %c2_42 = arith.constant 2 : index
    %c0_43 = arith.constant 0 : index
    %627 = vector.load %arg4[%c0_41, %c2_42, %c0_43] : memref<4x18x18xf32, #tpu.memory_space<vmem>>, vector<4x16x16xf32>
    %c80 = arith.constant 80 : index
    %628 = memref.load %arg2[%c80] : memref<128xf32, #tpu.memory_space<smem>>
    %629 = vector.extract_strided_slice %627 {offsets = [0, 0, 0], sizes = [1, 16, 16], strides = [1, 1, 1]} : vector<4x16x16xf32> to vector<1x16x16xf32>
    %630 = vector.shape_cast %629 : vector<1x16x16xf32> to vector<16x16xf32>
    %631 = vector.broadcast %628 : f32 to vector<16x16xf32>
    %632 = arith.mulf %631, %630 : vector<16x16xf32>
    %633 = arith.addf %457, %632 : vector<16x16xf32>
    %c82 = arith.constant 82 : index
    %634 = memref.load %arg2[%c82] : memref<128xf32, #tpu.memory_space<smem>>
    %635 = vector.extract_strided_slice %627 {offsets = [1, 0, 0], sizes = [1, 16, 16], strides = [1, 1, 1]} : vector<4x16x16xf32> to vector<1x16x16xf32>
    %636 = vector.shape_cast %635 : vector<1x16x16xf32> to vector<16x16xf32>
    %637 = vector.broadcast %634 : f32 to vector<16x16xf32>
    %638 = arith.mulf %637, %636 : vector<16x16xf32>
    %639 = arith.addf %633, %638 : vector<16x16xf32>
    %c84 = arith.constant 84 : index
    %640 = memref.load %arg2[%c84] : memref<128xf32, #tpu.memory_space<smem>>
    %641 = vector.extract_strided_slice %627 {offsets = [2, 0, 0], sizes = [1, 16, 16], strides = [1, 1, 1]} : vector<4x16x16xf32> to vector<1x16x16xf32>
    %642 = vector.shape_cast %641 : vector<1x16x16xf32> to vector<16x16xf32>
    %643 = vector.broadcast %640 : f32 to vector<16x16xf32>
    %644 = arith.mulf %643, %642 : vector<16x16xf32>
    %645 = arith.addf %639, %644 : vector<16x16xf32>
    %c86 = arith.constant 86 : index
    %646 = memref.load %arg2[%c86] : memref<128xf32, #tpu.memory_space<smem>>
    %647 = vector.extract_strided_slice %627 {offsets = [3, 0, 0], sizes = [1, 16, 16], strides = [1, 1, 1]} : vector<4x16x16xf32> to vector<1x16x16xf32>
    %648 = vector.shape_cast %647 : vector<1x16x16xf32> to vector<16x16xf32>
    %649 = vector.broadcast %646 : f32 to vector<16x16xf32>
    %650 = arith.mulf %649, %648 : vector<16x16xf32>
    %651 = arith.addf %645, %650 : vector<16x16xf32>
    %c81 = arith.constant 81 : index
    %652 = memref.load %arg2[%c81] : memref<128xf32, #tpu.memory_space<smem>>
    %653 = vector.extract_strided_slice %627 {offsets = [0, 0, 0], sizes = [1, 16, 16], strides = [1, 1, 1]} : vector<4x16x16xf32> to vector<1x16x16xf32>
    %654 = vector.shape_cast %653 : vector<1x16x16xf32> to vector<16x16xf32>
    %655 = vector.broadcast %652 : f32 to vector<16x16xf32>
    %656 = arith.mulf %655, %654 : vector<16x16xf32>
    %657 = arith.addf %481, %656 : vector<16x16xf32>
    %c83 = arith.constant 83 : index
    %658 = memref.load %arg2[%c83] : memref<128xf32, #tpu.memory_space<smem>>
    %659 = vector.extract_strided_slice %627 {offsets = [1, 0, 0], sizes = [1, 16, 16], strides = [1, 1, 1]} : vector<4x16x16xf32> to vector<1x16x16xf32>
    %660 = vector.shape_cast %659 : vector<1x16x16xf32> to vector<16x16xf32>
    %661 = vector.broadcast %658 : f32 to vector<16x16xf32>
    %662 = arith.mulf %661, %660 : vector<16x16xf32>
    %663 = arith.addf %657, %662 : vector<16x16xf32>
    %c85 = arith.constant 85 : index
    %664 = memref.load %arg2[%c85] : memref<128xf32, #tpu.memory_space<smem>>
    %665 = vector.extract_strided_slice %627 {offsets = [2, 0, 0], sizes = [1, 16, 16], strides = [1, 1, 1]} : vector<4x16x16xf32> to vector<1x16x16xf32>
    %666 = vector.shape_cast %665 : vector<1x16x16xf32> to vector<16x16xf32>
    %667 = vector.broadcast %664 : f32 to vector<16x16xf32>
    %668 = arith.mulf %667, %666 : vector<16x16xf32>
    %669 = arith.addf %663, %668 : vector<16x16xf32>
    %c87 = arith.constant 87 : index
    %670 = memref.load %arg2[%c87] : memref<128xf32, #tpu.memory_space<smem>>
    %671 = vector.extract_strided_slice %627 {offsets = [3, 0, 0], sizes = [1, 16, 16], strides = [1, 1, 1]} : vector<4x16x16xf32> to vector<1x16x16xf32>
    %672 = vector.shape_cast %671 : vector<1x16x16xf32> to vector<16x16xf32>
    %673 = vector.broadcast %670 : f32 to vector<16x16xf32>
    %674 = arith.mulf %673, %672 : vector<16x16xf32>
    %675 = arith.addf %669, %674 : vector<16x16xf32>
    %c0_44 = arith.constant 0 : index
    %c2_45 = arith.constant 2 : index
    %c1_46 = arith.constant 1 : index
    %676 = vector.load %arg4[%c0_44, %c2_45, %c1_46] : memref<4x18x18xf32, #tpu.memory_space<vmem>>, vector<4x16x16xf32>
    %c88 = arith.constant 88 : index
    %677 = memref.load %arg2[%c88] : memref<128xf32, #tpu.memory_space<smem>>
    %678 = vector.extract_strided_slice %676 {offsets = [0, 0, 0], sizes = [1, 16, 16], strides = [1, 1, 1]} : vector<4x16x16xf32> to vector<1x16x16xf32>
    %679 = vector.shape_cast %678 : vector<1x16x16xf32> to vector<16x16xf32>
    %680 = vector.broadcast %677 : f32 to vector<16x16xf32>
    %681 = arith.mulf %680, %679 : vector<16x16xf32>
    %682 = arith.addf %651, %681 : vector<16x16xf32>
    %c90 = arith.constant 90 : index
    %683 = memref.load %arg2[%c90] : memref<128xf32, #tpu.memory_space<smem>>
    %684 = vector.extract_strided_slice %676 {offsets = [1, 0, 0], sizes = [1, 16, 16], strides = [1, 1, 1]} : vector<4x16x16xf32> to vector<1x16x16xf32>
    %685 = vector.shape_cast %684 : vector<1x16x16xf32> to vector<16x16xf32>
    %686 = vector.broadcast %683 : f32 to vector<16x16xf32>
    %687 = arith.mulf %686, %685 : vector<16x16xf32>
    %688 = arith.addf %682, %687 : vector<16x16xf32>
    %c92 = arith.constant 92 : index
    %689 = memref.load %arg2[%c92] : memref<128xf32, #tpu.memory_space<smem>>
    %690 = vector.extract_strided_slice %676 {offsets = [2, 0, 0], sizes = [1, 16, 16], strides = [1, 1, 1]} : vector<4x16x16xf32> to vector<1x16x16xf32>
    %691 = vector.shape_cast %690 : vector<1x16x16xf32> to vector<16x16xf32>
    %692 = vector.broadcast %689 : f32 to vector<16x16xf32>
    %693 = arith.mulf %692, %691 : vector<16x16xf32>
    %694 = arith.addf %688, %693 : vector<16x16xf32>
    %c94 = arith.constant 94 : index
    %695 = memref.load %arg2[%c94] : memref<128xf32, #tpu.memory_space<smem>>
    %696 = vector.extract_strided_slice %676 {offsets = [3, 0, 0], sizes = [1, 16, 16], strides = [1, 1, 1]} : vector<4x16x16xf32> to vector<1x16x16xf32>
    %697 = vector.shape_cast %696 : vector<1x16x16xf32> to vector<16x16xf32>
    %698 = vector.broadcast %695 : f32 to vector<16x16xf32>
    %699 = arith.mulf %698, %697 : vector<16x16xf32>
    %700 = arith.addf %694, %699 : vector<16x16xf32>
    %c89 = arith.constant 89 : index
    %701 = memref.load %arg2[%c89] : memref<128xf32, #tpu.memory_space<smem>>
    %702 = vector.extract_strided_slice %676 {offsets = [0, 0, 0], sizes = [1, 16, 16], strides = [1, 1, 1]} : vector<4x16x16xf32> to vector<1x16x16xf32>
    %703 = vector.shape_cast %702 : vector<1x16x16xf32> to vector<16x16xf32>
    %704 = vector.broadcast %701 : f32 to vector<16x16xf32>
    %705 = arith.mulf %704, %703 : vector<16x16xf32>
    %706 = arith.addf %675, %705 : vector<16x16xf32>
    %c91 = arith.constant 91 : index
    %707 = memref.load %arg2[%c91] : memref<128xf32, #tpu.memory_space<smem>>
    %708 = vector.extract_strided_slice %676 {offsets = [1, 0, 0], sizes = [1, 16, 16], strides = [1, 1, 1]} : vector<4x16x16xf32> to vector<1x16x16xf32>
    %709 = vector.shape_cast %708 : vector<1x16x16xf32> to vector<16x16xf32>
    %710 = vector.broadcast %707 : f32 to vector<16x16xf32>
    %711 = arith.mulf %710, %709 : vector<16x16xf32>
    %712 = arith.addf %706, %711 : vector<16x16xf32>
    %c93 = arith.constant 93 : index
    %713 = memref.load %arg2[%c93] : memref<128xf32, #tpu.memory_space<smem>>
    %714 = vector.extract_strided_slice %676 {offsets = [2, 0, 0], sizes = [1, 16, 16], strides = [1, 1, 1]} : vector<4x16x16xf32> to vector<1x16x16xf32>
    %715 = vector.shape_cast %714 : vector<1x16x16xf32> to vector<16x16xf32>
    %716 = vector.broadcast %713 : f32 to vector<16x16xf32>
    %717 = arith.mulf %716, %715 : vector<16x16xf32>
    %718 = arith.addf %712, %717 : vector<16x16xf32>
    %c95 = arith.constant 95 : index
    %719 = memref.load %arg2[%c95] : memref<128xf32, #tpu.memory_space<smem>>
    %720 = vector.extract_strided_slice %676 {offsets = [3, 0, 0], sizes = [1, 16, 16], strides = [1, 1, 1]} : vector<4x16x16xf32> to vector<1x16x16xf32>
    %721 = vector.shape_cast %720 : vector<1x16x16xf32> to vector<16x16xf32>
    %722 = vector.broadcast %719 : f32 to vector<16x16xf32>
    %723 = arith.mulf %722, %721 : vector<16x16xf32>
    %724 = arith.addf %718, %723 : vector<16x16xf32>
    %c112 = arith.constant 112 : index
    %725 = memref.load %arg2[%c112] : memref<128xf32, #tpu.memory_space<smem>>
    %726 = vector.extract_strided_slice %676 {offsets = [0, 0, 0], sizes = [1, 16, 16], strides = [1, 1, 1]} : vector<4x16x16xf32> to vector<1x16x16xf32>
    %727 = vector.shape_cast %726 : vector<1x16x16xf32> to vector<16x16xf32>
    %728 = vector.broadcast %725 : f32 to vector<16x16xf32>
    %729 = arith.mulf %728, %727 : vector<16x16xf32>
    %730 = arith.addf %602, %729 : vector<16x16xf32>
    %c114 = arith.constant 114 : index
    %731 = memref.load %arg2[%c114] : memref<128xf32, #tpu.memory_space<smem>>
    %732 = vector.extract_strided_slice %676 {offsets = [1, 0, 0], sizes = [1, 16, 16], strides = [1, 1, 1]} : vector<4x16x16xf32> to vector<1x16x16xf32>
    %733 = vector.shape_cast %732 : vector<1x16x16xf32> to vector<16x16xf32>
    %734 = vector.broadcast %731 : f32 to vector<16x16xf32>
    %735 = arith.mulf %734, %733 : vector<16x16xf32>
    %736 = arith.addf %730, %735 : vector<16x16xf32>
    %c116 = arith.constant 116 : index
    %737 = memref.load %arg2[%c116] : memref<128xf32, #tpu.memory_space<smem>>
    %738 = vector.extract_strided_slice %676 {offsets = [2, 0, 0], sizes = [1, 16, 16], strides = [1, 1, 1]} : vector<4x16x16xf32> to vector<1x16x16xf32>
    %739 = vector.shape_cast %738 : vector<1x16x16xf32> to vector<16x16xf32>
    %740 = vector.broadcast %737 : f32 to vector<16x16xf32>
    %741 = arith.mulf %740, %739 : vector<16x16xf32>
    %742 = arith.addf %736, %741 : vector<16x16xf32>
    %c118 = arith.constant 118 : index
    %743 = memref.load %arg2[%c118] : memref<128xf32, #tpu.memory_space<smem>>
    %744 = vector.extract_strided_slice %676 {offsets = [3, 0, 0], sizes = [1, 16, 16], strides = [1, 1, 1]} : vector<4x16x16xf32> to vector<1x16x16xf32>
    %745 = vector.shape_cast %744 : vector<1x16x16xf32> to vector<16x16xf32>
    %746 = vector.broadcast %743 : f32 to vector<16x16xf32>
    %747 = arith.mulf %746, %745 : vector<16x16xf32>
    %748 = arith.addf %742, %747 : vector<16x16xf32>
    %c113 = arith.constant 113 : index
    %749 = memref.load %arg2[%c113] : memref<128xf32, #tpu.memory_space<smem>>
    %750 = vector.extract_strided_slice %676 {offsets = [0, 0, 0], sizes = [1, 16, 16], strides = [1, 1, 1]} : vector<4x16x16xf32> to vector<1x16x16xf32>
    %751 = vector.shape_cast %750 : vector<1x16x16xf32> to vector<16x16xf32>
    %752 = vector.broadcast %749 : f32 to vector<16x16xf32>
    %753 = arith.mulf %752, %751 : vector<16x16xf32>
    %754 = arith.addf %626, %753 : vector<16x16xf32>
    %c115 = arith.constant 115 : index
    %755 = memref.load %arg2[%c115] : memref<128xf32, #tpu.memory_space<smem>>
    %756 = vector.extract_strided_slice %676 {offsets = [1, 0, 0], sizes = [1, 16, 16], strides = [1, 1, 1]} : vector<4x16x16xf32> to vector<1x16x16xf32>
    %757 = vector.shape_cast %756 : vector<1x16x16xf32> to vector<16x16xf32>
    %758 = vector.broadcast %755 : f32 to vector<16x16xf32>
    %759 = arith.mulf %758, %757 : vector<16x16xf32>
    %760 = arith.addf %754, %759 : vector<16x16xf32>
    %c117 = arith.constant 117 : index
    %761 = memref.load %arg2[%c117] : memref<128xf32, #tpu.memory_space<smem>>
    %762 = vector.extract_strided_slice %676 {offsets = [2, 0, 0], sizes = [1, 16, 16], strides = [1, 1, 1]} : vector<4x16x16xf32> to vector<1x16x16xf32>
    %763 = vector.shape_cast %762 : vector<1x16x16xf32> to vector<16x16xf32>
    %764 = vector.broadcast %761 : f32 to vector<16x16xf32>
    %765 = arith.mulf %764, %763 : vector<16x16xf32>
    %766 = arith.addf %760, %765 : vector<16x16xf32>
    %c119 = arith.constant 119 : index
    %767 = memref.load %arg2[%c119] : memref<128xf32, #tpu.memory_space<smem>>
    %768 = vector.extract_strided_slice %676 {offsets = [3, 0, 0], sizes = [1, 16, 16], strides = [1, 1, 1]} : vector<4x16x16xf32> to vector<1x16x16xf32>
    %769 = vector.shape_cast %768 : vector<1x16x16xf32> to vector<16x16xf32>
    %770 = vector.broadcast %767 : f32 to vector<16x16xf32>
    %771 = arith.mulf %770, %769 : vector<16x16xf32>
    %772 = arith.addf %766, %771 : vector<16x16xf32>
    %c0_47 = arith.constant 0 : index
    %c2_48 = arith.constant 2 : index
    %c2_49 = arith.constant 2 : index
    %773 = vector.load %arg4[%c0_47, %c2_48, %c2_49] : memref<4x18x18xf32, #tpu.memory_space<vmem>>, vector<4x16x16xf32>
    %c120 = arith.constant 120 : index
    %774 = memref.load %arg2[%c120] : memref<128xf32, #tpu.memory_space<smem>>
    %775 = vector.extract_strided_slice %773 {offsets = [0, 0, 0], sizes = [1, 16, 16], strides = [1, 1, 1]} : vector<4x16x16xf32> to vector<1x16x16xf32>
    %776 = vector.shape_cast %775 : vector<1x16x16xf32> to vector<16x16xf32>
    %777 = vector.broadcast %774 : f32 to vector<16x16xf32>
    %778 = arith.mulf %777, %776 : vector<16x16xf32>
    %779 = arith.addf %748, %778 : vector<16x16xf32>
    %c122 = arith.constant 122 : index
    %780 = memref.load %arg2[%c122] : memref<128xf32, #tpu.memory_space<smem>>
    %781 = vector.extract_strided_slice %773 {offsets = [1, 0, 0], sizes = [1, 16, 16], strides = [1, 1, 1]} : vector<4x16x16xf32> to vector<1x16x16xf32>
    %782 = vector.shape_cast %781 : vector<1x16x16xf32> to vector<16x16xf32>
    %783 = vector.broadcast %780 : f32 to vector<16x16xf32>
    %784 = arith.mulf %783, %782 : vector<16x16xf32>
    %785 = arith.addf %779, %784 : vector<16x16xf32>
    %c124 = arith.constant 124 : index
    %786 = memref.load %arg2[%c124] : memref<128xf32, #tpu.memory_space<smem>>
    %787 = vector.extract_strided_slice %773 {offsets = [2, 0, 0], sizes = [1, 16, 16], strides = [1, 1, 1]} : vector<4x16x16xf32> to vector<1x16x16xf32>
    %788 = vector.shape_cast %787 : vector<1x16x16xf32> to vector<16x16xf32>
    %789 = vector.broadcast %786 : f32 to vector<16x16xf32>
    %790 = arith.mulf %789, %788 : vector<16x16xf32>
    %791 = arith.addf %785, %790 : vector<16x16xf32>
    %c126 = arith.constant 126 : index
    %792 = memref.load %arg2[%c126] : memref<128xf32, #tpu.memory_space<smem>>
    %793 = vector.extract_strided_slice %773 {offsets = [3, 0, 0], sizes = [1, 16, 16], strides = [1, 1, 1]} : vector<4x16x16xf32> to vector<1x16x16xf32>
    %794 = vector.shape_cast %793 : vector<1x16x16xf32> to vector<16x16xf32>
    %795 = vector.broadcast %792 : f32 to vector<16x16xf32>
    %796 = arith.mulf %795, %794 : vector<16x16xf32>
    %797 = arith.addf %791, %796 : vector<16x16xf32>
    %c121 = arith.constant 121 : index
    %798 = memref.load %arg2[%c121] : memref<128xf32, #tpu.memory_space<smem>>
    %799 = vector.extract_strided_slice %773 {offsets = [0, 0, 0], sizes = [1, 16, 16], strides = [1, 1, 1]} : vector<4x16x16xf32> to vector<1x16x16xf32>
    %800 = vector.shape_cast %799 : vector<1x16x16xf32> to vector<16x16xf32>
    %801 = vector.broadcast %798 : f32 to vector<16x16xf32>
    %802 = arith.mulf %801, %800 : vector<16x16xf32>
    %803 = arith.addf %772, %802 : vector<16x16xf32>
    %c123 = arith.constant 123 : index
    %804 = memref.load %arg2[%c123] : memref<128xf32, #tpu.memory_space<smem>>
    %805 = vector.extract_strided_slice %773 {offsets = [1, 0, 0], sizes = [1, 16, 16], strides = [1, 1, 1]} : vector<4x16x16xf32> to vector<1x16x16xf32>
    %806 = vector.shape_cast %805 : vector<1x16x16xf32> to vector<16x16xf32>
    %807 = vector.broadcast %804 : f32 to vector<16x16xf32>
    %808 = arith.mulf %807, %806 : vector<16x16xf32>
    %809 = arith.addf %803, %808 : vector<16x16xf32>
    %c125 = arith.constant 125 : index
    %810 = memref.load %arg2[%c125] : memref<128xf32, #tpu.memory_space<smem>>
    %811 = vector.extract_strided_slice %773 {offsets = [2, 0, 0], sizes = [1, 16, 16], strides = [1, 1, 1]} : vector<4x16x16xf32> to vector<1x16x16xf32>
    %812 = vector.shape_cast %811 : vector<1x16x16xf32> to vector<16x16xf32>
    %813 = vector.broadcast %810 : f32 to vector<16x16xf32>
    %814 = arith.mulf %813, %812 : vector<16x16xf32>
    %815 = arith.addf %809, %814 : vector<16x16xf32>
    %c127 = arith.constant 127 : index
    %816 = memref.load %arg2[%c127] : memref<128xf32, #tpu.memory_space<smem>>
    %817 = vector.extract_strided_slice %773 {offsets = [3, 0, 0], sizes = [1, 16, 16], strides = [1, 1, 1]} : vector<4x16x16xf32> to vector<1x16x16xf32>
    %818 = vector.shape_cast %817 : vector<1x16x16xf32> to vector<16x16xf32>
    %819 = vector.broadcast %816 : f32 to vector<16x16xf32>
    %820 = arith.mulf %819, %818 : vector<16x16xf32>
    %821 = arith.addf %815, %820 : vector<16x16xf32>
    %822 = arith.addf %361, %554 : vector<16x16xf32>
    %823 = arith.addf %822, %700 : vector<16x16xf32>
    %824 = arith.addf %823, %797 : vector<16x16xf32>
    %825 = vector.shape_cast %824 : vector<16x16xf32> to vector<1x16x16xf32>
    %cst_50 = arith.constant dense<0.000000e+00> : vector<1xf32>
    %826 = vector.multi_reduction <add>, %825, %cst_50 [1, 2] : vector<1x16x16xf32> to vector<1xf32>
    %827 = vector.shape_cast %826 : vector<1xf32> to vector<1x1x1xf32>
    %828 = vector.extract %827[0, 0, 0] : f32 from vector<1x1x1xf32>
    %829 = vector.broadcast %828 : f32 to vector<1x1xf32>
    %cst_51 = arith.constant 9.765625E-4 : f32
    %830 = vector.broadcast %cst_51 : f32 to vector<1x1xf32>
    %831 = arith.mulf %829, %830 : vector<1x1xf32>
    %cst_52 = arith.constant 0.000000e+00 : f32
    %832 = vector.broadcast %cst_52 : f32 to vector<1x1xf32>
    %833 = vector.broadcast %831 : vector<1x1xf32> to vector<16x16xf32>
    %834 = arith.subf %361, %833 : vector<16x16xf32>
    %835 = arith.mulf %834, %834 : vector<16x16xf32>
    %836 = vector.shape_cast %835 : vector<16x16xf32> to vector<1x16x16xf32>
    %cst_53 = arith.constant dense<0.000000e+00> : vector<1xf32>
    %837 = vector.multi_reduction <add>, %836, %cst_53 [1, 2] : vector<1x16x16xf32> to vector<1xf32>
    %838 = vector.shape_cast %837 : vector<1xf32> to vector<1x1x1xf32>
    %839 = vector.extract %838[0, 0, 0] : f32 from vector<1x1x1xf32>
    %840 = vector.broadcast %839 : f32 to vector<1x1xf32>
    %841 = arith.addf %832, %840 : vector<1x1xf32>
    %842 = vector.broadcast %831 : vector<1x1xf32> to vector<16x16xf32>
    %843 = arith.subf %554, %842 : vector<16x16xf32>
    %844 = arith.mulf %843, %843 : vector<16x16xf32>
    %845 = vector.shape_cast %844 : vector<16x16xf32> to vector<1x16x16xf32>
    %cst_54 = arith.constant dense<0.000000e+00> : vector<1xf32>
    %846 = vector.multi_reduction <add>, %845, %cst_54 [1, 2] : vector<1x16x16xf32> to vector<1xf32>
    %847 = vector.shape_cast %846 : vector<1xf32> to vector<1x1x1xf32>
    %848 = vector.extract %847[0, 0, 0] : f32 from vector<1x1x1xf32>
    %849 = vector.broadcast %848 : f32 to vector<1x1xf32>
    %850 = arith.addf %841, %849 : vector<1x1xf32>
    %851 = vector.broadcast %831 : vector<1x1xf32> to vector<16x16xf32>
    %852 = arith.subf %700, %851 : vector<16x16xf32>
    %853 = arith.mulf %852, %852 : vector<16x16xf32>
    %854 = vector.shape_cast %853 : vector<16x16xf32> to vector<1x16x16xf32>
    %cst_55 = arith.constant dense<0.000000e+00> : vector<1xf32>
    %855 = vector.multi_reduction <add>, %854, %cst_55 [1, 2] : vector<1x16x16xf32> to vector<1xf32>
    %856 = vector.shape_cast %855 : vector<1xf32> to vector<1x1x1xf32>
    %857 = vector.extract %856[0, 0, 0] : f32 from vector<1x1x1xf32>
    %858 = vector.broadcast %857 : f32 to vector<1x1xf32>
    %859 = arith.addf %850, %858 : vector<1x1xf32>
    %860 = vector.broadcast %831 : vector<1x1xf32> to vector<16x16xf32>
    %861 = arith.subf %797, %860 : vector<16x16xf32>
    %862 = arith.mulf %861, %861 : vector<16x16xf32>
    %863 = vector.shape_cast %862 : vector<16x16xf32> to vector<1x16x16xf32>
    %cst_56 = arith.constant dense<0.000000e+00> : vector<1xf32>
    %864 = vector.multi_reduction <add>, %863, %cst_56 [1, 2] : vector<1x16x16xf32> to vector<1xf32>
    %865 = vector.shape_cast %864 : vector<1xf32> to vector<1x1x1xf32>
    %866 = vector.extract %865[0, 0, 0] : f32 from vector<1x1x1xf32>
    %867 = vector.broadcast %866 : f32 to vector<1x1xf32>
    %868 = arith.addf %859, %867 : vector<1x1xf32>
    %cst_57 = arith.constant 9.765625E-4 : f32
    %869 = vector.broadcast %cst_57 : f32 to vector<1x1xf32>
    %870 = arith.mulf %868, %869 : vector<1x1xf32>
    %cst_58 = arith.constant 9.99999974E-6 : f32
    %871 = vector.broadcast %cst_58 : f32 to vector<1x1xf32>
    %872 = arith.addf %870, %871 : vector<1x1xf32>
    %873 = math.rsqrt %872 : vector<1x1xf32>
    %cst_59 = arith.constant 0.000000e+00 : f32
    %874 = vector.broadcast %cst_59 : f32 to vector<32x32xf32>
    %cst_60 = arith.constant 0.000000e+00 : f32
    %875 = vector.broadcast %cst_60 : f32 to vector<16x32xf32>
    %876 = vector.broadcast %831 : vector<1x1xf32> to vector<16x16xf32>
    %877 = arith.subf %361, %876 : vector<16x16xf32>
    %878 = vector.broadcast %873 : vector<1x1xf32> to vector<16x16xf32>
    %879 = arith.mulf %877, %878 : vector<16x16xf32>
    %cst_61 = arith.constant 5.000000e-01 : f32
    %880 = vector.broadcast %cst_61 : f32 to vector<16x16xf32>
    %881 = arith.mulf %880, %879 : vector<16x16xf32>
    %cst_62 = arith.constant 0.707106769 : f32
    %882 = vector.broadcast %cst_62 : f32 to vector<16x16xf32>
    %883 = arith.mulf %879, %882 : vector<16x16xf32>
    %884 = math.erf %883 : vector<16x16xf32>
    %cst_63 = arith.constant 1.000000e+00 : f32
    %885 = vector.broadcast %cst_63 : f32 to vector<16x16xf32>
    %886 = arith.addf %885, %884 : vector<16x16xf32>
    %887 = arith.mulf %881, %886 : vector<16x16xf32>
    %cst_64 = arith.constant dense<0.000000e+00> : vector<16x32xf32>
    %888 = tpu.matmul %887, %26, %cst_64 {dimension_numbers = #tpu.dot_dimension_numbers<[1], [0], [0], [1], [0, 0, 1, 1], [], []>} : vector<16x16xf32>, vector<16x32xf32>, vector<16x32xf32> -> vector<16x32xf32>
    %889 = arith.addf %875, %888 : vector<16x32xf32>
    %890 = vector.broadcast %831 : vector<1x1xf32> to vector<16x16xf32>
    %891 = arith.subf %554, %890 : vector<16x16xf32>
    %892 = vector.broadcast %873 : vector<1x1xf32> to vector<16x16xf32>
    %893 = arith.mulf %891, %892 : vector<16x16xf32>
    %cst_65 = arith.constant 5.000000e-01 : f32
    %894 = vector.broadcast %cst_65 : f32 to vector<16x16xf32>
    %895 = arith.mulf %894, %893 : vector<16x16xf32>
    %cst_66 = arith.constant 0.707106769 : f32
    %896 = vector.broadcast %cst_66 : f32 to vector<16x16xf32>
    %897 = arith.mulf %893, %896 : vector<16x16xf32>
    %898 = math.erf %897 : vector<16x16xf32>
    %cst_67 = arith.constant 1.000000e+00 : f32
    %899 = vector.broadcast %cst_67 : f32 to vector<16x16xf32>
    %900 = arith.addf %899, %898 : vector<16x16xf32>
    %901 = arith.mulf %895, %900 : vector<16x16xf32>
    %cst_68 = arith.constant dense<0.000000e+00> : vector<16x32xf32>
    %902 = tpu.matmul %901, %33, %cst_68 {dimension_numbers = #tpu.dot_dimension_numbers<[1], [0], [0], [1], [0, 0, 1, 1], [], []>} : vector<16x16xf32>, vector<16x32xf32>, vector<16x32xf32> -> vector<16x32xf32>
    %903 = arith.addf %889, %902 : vector<16x32xf32>
    %cst_69 = arith.constant dense<0.000000e+00> : vector<32x32xf32>
    %904 = tpu.matmul %10, %903, %cst_69 {dimension_numbers = #tpu.dot_dimension_numbers<[1], [0], [0], [1], [0, 0, 1, 1], [], []>} : vector<32x16xf32>, vector<16x32xf32>, vector<32x32xf32> -> vector<32x32xf32>
    %905 = arith.addf %874, %904 : vector<32x32xf32>
    %cst_70 = arith.constant 0.000000e+00 : f32
    %906 = vector.broadcast %cst_70 : f32 to vector<16x32xf32>
    %907 = vector.broadcast %831 : vector<1x1xf32> to vector<16x16xf32>
    %908 = arith.subf %700, %907 : vector<16x16xf32>
    %909 = vector.broadcast %873 : vector<1x1xf32> to vector<16x16xf32>
    %910 = arith.mulf %908, %909 : vector<16x16xf32>
    %cst_71 = arith.constant 5.000000e-01 : f32
    %911 = vector.broadcast %cst_71 : f32 to vector<16x16xf32>
    %912 = arith.mulf %911, %910 : vector<16x16xf32>
    %cst_72 = arith.constant 0.707106769 : f32
    %913 = vector.broadcast %cst_72 : f32 to vector<16x16xf32>
    %914 = arith.mulf %910, %913 : vector<16x16xf32>
    %915 = math.erf %914 : vector<16x16xf32>
    %cst_73 = arith.constant 1.000000e+00 : f32
    %916 = vector.broadcast %cst_73 : f32 to vector<16x16xf32>
    %917 = arith.addf %916, %915 : vector<16x16xf32>
    %918 = arith.mulf %912, %917 : vector<16x16xf32>
    %cst_74 = arith.constant dense<0.000000e+00> : vector<16x32xf32>
    %919 = tpu.matmul %918, %26, %cst_74 {dimension_numbers = #tpu.dot_dimension_numbers<[1], [0], [0], [1], [0, 0, 1, 1], [], []>} : vector<16x16xf32>, vector<16x32xf32>, vector<16x32xf32> -> vector<16x32xf32>
    %920 = arith.addf %906, %919 : vector<16x32xf32>
    %921 = vector.broadcast %831 : vector<1x1xf32> to vector<16x16xf32>
    %922 = arith.subf %797, %921 : vector<16x16xf32>
    %923 = vector.broadcast %873 : vector<1x1xf32> to vector<16x16xf32>
    %924 = arith.mulf %922, %923 : vector<16x16xf32>
    %cst_75 = arith.constant 5.000000e-01 : f32
    %925 = vector.broadcast %cst_75 : f32 to vector<16x16xf32>
    %926 = arith.mulf %925, %924 : vector<16x16xf32>
    %cst_76 = arith.constant 0.707106769 : f32
    %927 = vector.broadcast %cst_76 : f32 to vector<16x16xf32>
    %928 = arith.mulf %924, %927 : vector<16x16xf32>
    %929 = math.erf %928 : vector<16x16xf32>
    %cst_77 = arith.constant 1.000000e+00 : f32
    %930 = vector.broadcast %cst_77 : f32 to vector<16x16xf32>
    %931 = arith.addf %930, %929 : vector<16x16xf32>
    %932 = arith.mulf %926, %931 : vector<16x16xf32>
    %cst_78 = arith.constant dense<0.000000e+00> : vector<16x32xf32>
    %933 = tpu.matmul %932, %33, %cst_78 {dimension_numbers = #tpu.dot_dimension_numbers<[1], [0], [0], [1], [0, 0, 1, 1], [], []>} : vector<16x16xf32>, vector<16x32xf32>, vector<16x32xf32> -> vector<16x32xf32>
    %934 = arith.addf %920, %933 : vector<16x32xf32>
    %cst_79 = arith.constant dense<0.000000e+00> : vector<32x32xf32>
    %935 = tpu.matmul %17, %934, %cst_79 {dimension_numbers = #tpu.dot_dimension_numbers<[1], [0], [0], [1], [0, 0, 1, 1], [], []>} : vector<32x16xf32>, vector<16x32xf32>, vector<32x32xf32> -> vector<32x32xf32>
    %936 = arith.addf %905, %935 : vector<32x32xf32>
    %c0_80 = arith.constant 0 : index
    %c0_81 = arith.constant 0 : index
    %c0_82 = arith.constant 0 : index
    %c0_83 = arith.constant 0 : index
    %937 = vector.load %arg3[%c0_80, %c0_81, %c0_82, %c0_83] : memref<1x2x32x32xf32, #tpu.memory_space<vmem>>, vector<1x1x32x32xf32>
    %938 = vector.shape_cast %937 : vector<1x1x32x32xf32> to vector<32x32xf32>
    %939 = vector.shape_cast %936 : vector<32x32xf32> to vector<1x1x32x32xf32>
    tpu.vector_store %arg3[%c0_80, %c0_81, %c0_82, %c0_83], %939 {strides = array<i32>} : memref<1x2x32x32xf32, #tpu.memory_space<vmem>>, vector<1x1x32x32xf32>,
    %940 = arith.addf %385, %578 : vector<16x16xf32>
    %941 = arith.addf %940, %724 : vector<16x16xf32>
    %942 = arith.addf %941, %821 : vector<16x16xf32>
    %943 = vector.shape_cast %942 : vector<16x16xf32> to vector<1x16x16xf32>
    %cst_84 = arith.constant dense<0.000000e+00> : vector<1xf32>
    %944 = vector.multi_reduction <add>, %943, %cst_84 [1, 2] : vector<1x16x16xf32> to vector<1xf32>
    %945 = vector.shape_cast %944 : vector<1xf32> to vector<1x1x1xf32>
    %946 = vector.extract %945[0, 0, 0] : f32 from vector<1x1x1xf32>
    %947 = vector.broadcast %946 : f32 to vector<1x1xf32>
    %cst_85 = arith.constant 9.765625E-4 : f32
    %948 = vector.broadcast %cst_85 : f32 to vector<1x1xf32>
    %949 = arith.mulf %947, %948 : vector<1x1xf32>
    %cst_86 = arith.constant 0.000000e+00 : f32
    %950 = vector.broadcast %cst_86 : f32 to vector<1x1xf32>
    %951 = vector.broadcast %949 : vector<1x1xf32> to vector<16x16xf32>
    %952 = arith.subf %385, %951 : vector<16x16xf32>
    %953 = arith.mulf %952, %952 : vector<16x16xf32>
    %954 = vector.shape_cast %953 : vector<16x16xf32> to vector<1x16x16xf32>
    %cst_87 = arith.constant dense<0.000000e+00> : vector<1xf32>
    %955 = vector.multi_reduction <add>, %954, %cst_87 [1, 2] : vector<1x16x16xf32> to vector<1xf32>
    %956 = vector.shape_cast %955 : vector<1xf32> to vector<1x1x1xf32>
    %957 = vector.extract %956[0, 0, 0] : f32 from vector<1x1x1xf32>
    %958 = vector.broadcast %957 : f32 to vector<1x1xf32>
    %959 = arith.addf %950, %958 : vector<1x1xf32>
    %960 = vector.broadcast %949 : vector<1x1xf32> to vector<16x16xf32>
    %961 = arith.subf %578, %960 : vector<16x16xf32>
    %962 = arith.mulf %961, %961 : vector<16x16xf32>
    %963 = vector.shape_cast %962 : vector<16x16xf32> to vector<1x16x16xf32>
    %cst_88 = arith.constant dense<0.000000e+00> : vector<1xf32>
    %964 = vector.multi_reduction <add>, %963, %cst_88 [1, 2] : vector<1x16x16xf32> to vector<1xf32>
    %965 = vector.shape_cast %964 : vector<1xf32> to vector<1x1x1xf32>
    %966 = vector.extract %965[0, 0, 0] : f32 from vector<1x1x1xf32>
    %967 = vector.broadcast %966 : f32 to vector<1x1xf32>
    %968 = arith.addf %959, %967 : vector<1x1xf32>
    %969 = vector.broadcast %949 : vector<1x1xf32> to vector<16x16xf32>
    %970 = arith.subf %724, %969 : vector<16x16xf32>
    %971 = arith.mulf %970, %970 : vector<16x16xf32>
    %972 = vector.shape_cast %971 : vector<16x16xf32> to vector<1x16x16xf32>
    %cst_89 = arith.constant dense<0.000000e+00> : vector<1xf32>
    %973 = vector.multi_reduction <add>, %972, %cst_89 [1, 2] : vector<1x16x16xf32> to vector<1xf32>
    %974 = vector.shape_cast %973 : vector<1xf32> to vector<1x1x1xf32>
    %975 = vector.extract %974[0, 0, 0] : f32 from vector<1x1x1xf32>
    %976 = vector.broadcast %975 : f32 to vector<1x1xf32>
    %977 = arith.addf %968, %976 : vector<1x1xf32>
    %978 = vector.broadcast %949 : vector<1x1xf32> to vector<16x16xf32>
    %979 = arith.subf %821, %978 : vector<16x16xf32>
    %980 = arith.mulf %979, %979 : vector<16x16xf32>
    %981 = vector.shape_cast %980 : vector<16x16xf32> to vector<1x16x16xf32>
    %cst_90 = arith.constant dense<0.000000e+00> : vector<1xf32>
    %982 = vector.multi_reduction <add>, %981, %cst_90 [1, 2] : vector<1x16x16xf32> to vector<1xf32>
    %983 = vector.shape_cast %982 : vector<1xf32> to vector<1x1x1xf32>
    %984 = vector.extract %983[0, 0, 0] : f32 from vector<1x1x1xf32>
    %985 = vector.broadcast %984 : f32 to vector<1x1xf32>
    %986 = arith.addf %977, %985 : vector<1x1xf32>
    %cst_91 = arith.constant 9.765625E-4 : f32
    %987 = vector.broadcast %cst_91 : f32 to vector<1x1xf32>
    %988 = arith.mulf %986, %987 : vector<1x1xf32>
    %cst_92 = arith.constant 9.99999974E-6 : f32
    %989 = vector.broadcast %cst_92 : f32 to vector<1x1xf32>
    %990 = arith.addf %988, %989 : vector<1x1xf32>
    %991 = math.rsqrt %990 : vector<1x1xf32>
    %cst_93 = arith.constant 0.000000e+00 : f32
    %992 = vector.broadcast %cst_93 : f32 to vector<32x32xf32>
    %cst_94 = arith.constant 0.000000e+00 : f32
    %993 = vector.broadcast %cst_94 : f32 to vector<16x32xf32>
    %994 = vector.broadcast %949 : vector<1x1xf32> to vector<16x16xf32>
    %995 = arith.subf %385, %994 : vector<16x16xf32>
    %996 = vector.broadcast %991 : vector<1x1xf32> to vector<16x16xf32>
    %997 = arith.mulf %995, %996 : vector<16x16xf32>
    %cst_95 = arith.constant 5.000000e-01 : f32
    %998 = vector.broadcast %cst_95 : f32 to vector<16x16xf32>
    %999 = arith.mulf %998, %997 : vector<16x16xf32>
    %cst_96 = arith.constant 0.707106769 : f32
    %1000 = vector.broadcast %cst_96 : f32 to vector<16x16xf32>
    %1001 = arith.mulf %997, %1000 : vector<16x16xf32>
    %1002 = math.erf %1001 : vector<16x16xf32>
    %cst_97 = arith.constant 1.000000e+00 : f32
    %1003 = vector.broadcast %cst_97 : f32 to vector<16x16xf32>
    %1004 = arith.addf %1003, %1002 : vector<16x16xf32>
    %1005 = arith.mulf %999, %1004 : vector<16x16xf32>
    %cst_98 = arith.constant dense<0.000000e+00> : vector<16x32xf32>
    %1006 = tpu.matmul %1005, %26, %cst_98 {dimension_numbers = #tpu.dot_dimension_numbers<[1], [0], [0], [1], [0, 0, 1, 1], [], []>} : vector<16x16xf32>, vector<16x32xf32>, vector<16x32xf32> -> vector<16x32xf32>
    %1007 = arith.addf %993, %1006 : vector<16x32xf32>
    %1008 = vector.broadcast %949 : vector<1x1xf32> to vector<16x16xf32>
    %1009 = arith.subf %578, %1008 : vector<16x16xf32>
    %1010 = vector.broadcast %991 : vector<1x1xf32> to vector<16x16xf32>
    %1011 = arith.mulf %1009, %1010 : vector<16x16xf32>
    %cst_99 = arith.constant 5.000000e-01 : f32
    %1012 = vector.broadcast %cst_99 : f32 to vector<16x16xf32>
    %1013 = arith.mulf %1012, %1011 : vector<16x16xf32>
    %cst_100 = arith.constant 0.707106769 : f32
    %1014 = vector.broadcast %cst_100 : f32 to vector<16x16xf32>
    %1015 = arith.mulf %1011, %1014 : vector<16x16xf32>
    %1016 = math.erf %1015 : vector<16x16xf32>
    %cst_101 = arith.constant 1.000000e+00 : f32
    %1017 = vector.broadcast %cst_101 : f32 to vector<16x16xf32>
    %1018 = arith.addf %1017, %1016 : vector<16x16xf32>
    %1019 = arith.mulf %1013, %1018 : vector<16x16xf32>
    %cst_102 = arith.constant dense<0.000000e+00> : vector<16x32xf32>
    %1020 = tpu.matmul %1019, %33, %cst_102 {dimension_numbers = #tpu.dot_dimension_numbers<[1], [0], [0], [1], [0, 0, 1, 1], [], []>} : vector<16x16xf32>, vector<16x32xf32>, vector<16x32xf32> -> vector<16x32xf32>
    %1021 = arith.addf %1007, %1020 : vector<16x32xf32>
    %cst_103 = arith.constant dense<0.000000e+00> : vector<32x32xf32>
    %1022 = tpu.matmul %10, %1021, %cst_103 {dimension_numbers = #tpu.dot_dimension_numbers<[1], [0], [0], [1], [0, 0, 1, 1], [], []>} : vector<32x16xf32>, vector<16x32xf32>, vector<32x32xf32> -> vector<32x32xf32>
    %1023 = arith.addf %992, %1022 : vector<32x32xf32>
    %cst_104 = arith.constant 0.000000e+00 : f32
    %1024 = vector.broadcast %cst_104 : f32 to vector<16x32xf32>
    %1025 = vector.broadcast %949 : vector<1x1xf32> to vector<16x16xf32>
    %1026 = arith.subf %724, %1025 : vector<16x16xf32>
    %1027 = vector.broadcast %991 : vector<1x1xf32> to vector<16x16xf32>
    %1028 = arith.mulf %1026, %1027 : vector<16x16xf32>
    %cst_105 = arith.constant 5.000000e-01 : f32
    %1029 = vector.broadcast %cst_105 : f32 to vector<16x16xf32>
    %1030 = arith.mulf %1029, %1028 : vector<16x16xf32>
    %cst_106 = arith.constant 0.707106769 : f32
    %1031 = vector.broadcast %cst_106 : f32 to vector<16x16xf32>
    %1032 = arith.mulf %1028, %1031 : vector<16x16xf32>
    %1033 = math.erf %1032 : vector<16x16xf32>
    %cst_107 = arith.constant 1.000000e+00 : f32
    %1034 = vector.broadcast %cst_107 : f32 to vector<16x16xf32>
    %1035 = arith.addf %1034, %1033 : vector<16x16xf32>
    %1036 = arith.mulf %1030, %1035 : vector<16x16xf32>
    %cst_108 = arith.constant dense<0.000000e+00> : vector<16x32xf32>
    %1037 = tpu.matmul %1036, %26, %cst_108 {dimension_numbers = #tpu.dot_dimension_numbers<[1], [0], [0], [1], [0, 0, 1, 1], [], []>} : vector<16x16xf32>, vector<16x32xf32>, vector<16x32xf32> -> vector<16x32xf32>
    %1038 = arith.addf %1024, %1037 : vector<16x32xf32>
    %1039 = vector.broadcast %949 : vector<1x1xf32> to vector<16x16xf32>
    %1040 = arith.subf %821, %1039 : vector<16x16xf32>
    %1041 = vector.broadcast %991 : vector<1x1xf32> to vector<16x16xf32>
    %1042 = arith.mulf %1040, %1041 : vector<16x16xf32>
    %cst_109 = arith.constant 5.000000e-01 : f32
    %1043 = vector.broadcast %cst_109 : f32 to vector<16x16xf32>
    %1044 = arith.mulf %1043, %1042 : vector<16x16xf32>
    %cst_110 = arith.constant 0.707106769 : f32
    %1045 = vector.broadcast %cst_110 : f32 to vector<16x16xf32>
    %1046 = arith.mulf %1042, %1045 : vector<16x16xf32>
    %1047 = math.erf %1046 : vector<16x16xf32>
    %cst_111 = arith.constant 1.000000e+00 : f32
    %1048 = vector.broadcast %cst_111 : f32 to vector<16x16xf32>
    %1049 = arith.addf %1048, %1047 : vector<16x16xf32>
    %1050 = arith.mulf %1044, %1049 : vector<16x16xf32>
    %cst_112 = arith.constant dense<0.000000e+00> : vector<16x32xf32>
    %1051 = tpu.matmul %1050, %33, %cst_112 {dimension_numbers = #tpu.dot_dimension_numbers<[1], [0], [0], [1], [0, 0, 1, 1], [], []>} : vector<16x16xf32>, vector<16x32xf32>, vector<16x32xf32> -> vector<16x32xf32>
    %1052 = arith.addf %1038, %1051 : vector<16x32xf32>
    %cst_113 = arith.constant dense<0.000000e+00> : vector<32x32xf32>
    %1053 = tpu.matmul %17, %1052, %cst_113 {dimension_numbers = #tpu.dot_dimension_numbers<[1], [0], [0], [1], [0, 0, 1, 1], [], []>} : vector<32x16xf32>, vector<16x32xf32>, vector<32x32xf32> -> vector<32x32xf32>
    %1054 = arith.addf %1023, %1053 : vector<32x32xf32>
    %c0_114 = arith.constant 0 : index
    %c1_115 = arith.constant 1 : index
    %c0_116 = arith.constant 0 : index
    %c0_117 = arith.constant 0 : index
    %1055 = vector.load %arg3[%c0_114, %c1_115, %c0_116, %c0_117] : memref<1x2x32x32xf32, #tpu.memory_space<vmem>>, vector<1x1x32x32xf32>
    %1056 = vector.shape_cast %1055 : vector<1x1x32x32xf32> to vector<32x32xf32>
    %1057 = vector.shape_cast %1054 : vector<32x32xf32> to vector<1x1x32x32xf32>
    tpu.vector_store %arg3[%c0_114, %c1_115, %c0_116, %c0_117], %1057 {strides = array<i32>} : memref<1x2x32x32xf32, #tpu.memory_space<vmem>>, vector<1x1x32x32xf32>,
    return
  }
  func.func @transform_0(%arg0: i32) -> (i32, i32, i32, i32) {
    %c0_i32 = arith.constant 0 : i32
    %c0_i32_0 = arith.constant 0 : i32
    %c0_i32_1 = arith.constant 0 : i32
    %c0_i32_2 = arith.constant 0 : i32
    return %arg0, %c0_i32, %c0_i32_0, %c0_i32_1 : i32, i32, i32, i32
  }
  func.func @transform_1(%arg0: i32) -> i32 {
    %c0_i32 = arith.constant 0 : i32
    %c0_i32_0 = arith.constant 0 : i32
    return %c0_i32 : i32
  }
  func.func @transform_2(%arg0: i32) -> (i32, i32, i32, i32) {
    %c0_i32 = arith.constant 0 : i32
    %c0_i32_0 = arith.constant 0 : i32
    %c0_i32_1 = arith.constant 0 : i32
    %c0_i32_2 = arith.constant 0 : i32
    return %arg0, %c0_i32, %c0_i32_0, %c0_i32_1 : i32, i32, i32, i32
  }
}

</mosaic_0001>

<bundles_post_ra>
// kernel: tpu_custom_call.1
= control target key start
LH: loop header
LB: loop body
LE: loop exit
PB: predicated region body
PF: predicated region fallthrough
CT: control target
= control target key end

     0   :  { %s5395_s0 = inlined_call_operand.hbm [shape: f32[2,4,16,16], index: 0, kind: input, shape index: {}]   ;;  %s5396_s1 = inlined_call_operand.vmem [shape: f32[128], index: 1, kind: input, shape index: {}]   ;;  %s5397_s2 = inlined_call_operand.hbm [shape: f32[2,2,32,32], index: 2, kind: output, shape index: {}]  }
   0x1   :  { %5418 = sst [smem:[#allocation18_spill]] %s5395_s0 }
   0x2   :  { %5419 = sst [smem:[#allocation19_spill]] %s5396_s1 }
   0x3   :  { %7 = vsyncpa [#allocation4], 0 }
   0x4   :  { %9 = vsyncpa [#allocation4 + $0x1], 0 }
   0x5   :  { %10 = vsyncpa [#allocation6], 0 }
   0x6   :  { %11 = vsyncpa [#allocation5], 0 }
   0x7   :  { %13 = vsyncpa [#allocation5 + $0x1], 0  ;;  %s3791_s9 = smov 0   ;;  %s3793_s10 = smov 0  }
   0x8   :  { %s3795_s11 = smov 0   ;;  %s3797_s12 = smov 0  }
   0x9 LB: > { %s3812_s13 = sadd.s32 4294967295, %s3763_s12   ;;  %s3080_s14 = sadd.s32 4294967294, %s3763_s12   ;;  %s3763_s12 = sphi %s3797_s12, %s5464_s12   ;;  %s3759_s11 = sphi %s3795_s11, %s5463_s11   ;;  %s3755_s10 = sphi %s3793_s10, %s5462_s10   ;;  %s3751_s9 = sphi %s3791_s9, %s5461_s9  }
   0xa   : > { %s3816_s15 = sadd.s32 1, %s3763_s12   ;;  %s26_s16 = sadd.s32 1, %s3759_s11 }
   0xb   : > { %s23_s17 = ssub.s32 %s3763_s12, %s3816_s15  ;;  %p33_p0 = scmp.ne.s32.totalorder %s3759_s11, %s3755_s10 }
   0xc   : > { %p24_p1 = scmp.eq.s32.totalorder %s23_s17, 0  ;;  %p34_p2 = scmp.eq.s32.totalorder %s3763_s12, 0 }
   0xd   : > { %p39_p3 = scmp.ne.s32.totalorder %s3755_s10, %s3751_s9  ;;  %p5399_p4 = scmp.eq.s32.totalorder %s3812_s13, 0 }
   0xe   : > { %s3828_s18 = scalar_select %p24_p1, %s3759_s11, %s26_s16  }
   0xf   : > { %p3830_p5 = por %p34_p2, %p33_p0  ;;  %p3836_p6 = por %p5399_p4, %p39_p3 }
  0x10   : > { %p84_p7 = scmp.eq.s32.totalorder %s3812_s13, 1  ;;  %p90_p8 = scmp.eq.s32.totalorder %s3080_s14, 1 }
  0x11   : > { %s5421_s20 = scalar_select %p3836_p6, 1, 0 }
  0x12   : > { %p3081_p9 = scmp.ge.s32.totalorder %s3763_s12, 1  ;;  %p97_p10 = scmp.lt.s32.totalorder %s3763_s12, 3 }
  0x13   : > { %p3843_p11 = por %p84_p7, %p33_p0  ;;  %p3847_p12 = por %p90_p8, %p39_p3 }
  0x14   : > { %p3851_p13 = pnand %p3081_p9, %p97_p10  ;;  %s5425_s1 = sld [smem:[#allocation19_spill]] }
  0x15   : > { %s5422_s21 = scalar_select %p3843_p11, 1, 0 }
  0x16   : > { %s5423_s22 = scalar_select %p3847_p12, 1, 0 }
  0x17   : > { %p3533_p1 = pneg %p3851_p13  ;;  %p3546_p2 = scmp.lt.s32.totalorder %s3763_s12, 2 }
  0x18   : > { %s121_s28 = sand.u32 1, %s3759_s11  }
  0x19   : > { %p3864_p7 = pnand %p3533_p1, %p5399_p4  ;;  %p3871_p3 = pnand %p3546_p2, %p3830_p5 }
  0x1a   : > { %s110_s26 = sshll.u32 %s5425_s1, 4  ;;  %s3084_s30 = sshll.u32 %s121_s28, 6  ;;  %s111_s26 = int_to_ptr.vmem [resolvable:$true] %s110_s26 }
  0x1b   : > { %s3648_s3 = scalar_lea.vmem %s111_s26, 16  ;;  %p3650_p9 = pneg %p3864_p7 }
  0x1c   : > { %p3649_p8 = scmp.ne.s32.totalorder %s111_s26, %s3648_s3  ;;  %p3656_p12 = scmp.lt.s32.totalorder %s111_s26, %s111_s26 }
  0x1d   : > { %p3657_p11 = scmp.lt.s32.totalorder %s3648_s3, %s3648_s3 }
  0x1e   : > { %p3651_p10 = pnand %p3650_p9, %p3649_p8 }
  0x1f   : > { %p3658_p1 = por %p3657_p11, %p3656_p12 }
  0x20   : > { %p3652_p0 = pneg %p3651_p10 }
  0x22   : > { %p3659_p4 = pnand %p3658_p1, %p3652_p0 }
  0x24   : > { %3662 = shalt.err (!%p3659_p4)
}
  0x25   : > { %s3765_s4 = smov [#allocation7]   ;;  %s3287_s5 = sshll.u32 %s3763_s12, 10 }
  0x26   : > { %3536 = dma.vmem_to_smem (!%p3864_p7), %s111_s26, 16, %s3765_s4, [#allocation6]  }
  0x27   : > { %s125_s6 = scalar_lea.vmem [#allocation3], %s3084_s30  ;;  %s5428_s0 = sld [smem:[#allocation18_spill]] }
  0x28   : > { %s132_s7 = sshll.u32 %s125_s6, 4  ;;  %s3887_s17 = scalar_lea.sflag [#allocation4], %s121_s28  ;;  %s3885_s7 = int_to_ptr.vmem [resolvable:$true] %s132_s7 }
  0x29   : > { %p3665_p5 = pneg %p3871_p3 }
  0x2d   : > { %s3883_s16 = scalar_lea.hbm %s5428_s0, %s3287_s5  ;;  %s3668_s26 = scalar_lea.hbm %s5428_s0, 2048 }
  0x2e   : > { %s3663_s19 = scalar_lea.hbm %s3883_s16, 1024  ;;  %p3669_p0 = scmp.lt.u32.totalorder %s3883_s16, %s5428_s0 }
  0x2f   : > { %p3664_p4 = scmp.ne.s32.totalorder %s3883_s16, %s3663_s19  ;;  %p3670_p2 = scmp.lt.u32.totalorder %s3668_s26, %s3663_s19 }
  0x30   : > { %p3672_p8 = scmp.lt.u32.totalorder %s3663_s19, %s3883_s16 }
  0x31   : > { %p3666_p11 = pnand %p3665_p5, %p3664_p4  ;;  %p3671_p7 = por %p3670_p2, %p3669_p0 }
  0x33   : > { %p3667_p12 = pneg %p3666_p11  ;;  %p3673_p9 = por %p3672_p8, %p3671_p7 }
  0x35   : > { %p3674_p10 = pnand %p3673_p9, %p3667_p12 }
  0x37   : > { %3677 = shalt.err (!%p3674_p10)
}
  0x38   : > { %s3678_s28 = scalar_lea.vmem %s3885_s7, 1024  ;;  %s3766_s3 = smov [#allocation3]  }
  0x39   : > { %p3679_p1 = scmp.ne.s32.totalorder %s3885_s7, %s3678_s28  ;;  %s3683_s4 = sshll.u32 %s3766_s3, 4  ;;  %s3684_s4 = int_to_ptr.vmem [resolvable:$false] %s3683_s4 }
  0x3a   : > { %s3685_s5 = scalar_lea.vmem %s3684_s4, 2048  ;;  %p3686_p6 = scmp.lt.s32.totalorder %s3885_s7, %s3684_s4 }
  0x3b   : > { %p3681_p4 = pnand %p3679_p1, %p3665_p5  ;;  %p3687_p0 = scmp.lt.s32.totalorder %s3685_s5, %s3678_s28 }
  0x3d   : > { %p3682_p11 = pneg %p3681_p4  ;;  %p3688_p2 = por %p3687_p0, %p3686_p6 }
  0x3f   : > { %p3689_p7 = pnand %p3688_p2, %p3682_p11 }
  0x41   : > { %3692 = shalt.err (!%p3689_p7)
}
  0x42   : > { %s3767_s6 = smov 128   ;;  %s3768_s8 = smov 8  }
  0x43   : > { %3540 = dma.hbm_to_vmem [thread:$0]  (!%p3871_p3), %s3883_s16, 1024, %s3885_s7, %s3887_s17, %s3767_s6, %s3767_s6, %s3768_s8  }
  0x44   : > { %144 = sbr.rel (%p3851_p13) target bundleno = 2052 (0x804), region = 28 }
  0x4b   : > { %s3918_s14 = sand.u32 1, %s3755_s10   ;;  %p5429_p6 = scmp.ne.s32.totalorder %s5421_s20, 0 }
  0x4c   : > { %s5410_s19 = sshll.u32 %s3918_s14, 6  ;;  %s147_s24 = scalar_lea.sflag [#allocation4], %s3918_s14 }
  0x4d   : > { %s3924_s25 = scalar_lea.vmem [#allocation3], %s5410_s19 }
  0x4e   : > { %3738 = dma.done.wait (%p5429_p6), %s147_s24, 1024  }
  0x4f   : > { %3740 = vsyncadd (%p5429_p6), %s147_s24, 4294966272  ;;  %p5430_p3 = scmp.eq.s32.totalorder %s3812_s13, 0 }
  0x51   : > { %3742 = dma.done.wait (%p5430_p3), [#allocation6], 16   ;;  %p5431_p13 = pmov %p5430_p3 }
  0x53   : > { %3744 = vsyncadd (%p5431_p13), [#allocation6], 4294967280 }
  0x54   : > { %159 = sfence }
  0x55   : > { %v241_v0 = vld [vmem:[%s3924_s25 + $0x10] sm:$0xff]  ;;  %v239_v1 = vld [vmem:[%s3924_s25] sm:$0xff]  ;;  %vm176_vm0 = vcmask 146432   ;;  %s3769_s23 = smov 1   ;;  %vm179_vm1 = vcmask 140288   ;;  %v242_v2 = vld [vmem:[%s3924_s25 + $0x18] sm:$0xff] }
  0x56   : > { %259 = vrot.lane.b32.xlu1 %v241_v0, %s3769_s23  ;;  %255 = vrot.lane.b32.xlu0 %v239_v1, %s3769_s23  ;;  %v240_v3 = vld [vmem:[%s3924_s25 + $0x8] sm:$0xff]  ;;  %v5401_v4 = vmov 0.0   ;;  %v243_v6 = vld [vmem:[%s3924_s25 + $0x20] sm:$0xff]  ;;  %vm279_vm2 = vcmask 138248   ;;  %s3954_s20 = sld [smem:[#allocation7 + $0x28]]  ;;  %s3956_s29 = sld [smem:[#allocation7 + $0x2a]] }
  0x57   : > { %181 = vst.msk [vmem:[#allocation2 + $0x18] sm:$0xff] %vm176_vm0, %v5401_v4  ;;  %182 = vst.msk [vmem:[#allocation2 + $0x20] sm:$0xff] %vm176_vm0, %v5401_v4  ;;  %v244_v5 = vld [vmem:[%s3924_s25 + $0x28] sm:$0xff]  ;;  %v246_v7 = vld [vmem:[%s3924_s25 + $0x38] sm:$0xff]  ;;  %s3963_s7 = sld [smem:[#allocation7 + $0x2c]]  ;;  %s3971_s16 = sld [smem:[#allocation7 + $0x68]] }
  0x58   : > { %177 = vst.msk [vmem:[#allocation2] sm:$0xff] %vm176_vm0, %v5401_v4  ;;  %178 = vst.msk [vmem:[#allocation2 + $0x8] sm:$0xff] %vm176_vm0, %v5401_v4  ;;  %v245_v8 = vld [vmem:[%s3924_s25 + $0x30] sm:$0xff]  ;;  %s3975_s17 = sld [smem:[#allocation7 + $0x20]]  ;;  %s3977_s26 = sld [smem:[#allocation7 + $0x22]]  ;;  %vm1614_vm3 = vcmask 130048  }
  0x59   : > { %184 = vst.msk [vmem:[#allocation2 + $0x30] sm:$0xff] %vm176_vm0, %v5401_v4  ;;  %185 = vst.msk [vmem:[#allocation2 + $0x38] sm:$0xff] %vm176_vm0, %v5401_v4  ;;  %s5411_s27 = smov 127   ;;  %s3983_s30 = sld [smem:[#allocation7 + $0x2e]] }
  0x5a   : > { %187 = vst.msk [vmem:[#allocation2 + $0x48] sm:$0xff] %vm176_vm0, %v5401_v4  ;;  %188 = vst.msk [vmem:[#allocation2 + $0x50] sm:$0xff] %vm176_vm0, %v5401_v4  ;;  %261 = vrot.lane.b32.xlu1 %v242_v2, %s3769_s23  ;;  %257 = vrot.lane.b32.xlu0 %v240_v3, %s3769_s23  ;;  %s3991_s28 = sld [smem:[#allocation7 + $0x24]]  ;;  %s3993_s3 = sld [smem:[#allocation7 + $0x26]] }
  0x5b   : > { %183 = vst.msk [vmem:[#allocation2 + $0x28] sm:$0x3] %vm179_vm1, %v5401_v4  ;;  %180 = vst.msk [vmem:[#allocation2 + $0x10] sm:$0x3] %vm179_vm1, %v5401_v4  ;;  %s4006_s4 = sld [smem:[#allocation7 + $0x6a]]  ;;  %s4021_s5 = sld [smem:[#allocation7 + $0x6c]] }
  0x5c   : > { %186 = vst.msk [vmem:[#allocation2 + $0x40] sm:$0x3] %vm179_vm1, %v5401_v4  ;;  %189 = vst.msk [vmem:[#allocation2 + $0x58] sm:$0x3] %vm179_vm1, %v5401_v4  ;;  %v505_v13 = vstv %s3954_s20  ;;  %v519_v17 = vstv %s3956_s29  ;;  %s4035_s6 = sld [smem:[#allocation7 + $0x6e]]  ;;  %s4038_s8 = sld [smem:[#allocation7 + $0x2]] }
  0x5d   : > { %v533_v26 = vstv %s3963_s7  ;;  %v1153_v32 = vstv %s3971_s16  ;;  %s4044_s24 = sld [smem:[#allocation7]]  ;;  %s4046_s25 = sld [smem:[#allocation7 + $0x4]] }
  0x5e   : > { %265 = vrot.lane.b32.xlu1 %v244_v5, %s3769_s23  ;;  %263 = vrot.lane.b32.xlu0 %v243_v6, %s3769_s23  ;;  %v457_v33 = vstv %s3975_s17  ;;  %v463_v34 = vstv %s3977_s26  ;;  %s4057_s20 = sld [smem:[#allocation7 + $0x38]]  ;;  %s4070_s29 = sld [smem:[#allocation7 + $0x3a]] }
  0x5f   : > { %v547_v36 = vstv %s3983_s30  ;;  %s4086_s7 = sld [smem:[#allocation7 + $0x3c]]  ;;  %s4102_s16 = sld [smem:[#allocation7 + $0x78]] }
  0x60   : > { %v469_v42 = vstv %s3991_s28  ;;  %v475_v43 = vstv %s3993_s3  ;;  %s4110_s17 = sld [smem:[#allocation7 + $0x3e]]  ;;  %s4114_s26 = sld [smem:[#allocation7 + $0x21]] }
  0x61   : > { %v1167_v51 = vstv %s4006_s4  ;;  %v1181_v61 = vstv %s4021_s5  ;;  %s4117_s30 = sld [smem:[#allocation7 + $0x23]]  ;;  %s4119_s28 = sld [smem:[#allocation7 + $0x25]] }
  0x62   : > { %269 = vrot.lane.b32.xlu1 %v246_v7, %s3769_s23  ;;  %267 = vrot.lane.b32.xlu0 %v245_v8, %s3769_s23  ;;  %s4054_s23 = sld [smem:[#allocation7 + $0x6]]  ;;  %v1195_v5 = vstv %s4035_s6  ;;  %v303_v6 = vstv %s4038_s8  ;;  %s4123_s3 = sld [smem:[#allocation7 + $0x27]] }
  0x63   : > { %v297_v7 = vstv %s4044_s24  ;;  %v309_v8 = vstv %s4046_s25  ;;  %s4130_s4 = sld [smem:[#allocation7 + $0x7a]]  ;;  %s4134_s5 = sld [smem:[#allocation7 + $0x2f]] }
  0x64   : > { %s4141_s6 = sld [smem:[#allocation7 + $0x7c]]  ;;  %s4157_s8 = sld [smem:[#allocation7 + $0x7e]] }
  0x65   : > { %s4165_s24 = sld [smem:[#allocation7 + $0xd]]  ;;  %s4168_s25 = sld [smem:[#allocation7 + $0xf]] }
  0x66   : > { %s4558_s19 = sld [smem:[#allocation7 + $0x14]]  ;;  %s5434_s1 = smov 127  }
  0x67   : > { %s4583_s0 = sld [smem:[#allocation7 + $0x54]]  ;;  %p5458_p12 = scmp.ne.s32.totalorder %s5422_s21, 0 }
  0xc8   : > { %v260_v9 = vpop.permute.xlu1 %259  ;;  %v256_v10 = vpop.permute.xlu0 %255 }
  0xc9   : > { %282 = vst.msk [vmem:[#allocation2 + $0x19] sm:$0xff] %vm279_vm2, %v260_v9  ;;  %280 = vst.msk [vmem:[#allocation2 + $0x1] sm:$0xff] %vm279_vm2, %v256_v10 }
  0xcc   : > { %v262_v11 = vpop.permute.xlu1 %261  ;;  %v258_v12 = vpop.permute.xlu0 %257 }
  0xcd   : > { %283 = vst.msk [vmem:[#allocation2 + $0x21] sm:$0xff] %vm279_vm2, %v262_v11  ;;  %281 = vst.msk [vmem:[#allocation2 + $0x9] sm:$0xff] %vm279_vm2, %v258_v12 }
  0xd0   : > { %v266_v14 = vpop.permute.xlu1 %265  ;;  %v264_v15 = vpop.permute.xlu0 %263  ;;  %v3965_v16 = vld [vmem:[#allocation2] sm:$0xff]  ;;  %v3973_v19 = vld [vmem:[#allocation2 + $0x18] sm:$0xff] }
  0xd1   : > { %285 = vst.msk [vmem:[#allocation2 + $0x39] sm:$0xff] %vm279_vm2, %v266_v14  ;;  %284 = vst.msk [vmem:[#allocation2 + $0x31] sm:$0xff] %vm279_vm2, %v264_v15  ;;  %v506_v18 = vmul.f32 %v505_v13, %v3965_v16  ;;  %v520_v20 = vmul.f32 %v519_v17, %v3973_v19  ;;  %v4001_v30 = vld [vmem:[#allocation2 + $0x1] sm:$0xff]  ;;  %v464_v38 = vmul.f32 %v463_v34, %v3973_v19  ;;  %v4048_v56 = vld [vmem:[#allocation2 + $0x19] sm:$0xff]  ;;  %v315_v14 = vstv %s4054_s23  ;;  %s4171_s23 = sld [smem:[#allocation7 + $0x3]] }
  0xd2   : > { %v1154_v37 = vmul.f32 %v1153_v32, %v4001_v30  ;;  %v458_v39 = vmul.f32 %v457_v33, %v3965_v16  ;;  %v1168_v57 = vmul.f32 %v1167_v51, %v4048_v56  ;;  %v1041_v15 = vstv %s4057_s20  ;;  %s4175_s20 = sld [smem:[#allocation7 + $0x1]] }
  0xd3   : > { %510 = vrot.lane.b32.xlu0 %v506_v18, %s5411_s27  ;;  %v298_v18 = vmul.f32 %v297_v7, %v3965_v16 }
  0xd4   : > { %v270_v21 = vpop.permute.xlu1 %269  ;;  %v268_v22 = vpop.permute.xlu0 %267  ;;  %v3981_v23 = vld [vmem:[#allocation2 + $0x8] sm:$0xff]  ;;  %v3988_v25 = vld [vmem:[#allocation2 + $0x20] sm:$0xff]  ;;  %v466_v49 = vadd.f32 %v464_v38, %v458_v39 }
  0xd5   : > { %287 = vst.msk [vmem:[#allocation2 + $0x51] sm:$0xff] %vm279_vm2, %v270_v21  ;;  %286 = vst.msk [vmem:[#allocation2 + $0x49] sm:$0xff] %vm279_vm2, %v268_v22  ;;  %v507_v24 = vmul.f32 %v505_v13, %v3981_v23  ;;  %v521_v28 = vmul.f32 %v519_v17, %v3988_v25  ;;  %v4017_v40 = vld [vmem:[#allocation2 + $0x9] sm:$0xff]  ;;  %v465_v52 = vmul.f32 %v463_v34, %v3988_v25  ;;  %v4061_v63 = vld [vmem:[#allocation2 + $0x21] sm:$0xff]  ;;  %vm2294_vm2 = vcmask 261120  }
  0xd6   : > { %v1155_v45 = vmul.f32 %v1153_v32, %v4017_v40  ;;  %v459_v55 = vmul.f32 %v457_v33, %v3981_v23  ;;  %v1169_v1 = vmul.f32 %v1167_v51, %v4061_v63  ;;  %v304_v13 = vmul.f32 %v303_v6, %v3973_v19 }
  0xd7   : > { %512 = vrot.lane.b32.xlu1 %v507_v24, %s5411_s27  ;;  %524 = vrot.lane.b32.xlu0 %v520_v20, %s5411_s27  ;;  %v305_v20 = vmul.f32 %v303_v6, %v3988_v25  ;;  %v299_v22 = vmul.f32 %v297_v7, %v3981_v23  ;;  %v1042_v32 = vmul.f32 %v1041_v15, %v4001_v30  ;;  %v1495_v6 = vstv %s4130_s4  ;;  %s3168_s4 = sld [smem:[#allocation7 + $0x4c]] }
  0xd8   : > { %v3997_v27 = vld [vmem:[#allocation2 + $0x30] sm:$0xff]  ;;  %v4003_v31 = vld [vmem:[#allocation2 + $0x38] sm:$0xff]  ;;  %v467_v60 = vadd.f32 %v465_v52, %v459_v55  ;;  %v1043_v39 = vmul.f32 %v1041_v15, %v4017_v40  ;;  %v487_v55 = vstv %s4117_s30  ;;  %s4241_s30 = sld [smem:[#allocation7 + $0xc]] }
  0xd9   : > { %v534_v29 = vmul.f32 %v533_v26, %v3997_v27  ;;  %v535_v35 = vmul.f32 %v533_v26, %v4003_v31  ;;  %v470_v47 = vmul.f32 %v469_v42, %v3997_v27  ;;  %v471_v54 = vmul.f32 %v469_v42, %v4003_v31  ;;  %v4063_v0 = vld [vmem:[#allocation2 + $0x31] sm:$0xff]  ;;  %v4077_v9 = vld [vmem:[#allocation2 + $0x39] sm:$0xff] }
  0xda   : > { %v1182_v2 = vmul.f32 %v1181_v61, %v4063_v0  ;;  %v1183_v11 = vmul.f32 %v1181_v61, %v4077_v9  ;;  %v310_v17 = vmul.f32 %v309_v8, %v3997_v27  ;;  %v311_v21 = vmul.f32 %v309_v8, %v4003_v31  ;;  %v4138_v52 = vld [vmem:[#allocation2 + $0xa] sm:$0xff] }
  0xdb   : > { %526 = vrot.lane.b32.xlu1 %v521_v28, %s5411_s27  ;;  %538 = vrot.lane.b32.xlu0 %v534_v29, %s5411_s27  ;;  %v472_v53 = vadd.f32 %v470_v47, %v466_v49  ;;  %v473_v62 = vadd.f32 %v471_v54, %v467_v60  ;;  %v306_v28 = vadd.f32 %v304_v13, %v298_v18  ;;  %v1481_v49 = vstv %s4102_s16  ;;  %s4195_s16 = sld [smem:[#allocation7 + $0x7]] }
  0xdc   : > { %v4019_v41 = vld [vmem:[#allocation2 + $0x48] sm:$0xff]  ;;  %v4029_v46 = vld [vmem:[#allocation2 + $0x50] sm:$0xff]  ;;  %v307_v34 = vadd.f32 %v305_v20, %v299_v22  ;;  %v481_v54 = vstv %s4114_s26  ;;  %v499_v60 = vstv %s4123_s3  ;;  %v489_v8 = vmul.f32 %v487_v55, %v3988_v25  ;;  %s4215_s26 = sld [smem:[#allocation7 + $0x48]]  ;;  %s3113_s3 = sld [smem:[#allocation7 + $0xe]] }
  0xdd   : > { %v548_v44 = vmul.f32 %v547_v36, %v4019_v41  ;;  %v476_v48 = vmul.f32 %v475_v43, %v4019_v41  ;;  %v549_v50 = vmul.f32 %v547_v36, %v4029_v46  ;;  %v477_v59 = vmul.f32 %v475_v43, %v4029_v46  ;;  %v4079_v10 = vld [vmem:[#allocation2 + $0x49] sm:$0xff]  ;;  %v4095_v24 = vld [vmem:[#allocation2 + $0x51] sm:$0xff] }
  0xde   : > { %v1196_v12 = vmul.f32 %v1195_v5, %v4079_v10  ;;  %v316_v26 = vmul.f32 %v315_v14, %v4019_v41  ;;  %v1197_v29 = vmul.f32 %v1195_v5, %v4095_v24  ;;  %v317_v33 = vmul.f32 %v315_v14, %v4029_v46  ;;  %v4154_v5 = vld [vmem:[#allocation2 + $0x1a] sm:$0xff]  ;;  %v4179_v22 = vld [vmem:[#allocation2 + $0x22] sm:$0xff] }
  0xdf   : > { %540 = vrot.lane.b32.xlu1 %v535_v35, %s5411_s27  ;;  %1158 = vrot.lane.b32.xlu0 %v1154_v37, %s5411_s27  ;;  %v4051_v58 = vadd.f32 %v476_v48, %v472_v53  ;;  %v4067_v3 = vadd.f32 %v477_v59, %v473_v62  ;;  %v1055_v35 = vstv %s4070_s29  ;;  %v312_v36 = vadd.f32 %v310_v17, %v306_v28  ;;  %v4127_v48 = vld [vmem:[#allocation2 + $0x2] sm:$0xff]  ;;  %s4177_s29 = sld [smem:[#allocation7 + $0x5]] }
  0xe0   : > { %v313_v37 = vadd.f32 %v311_v21, %v307_v34  ;;  %v1056_v42 = vmul.f32 %v1055_v35, %v4048_v56  ;;  %v1482_v51 = vmul.f32 %v1481_v49, %v4127_v48  ;;  %v1083_v53 = vstv %s4110_s17  ;;  %s4206_s17 = sld [smem:[#allocation7 + $0xa]] }
  0xe1   : > { %v4106_v38 = vadd.f32 %v316_v26, %v312_v36  ;;  %v1483_v59 = vmul.f32 %v1481_v49, %v4138_v52  ;;  %v1084_v61 = vmul.f32 %v1083_v53, %v4079_v10  ;;  %v488_v62 = vmul.f32 %v487_v55, %v3973_v19  ;;  %v4181_v26 = vld [vmem:[#allocation2 + $0x32] sm:$0xff] }
  0xe2   : > { %v4112_v43 = vadd.f32 %v317_v33, %v313_v37  ;;  %v483_v7 = vmul.f32 %v481_v54, %v3981_v23  ;;  %v500_v13 = vmul.f32 %v499_v60, %v4019_v41  ;;  %v501_v17 = vmul.f32 %v499_v60, %v4029_v46  ;;  %v4201_v37 = vld [vmem:[#allocation2 + $0x3a] sm:$0xff] }
  0xe3   : > { %1160 = vrot.lane.b32.xlu1 %v1155_v45, %s5411_s27  ;;  %552 = vrot.lane.b32.xlu0 %v548_v44, %s5411_s27  ;;  %v1069_v44 = vstv %s4086_s7  ;;  %v1057_v45 = vmul.f32 %v1055_v35, %v4061_v63  ;;  %v1085_v18 = vmul.f32 %v1083_v53, %v4095_v24  ;;  %v1496_v20 = vmul.f32 %v1495_v6, %v4154_v5  ;;  %s4184_s7 = sld [smem:[#allocation7 + $0x8]] }
  0xe4   : > { %v1070_v47 = vmul.f32 %v1069_v44, %v4063_v0  ;;  %v491_v15 = vadd.f32 %v489_v8, %v483_v7  ;;  %v1509_v28 = vstv %s4141_s6  ;;  %v1497_v35 = vmul.f32 %v1495_v6, %v4179_v22  ;;  %s3169_s6 = sld [smem:[#allocation7 + $0x4e]] }
  0xe5   : > { %v1510_v36 = vmul.f32 %v1509_v28, %v4181_v26  ;;  %v1511_v49 = vmul.f32 %v1509_v28, %v4201_v37  ;;  %v333_v53 = vstv %s4177_s29  ;;  %s3152_s29 = sld [smem:[#allocation7 + $0x1c]] }
  0xe6   : > { %v359_v7 = vstv %s4206_s17  ;;  %s3208_s17 = sld [smem:[#allocation7 + $0x5c]] }
  0xe7   : > { %554 = vrot.lane.b32.xlu1 %v549_v50, %s5411_s27  ;;  %1172 = vrot.lane.b32.xlu0 %v1168_v57, %s5411_s27  ;;  %v1071_v50 = vmul.f32 %v1069_v44, %v4077_v9  ;;  %v493_v57 = vstv %s4119_s28  ;;  %v5404_v44 = vstv %s4165_s24  ;;  %s3167_s28 = sld [smem:[#allocation7 + $0x4a]] }
  0xe9   : > { %v345_v55 = vstv %s4184_s7  ;;  %s3207_s7 = sld [smem:[#allocation7 + $0x5a]] }
  0xea   : > { %v346_v6 = vmul.f32 %v345_v55, %v3965_v16 }
  0xeb   : > { %1174 = vrot.lane.b32.xlu1 %v1169_v1, %s5411_s27  ;;  %1186 = vrot.lane.b32.xlu0 %v1182_v2, %s5411_s27  ;;  %v494_v1 = vmul.f32 %v493_v57, %v3997_v27  ;;  %v482_v2 = vmul.f32 %v481_v54, %v3965_v16  ;;  %v4219_v54 = vld [vmem:[#allocation2 + $0x52] sm:$0xff] }
  0xed   : > { %v490_v14 = vadd.f32 %v488_v62, %v482_v2  ;;  %v334_v62 = vmul.f32 %v333_v53, %v3997_v27 }
  0xef   : > { %1188 = vrot.lane.b32.xlu1 %v1183_v11, %s5411_s27  ;;  %1200 = vrot.lane.b32.xlu0 %v1196_v12, %s5411_s27  ;;  %v495_v11 = vmul.f32 %v493_v57, %v4003_v31  ;;  %v5405_v12 = vstv %s4134_s5  ;;  %v496_v21 = vadd.f32 %v494_v1, %v490_v14  ;;  %v4225_v57 = vmul.f32 %v5404_v44, %v4003_v31 }
  0xf0   : > { %v347_v14 = vmul.f32 %v345_v55, %v3981_v23 }
  0xf1   : > { %v4193_v33 = vadd.f32 %v500_v13, %v496_v21  ;;  %v361_v21 = vmul.f32 %v359_v7, %v3988_v25 }
  0xf3   : > { %1202 = vrot.lane.b32.xlu1 %v1197_v29, %s5411_s27  ;;  %1046 = vrot.lane.b32.xlu0 %v1042_v32, %s5411_s27  ;;  %v497_v29 = vadd.f32 %v495_v11, %v491_v15  ;;  %v4189_v32 = vmul.f32 %v5405_v12, %v4019_v41  ;;  %v360_v15 = vmul.f32 %v359_v7, %v3973_v19 }
  0xf5   : > { %v4197_v34 = vadd.f32 %v501_v17, %v497_v29  ;;  %v881_v17 = vstv %s4215_s26  ;;  %s3209_s26 = sld [smem:[#allocation7 + $0x5e]] }
  0xf7   : > { %1048 = vrot.lane.b32.xlu1 %v1043_v39, %s5411_s27  ;;  %1060 = vrot.lane.b32.xlu0 %v1056_v42, %s5411_s27  ;;  %v4203_v39 = vld [vmem:[#allocation2 + $0x4a] sm:$0xff]  ;;  %v1523_v42 = vstv %s4157_s8  ;;  %s3150_s8 = sld [smem:[#allocation7 + $0x18]] }
  0xf8   : > { %v1525_v2 = vmul.f32 %v1523_v42, %v4219_v54 }
  0xfb   : > { %1062 = vrot.lane.b32.xlu1 %v1057_v45, %s5411_s27  ;;  %1074 = vrot.lane.b32.xlu0 %v1070_v47, %s5411_s27  ;;  %v5403_v45 = vstv %s4168_s25  ;;  %v327_v47 = vstv %s4171_s23  ;;  %s3151_s23 = sld [smem:[#allocation7 + $0x1a]] }
  0xfc   : > { %v328_v60 = vmul.f32 %v327_v47, %v3973_v19  ;;  %v329_v29 = vmul.f32 %v327_v47, %v3988_v25 }
  0xff   : > { %1076 = vrot.lane.b32.xlu1 %v1071_v50, %s5411_s27  ;;  %1486 = vrot.lane.b32.xlu0 %v1482_v51, %s5411_s27  ;;  %v1524_v50 = vmul.f32 %v1523_v42, %v4203_v39  ;;  %v321_v51 = vstv %s4175_s20  ;;  %s3206_s20 = sld [smem:[#allocation7 + $0x58]] }
 0x100   : > { %v322_v1 = vmul.f32 %v321_v51, %v3965_v16  ;;  %v323_v28 = vmul.f32 %v321_v51, %v3981_v23 }
 0x102   : > { %v330_v11 = vadd.f32 %v328_v60, %v322_v1  ;;  %v331_v42 = vadd.f32 %v329_v29, %v323_v28  ;;  %v387_v1 = vstv %s3113_s3  ;;  %s4320_s3 = sld [smem:[#allocation7 + $0x64]] }
 0x103   : > { %1488 = vrot.lane.b32.xlu1 %v1483_v59, %s5411_s27  ;;  %1088 = vrot.lane.b32.xlu0 %v1084_v61, %s5411_s27  ;;  %v4232_v59 = vmul.f32 %v5403_v45, %v4029_v46  ;;  %v339_v61 = vstv %s4195_s16  ;;  %v389_v7 = vmul.f32 %v387_v1, %v4029_v46  ;;  %s3153_s16 = sld [smem:[#allocation7 + $0x1e]] }
 0x104   : > { %v340_v8 = vmul.f32 %v339_v61, %v4019_v41  ;;  %v336_v13 = vadd.f32 %v334_v62, %v330_v11  ;;  %v895_v62 = vstv %s3167_s28  ;;  %v923_v11 = vstv %s3169_s6  ;;  %s4316_s28 = sld [smem:[#allocation7 + $0x62]]  ;;  %s4326_s6 = sld [smem:[#allocation7 + $0x30]] }
 0x105   : > { %v1321_v29 = vstv %s3206_s20  ;;  %s4349_s20 = sld [smem:[#allocation7 + $0x70]] }
 0x107   : > { %1090 = vrot.lane.b32.xlu1 %v1085_v18, %s5411_s27  ;;  %1500 = vrot.lane.b32.xlu0 %v1496_v20, %s5411_s27  ;;  %v4249_v18 = vadd.f32 %v340_v8, %v336_v13  ;;  %v882_v20 = vmul.f32 %v881_v17, %v4001_v30 }
 0x10b   : > { %1502 = vrot.lane.b32.xlu1 %v1497_v35, %s5411_s27  ;;  %1514 = vrot.lane.b32.xlu0 %v1510_v36, %s5411_s27  ;;  %v335_v35 = vmul.f32 %v333_v53, %v4003_v31  ;;  %v373_v36 = vstv %s4241_s30  ;;  %v896_v53 = vmul.f32 %v895_v62, %v4048_v56  ;;  %s4314_s30 = sld [smem:[#allocation7 + $0x60]] }
 0x10c   : > { %v374_v55 = vmul.f32 %v373_v36, %v3997_v27  ;;  %v375_v51 = vmul.f32 %v373_v36, %v4003_v31  ;;  %v1322_v36 = vmul.f32 %v1321_v29, %v4127_v48 }
 0x10d   : > { %v337_v60 = vadd.f32 %v335_v35, %v331_v42  ;;  %v749_v42 = vstv %s3152_s29  ;;  %s4351_s29 = sld [smem:[#allocation7 + $0x36]] }
 0x10f   : > { %1516 = vrot.lane.b32.xlu1 %v1511_v49, %s5411_s27  ;;  %1528 = vrot.lane.b32.xlu0 %v1524_v50, %s5411_s27  ;;  %v341_v49 = vmul.f32 %v339_v61, %v4029_v46  ;;  %v883_v50 = vmul.f32 %v881_v17, %v4017_v40  ;;  %v897_v61 = vmul.f32 %v895_v62, %v4061_v63 }
 0x111   : > { %v4266_v47 = vadd.f32 %v341_v49, %v337_v60  ;;  %v1323_v49 = vmul.f32 %v1321_v29, %v4138_v52  ;;  %v751_v60 = vmul.f32 %v749_v42, %v4077_v9 }
 0x113   : > { %1530 = vrot.lane.b32.xlu1 %v1525_v2, %s5411_s27  ;;  %350 = vrot.lane.b32.xlu0 %v346_v6, %s5411_s27  ;;  %5432 = vst [vmem:[#allocation12_spill] sm:$0xff] %v4266_v47  ;;  %v388_v2 = vmul.f32 %v387_v1, %v4019_v41  ;;  %v909_v6 = vstv %s3168_s4  ;;  %v924_v41 = vmul.f32 %v923_v11, %v4079_v10  ;;  %s4323_s4 = sld [smem:[#allocation7 + $0x66]] }
 0x114   : > { %v910_v8 = vmul.f32 %v909_v6, %v4063_v0  ;;  %v911_v13 = vmul.f32 %v909_v6, %v4077_v9 }
 0x117   : > { %352 = vrot.lane.b32.xlu1 %v347_v14, %s5411_s27  ;;  %364 = vrot.lane.b32.xlu0 %v360_v15, %s5411_s27  ;;  %v721_v14 = vstv %s3150_s8  ;;  %v925_v15 = vmul.f32 %v923_v11, %v4095_v24  ;;  %s4334_s8 = sld [smem:[#allocation7 + $0x32]] }
 0x118   : > { %v722_v17 = vmul.f32 %v721_v14, %v4001_v30 }
 0x11b   : > { %366 = vrot.lane.b32.xlu1 %v361_v21, %s5411_s27  ;;  %886 = vrot.lane.b32.xlu0 %v882_v20, %s5411_s27  ;;  %v735_v20 = vstv %s3151_s23  ;;  %v723_v21 = vmul.f32 %v721_v14, %v4017_v40  ;;  %s4341_s23 = sld [smem:[#allocation7 + $0x34]] }
 0x11c   : > { %v736_v28 = vmul.f32 %v735_v20, %v4048_v56  ;;  %v737_v35 = vmul.f32 %v735_v20, %v4061_v63 }
 0x11f   : > { %888 = vrot.lane.b32.xlu1 %v883_v50, %s5411_s27  ;;  %378 = vrot.lane.b32.xlu0 %v374_v55, %s5411_s27  ;;  %v750_v50 = vmul.f32 %v749_v42, %v4063_v0  ;;  %v1335_v55 = vstv %s3207_s7  ;;  %v999_v42 = vstv %s4316_s28  ;;  %s4355_s7 = sld [smem:[#allocation7 + $0x72]]  ;;  %s3132_s28 = sld [smem:[#allocation7 + $0x2d]] }
 0x120   : > { %v1336_v62 = vmul.f32 %v1335_v55, %v4154_v5  ;;  %v1337_v1 = vmul.f32 %v1335_v55, %v4179_v22  ;;  %v1000_v55 = vmul.f32 %v999_v42, %v4048_v56 }
 0x123   : > { %380 = vrot.lane.b32.xlu1 %v375_v51, %s5411_s27  ;;  %900 = vrot.lane.b32.xlu0 %v896_v53, %s5411_s27  ;;  %v763_v51 = vstv %s3153_s16  ;;  %s4362_s16 = sld [smem:[#allocation7 + $0x74]] }
 0x127   : > { %902 = vrot.lane.b32.xlu1 %v897_v61, %s5411_s27  ;;  %392 = vrot.lane.b32.xlu0 %v388_v2, %s5411_s27  ;;  %v764_v61 = vmul.f32 %v763_v51, %v4079_v10  ;;  %v1349_v2 = vstv %s3208_s17  ;;  %s4368_s17 = sld [smem:[#allocation7 + $0x76]] }
 0x128   : > { %v1350_v11 = vmul.f32 %v1349_v2, %v4181_v26 }
 0x12b   : > { %394 = vrot.lane.b32.xlu1 %v389_v7, %s5411_s27  ;;  %914 = vrot.lane.b32.xlu0 %v910_v8, %s5411_s27  ;;  %v765_v8 = vmul.f32 %v763_v51, %v4095_v24 }
 0x12f   : > { %916 = vrot.lane.b32.xlu1 %v911_v13, %s5411_s27  ;;  %928 = vrot.lane.b32.xlu0 %v924_v41, %s5411_s27  ;;  %v1363_v13 = vstv %s3209_s26  ;;  %s3130_s26 = sld [smem:[#allocation7 + $0x29]] }
 0x133   : > { %930 = vrot.lane.b32.xlu1 %v925_v15, %s5411_s27  ;;  %726 = vrot.lane.b32.xlu0 %v722_v17, %s5411_s27  ;;  %v1351_v15 = vmul.f32 %v1349_v2, %v4201_v37  ;;  %v1364_v17 = vmul.f32 %v1363_v13, %v4203_v39 }
 0x137   : > { %728 = vrot.lane.b32.xlu1 %v723_v21, %s5411_s27  ;;  %740 = vrot.lane.b32.xlu0 %v736_v28, %s5411_s27  ;;  %v1365_v28 = vmul.f32 %v1363_v13, %v4219_v54 }
 0x13b   : > { %742 = vrot.lane.b32.xlu1 %v737_v35, %s5411_s27  ;;  %1326 = vrot.lane.b32.xlu0 %v1322_v36, %s5411_s27  ;;  %v993_v36 = vstv %s4314_s30  ;;  %s3131_s30 = sld [smem:[#allocation7 + $0x2b]] }
 0x13c   : > { %v995_v4 = vmul.f32 %v993_v36, %v4017_v40 }
 0x13f   : > { %1328 = vrot.lane.b32.xlu1 %v1323_v49, %s5411_s27  ;;  %754 = vrot.lane.b32.xlu0 %v750_v50, %s5411_s27  ;;  %v994_v50 = vmul.f32 %v993_v36, %v4001_v30 }
 0x141   : > { %v1002_v13 = vadd.f32 %v1000_v55, %v994_v50  ;;  %v839_v55 = vstv %s4334_s8  ;;  %s4443_s8 = sld [smem:[#allocation7 + $0x6f]] }
 0x143   : > { %756 = vrot.lane.b32.xlu1 %v751_v60, %s5411_s27  ;;  %1340 = vrot.lane.b32.xlu0 %v1336_v62, %s5411_s27  ;;  %v1005_v60 = vstv %s4320_s3  ;;  %s3194_s3 = sld [smem:[#allocation7 + $0x69]] }
 0x145   : > { %v511_v53 = vpop.permute.xlu0 %510 }
 0x146   : > { %v516_v49 = vadd.f32 %v511_v53, %v4051_v58  ;;  %v833_v53 = vstv %s4326_s6  ;;  %s3196_s6 = sld [smem:[#allocation7 + $0x6d]] }
 0x147   : > { %1342 = vrot.lane.b32.xlu1 %v1337_v1, %s5411_s27  ;;  %768 = vrot.lane.b32.xlu0 %v764_v61, %s5411_s27  ;;  %v1011_v61 = vstv %s4323_s4  ;;  %s3195_s4 = sld [smem:[#allocation7 + $0x6b]] }
 0x148   : > { %v1012_v58 = vmul.f32 %v1011_v61, %v4079_v10  ;;  %v1013_v50 = vmul.f32 %v1011_v61, %v4095_v24  ;;  %v835_v61 = vmul.f32 %v833_v53, %v4017_v40 }
 0x149   : > { %v513_v6 = vpop.permute.xlu1 %512  ;;  %v525_v7 = vpop.permute.xlu0 %524 }
 0x14a   : > { %v530_v1 = vadd.f32 %v525_v7, %v516_v49  ;;  %v517_v2 = vadd.f32 %v513_v6, %v4067_v3  ;;  %v1001_v7 = vmul.f32 %v999_v42, %v4061_v63  ;;  %v1007_v6 = vmul.f32 %v1005_v60, %v4077_v9 }
 0x14b   : > { %770 = vrot.lane.b32.xlu1 %v765_v8, %s5411_s27  ;;  %1354 = vrot.lane.b32.xlu0 %v1350_v11, %s5411_s27  ;;  %v1006_v11 = vmul.f32 %v1005_v60, %v4063_v0  ;;  %v840_v60 = vmul.f32 %v839_v55, %v4048_v56 }
 0x14c   : > { %v1003_v36 = vadd.f32 %v1001_v7, %v995_v4  ;;  %v1433_v7 = vstv %s4349_s20  ;;  %s4467_s20 = sld [smem:[#allocation7 + $0x3d]] }
 0x14d   : > { %v527_v41 = vpop.permute.xlu1 %526  ;;  %v539_v14 = vpop.permute.xlu0 %538  ;;  %v1008_v3 = vadd.f32 %v1006_v11, %v1002_v13  ;;  %v845_v11 = vstv %s4341_s23  ;;  %s4456_s23 = sld [smem:[#allocation7 + $0x3b]] }
 0x14e   : > { %v544_v8 = vadd.f32 %v539_v14, %v530_v1  ;;  %v834_v14 = vmul.f32 %v833_v53, %v4001_v30 }
 0x14f   : > { %1356 = vrot.lane.b32.xlu1 %v1351_v15, %s5411_s27  ;;  %1368 = vrot.lane.b32.xlu0 %v1364_v17, %s5411_s27 }
 0x151   : > { %v541_v20 = vpop.permute.xlu1 %540  ;;  %v1159_v21 = vpop.permute.xlu0 %1158 }
 0x153   : > { %1370 = vrot.lane.b32.xlu1 %v1365_v28, %s5411_s27  ;;  %v531_v28 = vadd.f32 %v527_v41, %v517_v2  ;;  %v1014_v41 = vadd.f32 %v1012_v58, %v1008_v3  ;;  %v1009_v2 = vadd.f32 %v1007_v6, %v1003_v36 }
 0x155   : > { %v1161_v29 = vpop.permute.xlu1 %1160  ;;  %v553_v35 = vpop.permute.xlu0 %552  ;;  %v545_v45 = vadd.f32 %v541_v20, %v531_v28  ;;  %v1164_v20 = vadd.f32 %v1159_v21, %v1014_v41  ;;  %v1015_v28 = vadd.f32 %v1013_v50, %v1009_v2 }
 0x156   : > { %v558_v49 = vadd.f32 %v553_v35, %v544_v8 }
 0x157   : > { %v1165_v4 = vadd.f32 %v1161_v29, %v1015_v28  ;;  %v1445_v28 = vstv %s4362_s16  ;;  %s4476_s16 = sld [smem:[#allocation7 + $0x79]] }
 0x158   : > { %v836_v42 = vadd.f32 %v834_v14, %v558_v49  ;;  %v851_v49 = vstv %s4351_s29  ;;  %s3142_s29 = sld [smem:[#allocation7 + $0x40]] }
 0x159   : > { %v555_v62 = vpop.permute.xlu1 %554  ;;  %v1173_v51 = vpop.permute.xlu0 %1172  ;;  %v852_v29 = vmul.f32 %v851_v49, %v4079_v10 }
 0x15a   : > { %v559_v35 = vadd.f32 %v555_v62, %v545_v45  ;;  %v842_v12 = vadd.f32 %v840_v60, %v836_v42  ;;  %v1178_v58 = vadd.f32 %v1173_v51, %v1164_v20  ;;  %v841_v45 = vmul.f32 %v839_v55, %v4061_v63 }
 0x15b   : > { %v846_v62 = vmul.f32 %v845_v11, %v4063_v0  ;;  %v1434_v51 = vmul.f32 %v1433_v7, %v4127_v48  ;;  %v1439_v55 = vstv %s4355_s7  ;;  %s3143_s7 = sld [smem:[#allocation7 + $0x42]] }
 0x15c   : > { %v837_v47 = vadd.f32 %v835_v61, %v559_v35 }
 0x15d   : > { %v1175_v15 = vpop.permute.xlu1 %1174  ;;  %v1187_v17 = vpop.permute.xlu0 %1186  ;;  %v848_v50 = vadd.f32 %v846_v62, %v842_v12  ;;  %v1440_v12 = vmul.f32 %v1439_v55, %v4154_v5  ;;  %v1441_v62 = vmul.f32 %v1439_v55, %v4179_v22 }
 0x15e   : > { %v1192_v21 = vadd.f32 %v1187_v17, %v1178_v58  ;;  %v843_v6 = vadd.f32 %v841_v45, %v837_v47  ;;  %v1179_v14 = vadd.f32 %v1175_v15, %v1165_v4  ;;  %v847_v17 = vmul.f32 %v845_v11, %v4077_v9 }
 0x15f   : > { %v854_v60 = vadd.f32 %v852_v29, %v848_v50 }
 0x160   : > { %v849_v47 = vadd.f32 %v847_v17, %v843_v6  ;;  %v1446_v6 = vmul.f32 %v1445_v28, %v4181_v26 }
 0x161   : > { %v1189_v1 = vpop.permute.xlu1 %1188  ;;  %v1201_v44 = vpop.permute.xlu0 %1200 }
 0x162   : > { %v1206_v41 = vadd.f32 %v1201_v44, %v1192_v21  ;;  %v1193_v36 = vadd.f32 %v1189_v1, %v1179_v14  ;;  %v1435_v44 = vmul.f32 %v1433_v7, %v4138_v52  ;;  %v853_v1 = vmul.f32 %v851_v49, %v4095_v24 }
 0x164   : > { %v1436_v20 = vadd.f32 %v1434_v51, %v1206_v41  ;;  %v855_v45 = vadd.f32 %v853_v1, %v849_v47  ;;  %v1451_v41 = vstv %s4368_s17  ;;  %s4478_s17 = sld [smem:[#allocation7 + $0x44]] }
 0x165   : > { %v1203_v8 = vpop.permute.xlu1 %1202  ;;  %v1047_v13 = vpop.permute.xlu0 %1046  ;;  %v1452_v17 = vmul.f32 %v1451_v41, %v4203_v39 }
 0x166   : > { %v1207_v2 = vadd.f32 %v1203_v8, %v1193_v36  ;;  %v1052_v15 = vadd.f32 %v1047_v13, %v854_v60  ;;  %v1442_v58 = vadd.f32 %v1440_v12, %v1436_v20  ;;  %v1447_v20 = vmul.f32 %v1445_v28, %v4201_v37 }
 0x168   : > { %v1437_v4 = vadd.f32 %v1435_v44, %v1207_v2  ;;  %v1448_v51 = vadd.f32 %v1446_v6, %v1442_v58 }
 0x169   : > { %v1049_v3 = vpop.permute.xlu1 %1048  ;;  %v1061_v53 = vpop.permute.xlu0 %1060 }
 0x16a   : > { %v1066_v21 = vadd.f32 %v1061_v53, %v1052_v15  ;;  %v1053_v8 = vadd.f32 %v1049_v3, %v855_v45  ;;  %v1443_v7 = vadd.f32 %v1441_v62, %v1437_v4  ;;  %v1454_v55 = vadd.f32 %v1452_v17, %v1448_v51 }
 0x16b   : > { %v589_v51 = vstv %s3132_s28  ;;  %s4499_s28 = sld [smem:[#allocation7 + $0x7b]] }
 0x16c   : > { %v591_v17 = vmul.f32 %v589_v51, %v4003_v31  ;;  %v5433_v31 = vstv %s4134_s5  ;;  %s4449_s5 = sld [smem:[#allocation7 + $0x39]] }
 0x16d   : > { %v1063_v42 = vpop.permute.xlu1 %1062  ;;  %v1075_v35 = vpop.permute.xlu0 %1074 }
 0x16e   : > { %v1080_v14 = vadd.f32 %v1075_v35, %v1066_v21  ;;  %v1067_v13 = vadd.f32 %v1063_v42, %v1053_v8  ;;  %v1449_v35 = vadd.f32 %v1447_v20, %v1443_v7  ;;  %v1453_v42 = vmul.f32 %v1451_v41, %v4219_v54 }
 0x16f   : > { %v561_v8 = vstv %s3130_s26  ;;  %v575_v41 = vstv %s3131_s30  ;;  %v1209_v20 = vstv %s3194_s3  ;;  %s4483_s26 = sld [smem:[#allocation7 + $0x46]]  ;;  %s4489_s30 = sld [smem:[#allocation7 + $0x3f]] }
 0x170   : > { %v1455_v44 = vadd.f32 %v1453_v42, %v1449_v35  ;;  %v563_v6 = vmul.f32 %v561_v8, %v3981_v23  ;;  %v1223_v42 = vstv %s3195_s4  ;;  %s4512_s3 = sld [smem:[#allocation7 + $0x7d]]  ;;  %s4518_s4 = sld [smem:[#allocation7 + $0x10]] }
 0x171   : > { %v1077_v61 = vpop.permute.xlu1 %1076  ;;  %v1487_v11 = vpop.permute.xlu0 %1486 }
 0x172   : > { %v1081_v29 = vadd.f32 %v1077_v61, %v1067_v13  ;;  %v1492_v60 = vadd.f32 %v1487_v11, %v1454_v55  ;;  %v577_v13 = vmul.f32 %v575_v41, %v3988_v25  ;;  %v1210_v25 = vmul.f32 %v1209_v20, %v4001_v30 }
 0x175   : > { %v1489_v50 = vpop.permute.xlu1 %1488  ;;  %v1089_v36 = vpop.permute.xlu0 %1088 }
 0x176   : > { %v4377_v49 = vadd.f32 %v1089_v36, %v1080_v14  ;;  %v1493_v1 = vadd.f32 %v1489_v50, %v1455_v44  ;;  %v562_v14 = vmul.f32 %v561_v8, %v3965_v16  ;;  %v576_v36 = vmul.f32 %v575_v41, %v3973_v19 }
 0x178   : > { %1594 = vrot.lane.b32.xlu0 %v4377_v49, %s5411_s27 }
 0x179   : > { %v1091_v3 = vpop.permute.xlu1 %1090  ;;  %v1501_v53 = vpop.permute.xlu0 %1500 }
 0x17a   : > { %v4383_v2 = vadd.f32 %v1091_v3, %v1081_v29  ;;  %v1506_v15 = vadd.f32 %v1501_v53, %v1492_v60  ;;  %v590_v29 = vmul.f32 %v589_v51, %v3997_v27  ;;  %v1211_v27 = vmul.f32 %v1209_v20, %v4017_v40 }
 0x17b   : > { %v605_v60 = vmul.f32 %v5433_v31, %v4029_v46 }
 0x17c   : > { %1596 = vrot.lane.b32.xlu1 %v4383_v2, %s5411_s27 }
 0x17d   : > { %v1503_v47 = vpop.permute.xlu1 %1502  ;;  %v1515_v12 = vpop.permute.xlu0 %1514 }
 0x17e   : > { %v1520_v61 = vadd.f32 %v1515_v12, %v1506_v15  ;;  %v1507_v4 = vadd.f32 %v1503_v47, %v1493_v1  ;;  %v1224_v12 = vmul.f32 %v1223_v42, %v4048_v56  ;;  %v1225_v1 = vmul.f32 %v1223_v42, %v4061_v63 }
 0x17f   : > { %v5408_v42 = vstv %s4476_s16 }
 0x181   : > { %v1517_v28 = vpop.permute.xlu1 %1516  ;;  %v1529_v58 = vpop.permute.xlu0 %1528 }
 0x182   : > { %v4388_v45 = vadd.f32 %v1529_v58, %v1520_v61  ;;  %v1521_v21 = vadd.f32 %v1517_v28, %v1507_v4  ;;  %v1237_v61 = vstv %s3196_s6  ;;  %s4529_s6 = sld [smem:[#allocation7 + $0x7f]] }
 0x183   : > { %v1238_v28 = vmul.f32 %v1237_v61, %v4063_v0  ;;  %v1239_v4 = vmul.f32 %v1237_v61, %v4077_v9 }
 0x184   : > { %1606 = vrot.lane.b32.xlu0 %v4388_v45, %s5411_s27 }
 0x185   : > { %v1531_v11 = vpop.permute.xlu1 %1530  ;;  %v4400_v50 = vpop.permute.xlu0 %350 }
 0x186   : > { %v4392_v62 = vadd.f32 %v1531_v11, %v1521_v21  ;;  %v1251_v21 = vstv %s4443_s8  ;;  %s3178_s8 = sld [smem:[#allocation7 + $0x61]] }
 0x188   : > { %1608 = vrot.lane.b32.xlu1 %v4392_v62, %s5411_s27 }
 0x189   : > { %v4403_v7 = vpop.permute.xlu1 %352  ;;  %v4407_v16 = vpop.permute.xlu0 %364 }
 0x18c   : > { %566 = vrot.lane.b32.xlu1 %v562_v14, %s5411_s27  ;;  %v1252_v14 = vmul.f32 %v1251_v21, %v4079_v10 }
 0x18d   : > { %v4410_v23 = vpop.permute.xlu1 %366  ;;  %v4414_v19 = vpop.permute.xlu0 %886 }
 0x190   : > { %568 = vrot.lane.b32.xlu1 %v563_v6, %s5411_s27  ;;  %v5409_v6 = vstv %s4449_s5 }
 0x191   : > { %v4417_v3 = vpop.permute.xlu1 %888  ;;  %v4421_v53 = vpop.permute.xlu0 %378 }
 0x194   : > { %580 = vrot.lane.b32.xlu1 %v576_v36, %s5411_s27  ;;  %v1098_v36 = vmul.f32 %v5409_v6, %v4001_v30 }
 0x195   : > { %v4424_v55 = vpop.permute.xlu1 %380  ;;  %v4428_v35 = vpop.permute.xlu0 %900 }
 0x198   : > { %582 = vrot.lane.b32.xlu1 %v577_v13, %s5411_s27  ;;  %v5407_v13 = vstv %s4456_s23 }
 0x199   : > { %v4433_v47 = vpop.permute.xlu1 %902  ;;  %v4437_v44 = vpop.permute.xlu0 %392 }
 0x19c   : > { %594 = vrot.lane.b32.xlu1 %v590_v29, %s5411_s27  ;;  %v1112_v29 = vmul.f32 %v5407_v13, %v4048_v56 }
 0x19d   : > { %v4440_v15 = vpop.permute.xlu1 %394  ;;  %v4446_v46 = vpop.permute.xlu0 %914 }
 0x1a0   : > { %596 = vrot.lane.b32.xlu1 %v591_v17, %s5411_s27  ;;  %v5406_v17 = vstv %s4467_s20 }
 0x1a1   : > { %v4451_v58 = vpop.permute.xlu1 %916  ;;  %v4458_v11 = vpop.permute.xlu0 %928 }
 0x1a4   : > { %1214 = vrot.lane.b32.xlu1 %v1210_v25, %s5411_s27  ;;  %v673_v25 = vstv %s3142_s29  ;;  %s4534_s29 = sld [smem:[#allocation7 + $0x12]] }
 0x1a5   : > { %v4461_v8 = vpop.permute.xlu1 %930  ;;  %v4470_v41 = vpop.permute.xlu0 %726 }
 0x1a8   : > { %1216 = vrot.lane.b32.xlu1 %v1211_v27, %s5411_s27  ;;  %v679_v27 = vstv %s3143_s7  ;;  %s4536_s7 = sld [smem:[#allocation7 + $0x50]] }
 0x1a9   : > { %v4480_v51 = vpop.permute.xlu1 %728  ;;  %v4491_v20 = vpop.permute.xlu0 %740  ;;  %v680_v61 = vmul.f32 %v679_v27, %v4048_v56 }
 0x1ac   : > { %610 = vrot.lane.b32.xlu1 %v605_v60, %s5411_s27  ;;  %v1126_v60 = vmul.f32 %v5406_v17, %v4063_v0  ;;  %v1139_v17 = vstv %s4489_s30  ;;  %s4825_s30 = sld [smem:[#allocation7 + $0x33]] }
 0x1ad   : > { %v4494_v31 = vpop.permute.xlu1 %742  ;;  %v1140_v6 = vmul.f32 %v1139_v17, %v4079_v10 }
 0x1b0   : > { %1228 = vrot.lane.b32.xlu1 %v1224_v12, %s5411_s27  ;;  %v685_v12 = vstv %s4478_s17  ;;  %s4550_s17 = sld [smem:[#allocation7 + $0x9]] }
 0x1b4   : > { %1230 = vrot.lane.b32.xlu1 %v1225_v1, %s5411_s27  ;;  %v674_v1 = vmul.f32 %v673_v25, %v4001_v30  ;;  %v4520_v30 = vpop.permute.xlu1 %1328 }
 0x1b6   : > { %v682_v56 = vadd.f32 %v680_v61, %v674_v1  ;;  %v1565_v61 = vstv %s4512_s3  ;;  %s4838_s3 = sld [smem:[#allocation7 + $0x35]] }
 0x1b8   : > { %1242 = vrot.lane.b32.xlu1 %v1238_v28, %s5411_s27  ;;  %v691_v28 = vstv %s4483_s26  ;;  %s4556_s26 = sld [smem:[#allocation7 + $0x52]] }
 0x1b9   : > { %v692_v13 = vmul.f32 %v691_v28, %v4079_v10  ;;  %v357_v10 = vadd.f32 %v4403_v7, %v4112_v43  ;;  %v625_v7 = vstv %s4518_s4  ;;  %s4571_s4 = sld [smem:[#allocation7 + $0xb]] }
 0x1bc   : > { %1244 = vrot.lane.b32.xlu1 %v1239_v4, %s5411_s27  ;;  %v4507_v4 = vpop.permute.xlu0 %1326 }
 0x1c0   : > { %1256 = vrot.lane.b32.xlu1 %v1252_v14, %s5411_s27  ;;  %v1538_v14 = vmul.f32 %v5408_v42, %v4127_v48  ;;  %v687_v42 = vmul.f32 %v685_v12, %v4077_v9  ;;  %v4538_v9 = vpop.permute.xlu0 %754 }
 0x1c4   : > { %1102 = vrot.lane.b32.xlu1 %v1098_v36, %s5411_s27  ;;  %v686_v36 = vmul.f32 %v685_v12, %v4063_v0  ;;  %v1551_v0 = vstv %s4499_s28 }
 0x1c8   : > { %1116 = vrot.lane.b32.xlu1 %v1112_v29, %s5411_s27  ;;  %v675_v29 = vmul.f32 %v673_v25, %v4017_v40  ;;  %v356_v40 = vadd.f32 %v4400_v50, %v4106_v38  ;;  %v4544_v50 = vpop.permute.xlu1 %756 }
 0x1ca   : > { %v370_v12 = vadd.f32 %v4407_v16, %v356_v40 }
 0x1cc   : > { %1130 = vrot.lane.b32.xlu1 %v1126_v60, %s5411_s27  ;;  %v681_v60 = vmul.f32 %v679_v27, %v4061_v63  ;;  %v688_v63 = vadd.f32 %v686_v36, %v682_v56  ;;  %v693_v27 = vmul.f32 %v691_v28, %v4095_v24  ;;  %v1552_v24 = vmul.f32 %v1551_v0, %v4154_v5  ;;  %v4585_v40 = vpop.permute.xlu1 %1342 }
 0x1cd   : > { %v371_v28 = vadd.f32 %v4410_v23, %v357_v10  ;;  %v384_v43 = vadd.f32 %v4421_v53, %v370_v12  ;;  %v1566_v53 = vmul.f32 %v1565_v61, %v4181_v26  ;;  %v1579_v36 = vstv %s4529_s6  ;;  %v4599_v12 = vld [vmem:[#allocation2 + $0x19] sm:$0xff]  ;;  %s4840_s6 = sld [smem:[#allocation7 + $0x1d]] }
 0x1ce   : > { %v683_v25 = vadd.f32 %v681_v60, %v675_v29  ;;  %v694_v1 = vadd.f32 %v692_v13, %v688_v63  ;;  %v4574_v60 = vld [vmem:[#allocation2 + $0x1] sm:$0xff]  ;;  %v1273_v56 = vstv %s4536_s7  ;;  %v4588_v63 = vld [vmem:[#allocation2 + $0x9] sm:$0xff]  ;;  %v401_v10 = vstv %s4550_s17  ;;  %s4606_s7 = sld [smem:[#allocation7 + $0x56]]  ;;  %s4847_s17 = sld [smem:[#allocation7 + $0x71]] }
 0x1cf   : > { %v385_v13 = vadd.f32 %v4424_v55, %v371_v28 }
 0x1d0   : > { %1542 = vrot.lane.b32.xlu1 %v1538_v14, %s5411_s27  ;;  %v689_v38 = vadd.f32 %v687_v42, %v683_v25  ;;  %v4565_v42 = vpop.permute.xlu0 %1340  ;;  %v627_v25 = vmul.f32 %v4588_v63, %v625_v7 }
 0x1d1   : > { %v399_v55 = vadd.f32 %v4440_v15, %v385_v13  ;;  %v4615_v13 = vpop.permute.xlu1 %770 }
 0x1d2   : > { %v695_v14 = vadd.f32 %v693_v27, %v689_v38  ;;  %v1580_v27 = vmul.f32 %v1579_v36, %v4203_v39 }
 0x1d3   : > { %v629_v38 = vadd.f32 %v627_v25, %v399_v55  ;;  %v4621_v55 = vld [vmem:[#allocation2 + $0x31] sm:$0xff] }
 0x1d4   : > { %1144 = vrot.lane.b32.xlu1 %v1140_v6, %s5411_s27  ;;  %v892_v6 = vadd.f32 %v4414_v19, %v694_v1  ;;  %v893_v16 = vadd.f32 %v4417_v3, %v695_v14  ;;  %v398_v19 = vadd.f32 %v4437_v44, %v384_v43  ;;  %v626_v3 = vmul.f32 %v4574_v60, %v625_v7  ;;  %v4611_v43 = vld [vmem:[#allocation2 + $0x21] sm:$0xff] }
 0x1d5   : > { %v631_v44 = vstv %s4534_s29  ;;  %s4597_s29 = sld [smem:[#allocation7 + $0x49]] }
 0x1d6   : > { %v906_v23 = vadd.f32 %v4428_v35, %v892_v6  ;;  %v907_v29 = vadd.f32 %v4433_v47, %v893_v16  ;;  %v628_v47 = vadd.f32 %v626_v3, %v398_v19  ;;  %v632_v1 = vmul.f32 %v4599_v12, %v631_v44 }
 0x1d7   : > { %v637_v6 = vstv %s4558_s19  ;;  %v633_v7 = vmul.f32 %v4611_v43, %v631_v44  ;;  %v415_v19 = vstv %s4571_s4  ;;  %s4634_s19 = sld [smem:[#allocation7 + $0x4b]]  ;;  %s4860_s4 = sld [smem:[#allocation7 + $0x37]] }
 0x1d8   : > { %1556 = vrot.lane.b32.xlu1 %v1552_v24, %s5411_s27  ;;  %v920_v35 = vadd.f32 %v4446_v46, %v906_v23  ;;  %s4581_s27 = sld [smem:[#allocation7 + $0x16]]  ;;  %v921_v15 = vadd.f32 %v4451_v58, %v907_v29  ;;  %v1274_v24 = vmul.f32 %v1273_v56, %v4127_v48  ;;  %v1279_v58 = vstv %s4556_s26  ;;  %s4705_s26 = sld [smem:[#allocation7 + $0x59]] }
 0x1d9   : > { %v634_v14 = vadd.f32 %v632_v1, %v628_v47  ;;  %v1275_v48 = vmul.f32 %v1273_v56, %v4138_v52  ;;  %v1280_v29 = vmul.f32 %v1279_v58, %v4154_v5  ;;  %v1285_v47 = vstv %s4583_s0  ;;  %v3633_v5 = vld [vmem:[#allocation2 + $0x18] sm:$0xff]  ;;  %s4661_s0 = sld [smem:[#allocation7 + $0x4d]] }
 0x1da   : > { %v934_v46 = vadd.f32 %v4458_v11, %v920_v35  ;;  %v935_v28 = vadd.f32 %v4461_v8, %v921_v15  ;;  %v4608_v11 = vpop.permute.xlu0 %768  ;;  %v3630_v8 = vld [vmem:[#allocation2] sm:$0xff]  ;;  %v638_v35 = vmul.f32 %v4621_v55, %v637_v6  ;;  %v1281_v56 = vmul.f32 %v1279_v58, %v4179_v22 }
 0x1db   : > { %v402_v23 = vmul.f32 %v3630_v8, %v401_v10  ;;  %v4628_v15 = vld [vmem:[#allocation2 + $0x39] sm:$0xff]  ;;  %v416_v1 = vmul.f32 %v3633_v5, %v415_v19  ;;  %v1286_v22 = vmul.f32 %v1285_v47, %v4181_v26  ;;  %v1291_v58 = vstv %s4606_s7  ;;  %s4886_s7 = sld [smem:[#allocation7 + $0x73]] }
 0x1dc   : > { %1570 = vrot.lane.b32.xlu1 %v1566_v53, %s5434_s1  ;;  %v1276_v16 = vadd.f32 %v1274_v24, %v934_v46  ;;  %v635_v53 = vadd.f32 %v633_v7, %v629_v38  ;;  %v1277_v3 = vadd.f32 %v1275_v48, %v935_v28  ;;  %v640_v25 = vadd.f32 %v638_v35, %v634_v14  ;;  %v4636_v28 = vld [vmem:[#allocation2 + $0x49] sm:$0xff]  ;;  %v1357_v14 = vpop.permute.xlu1 %1356  ;;  %v4642_v48 = vld [vmem:[#allocation2 + $0x51] sm:$0xff] }
 0x1dd   : > { %v639_v46 = vmul.f32 %v4628_v15, %v637_v6  ;;  %v937_v38 = vstv %s4597_s29  ;;  %v1292_v35 = vmul.f32 %v1291_v58, %v4203_v39  ;;  %v1293_v5 = vmul.f32 %v1291_v58, %v4219_v54  ;;  %s4864_s29 = sld [smem:[#allocation7 + $0x5b]] }
 0x1de   : > { %v643_v44 = vstv %s4581_s27  ;;  %v1282_v52 = vadd.f32 %v1280_v29, %v1276_v16  ;;  %v1283_v24 = vadd.f32 %v1281_v56, %v1277_v3  ;;  %v1287_v29 = vmul.f32 %v1285_v47, %v4201_v37  ;;  %v3636_v47 = vld [vmem:[#allocation2 + $0x30] sm:$0xff]  ;;  %s4678_s27 = sld [smem:[#allocation7 + $0x4f]] }
 0x1df   : > { %v644_v7 = vmul.f32 %v4636_v28, %v643_v44  ;;  %v641_v16 = vadd.f32 %v639_v46, %v635_v53  ;;  %v645_v8 = vmul.f32 %v4642_v48, %v643_v44  ;;  %v938_v3 = vmul.f32 %v4574_v60, %v937_v38 }
 0x1e0   : > { %1584 = vrot.lane.b32.xlu1 %v1580_v27, %s5434_s1  ;;  %v1355_v27 = vpop.permute.xlu0 %1354  ;;  %v1289_v56 = vadd.f32 %v1287_v29, %v1283_v24  ;;  %v1371_v37 = vpop.permute.xlu1 %1370 }
 0x1e1   : > { %v646_v6 = vadd.f32 %v644_v7, %v640_v25  ;;  %v647_v26 = vadd.f32 %v645_v8, %v641_v16 }
 0x1e2   : > { %v1295_v24 = vadd.f32 %v1293_v5, %v1289_v56 }
 0x1e3   : > { %v732_v53 = vadd.f32 %v4470_v41, %v646_v6  ;;  %v733_v25 = vadd.f32 %v4480_v51, %v647_v26  ;;  %v951_v41 = vstv %s4634_s19  ;;  %v965_v26 = vstv %s4661_s0  ;;  %s4890_s19 = sld [smem:[#allocation7 + $0x1f]]  ;;  %s4908_s0 = sld [smem:[#allocation7 + $0x75]] }
 0x1e4   : > { %406 = vrot.lane.b32.xlu1 %v402_v23, %s5434_s1  ;;  %v1288_v23 = vadd.f32 %v1286_v22, %v1282_v52  ;;  %v1369_v46 = vpop.permute.xlu0 %1368  ;;  %v1333_v54 = vadd.f32 %v4520_v30, %v1295_v24  ;;  %v1377_v24 = vstv %s4705_s26  ;;  %s3146_s26 = sld [smem:[#allocation7 + $0x41]] }
 0x1e5   : > { %v746_v44 = vadd.f32 %v4491_v20, %v732_v53  ;;  %v747_v16 = vadd.f32 %v4494_v31, %v733_v25 }
 0x1e6   : > { %v1294_v52 = vadd.f32 %v1292_v35, %v1288_v23 }
 0x1e7   : > { %v760_v22 = vadd.f32 %v4538_v9, %v746_v44  ;;  %v761_v20 = vadd.f32 %v4544_v50, %v747_v16  ;;  %v1347_v9 = vadd.f32 %v4585_v40, %v1333_v54  ;;  %v5436_v40 = vstv %s4168_s25  ;;  %s4698_s25 = sld [smem:[#allocation7 + $0x1b]] }
 0x1e8   : > { %420 = vrot.lane.b32.xlu1 %v416_v1, %s5434_s1  ;;  %v5435_v1 = vstv %s4165_s24  ;;  %v1332_v39 = vadd.f32 %v4507_v4, %v1294_v52  ;;  %v952_v4 = vmul.f32 %v4599_v12, %v951_v41  ;;  %s4690_s24 = sld [smem:[#allocation7 + $0x19]]  ;;  %v979_v44 = vstv %s4678_s27  ;;  %s4914_s27 = sld [smem:[#allocation7 + $0x5d]] }
 0x1e9   : > { %v430_v7 = vmul.f32 %v3636_v47, %v5435_v1  ;;  %v4668_v6 = vadd.f32 %v4608_v11, %v760_v22  ;;  %v4675_v8 = vadd.f32 %v4615_v13, %v761_v20  ;;  %v1361_v50 = vadd.f32 %v1357_v14, %v1347_v9  ;;  %v4714_v22 = vld [vmem:[#allocation2 + $0x2] sm:$0xff] }
 0x1ea   : > { %v1595_v51 = vpop.permute.xlu0 %1594  ;;  %v1346_v58 = vadd.f32 %v4565_v42, %v1332_v39  ;;  %v1253_v54 = vmul.f32 %v4642_v48, %v1251_v21  ;;  %v5437_v20 = vstv %s4449_s5  ;;  %v5439_v9 = vstv %s4467_s20  ;;  %v4736_v21 = vld [vmem:[#allocation2 + $0xa] sm:$0xff]  ;;  %s3179_s5 = sld [smem:[#allocation7 + $0x63]]  ;;  %s3181_s20 = sld [smem:[#allocation7 + $0x67]] }
 0x1eb   : > { %v1600_v30 = vadd.f32 %v1595_v51, %v4668_v6  ;;  %v4686_v13 = vadd.f32 %v1371_v37, %v1361_v50  ;;  %v980_v37 = vmul.f32 %v4636_v28, %v979_v44  ;;  %v1378_v51 = vmul.f32 %v4714_v22, %v1377_v24 }
 0x1ec   : > { %942 = vrot.lane.b32.xlu1 %v938_v3, %s5434_s1  ;;  %v1360_v23 = vadd.f32 %v1355_v27, %v1346_v58  ;;  %v3637_v3 = vld [vmem:[#allocation2 + $0x48] sm:$0xff]  ;;  %v1099_v58 = vmul.f32 %v4588_v63, %v5437_v20  ;;  %v1141_v50 = vmul.f32 %v4642_v48, %v1139_v17  ;;  %v4758_v17 = vld [vmem:[#allocation2 + $0x52] sm:$0xff] }
 0x1ed   : > { %v444_v53 = vmul.f32 %v3637_v3, %v5436_v40  ;;  %v791_v16 = vstv %s4698_s25  ;;  %v4752_v3 = vld [vmem:[#allocation2 + $0x3a] sm:$0xff]  ;;  %s4932_s25 = sld [smem:[#allocation7 + $0x5f]] }
 0x1ee   : > { %v1597_v31 = vpop.permute.xlu1 %1596  ;;  %v4681_v42 = vadd.f32 %v1369_v46, %v1360_v23  ;;  %v966_v46 = vmul.f32 %v4621_v55, %v965_v26  ;;  %v777_v1 = vstv %s4690_s24  ;;  %v792_v39 = vmul.f32 %v4599_v12, %v791_v16  ;;  %s4925_s24 = sld [smem:[#allocation7 + $0x77]] }
 0x1ef   : > { %v1601_v11 = vadd.f32 %v1597_v31, %v4675_v8  ;;  %v5438_v31 = vstv %s4456_s23  ;;  %v5440_v23 = vstv %s4476_s16  ;;  %v1567_v40 = vmul.f32 %v4752_v3, %v1565_v61  ;;  %s3180_s23 = sld [smem:[#allocation7 + $0x65]]  ;;  %s4816_s16 = sld [smem:[#allocation7 + $0x31]] }
 0x1f0   : > { %434 = vrot.lane.b32.xlu1 %v430_v7, %s5434_s1  ;;  %v1602_v27 = vadd.f32 %v1600_v30, %v4681_v42  ;;  %v778_v7 = vmul.f32 %v4574_v60, %v777_v1  ;;  %v1539_v30 = vmul.f32 %v4736_v21, %v5440_v23  ;;  %v939_v61 = vmul.f32 %v4588_v63, %v937_v38 }
 0x1f1   : > { %v1603_v35 = vadd.f32 %v1601_v11, %v4686_v13  ;;  %v4746_v11 = vld [vmem:[#allocation2 + $0x22] sm:$0xff]  ;;  %v779_v38 = vmul.f32 %v4588_v63, %v777_v1  ;;  %v1017_v23 = vstv %s3178_s8  ;;  %s3147_s8 = sld [smem:[#allocation7 + $0x43]] }
 0x1f4   : > { %956 = vrot.lane.b32.xlu1 %v952_v4, %s5434_s1  ;;  %v1113_v4 = vmul.f32 %v4611_v43, %v5438_v31 }
 0x1f6   : > { %v1607_v29 = vpop.permute.xlu0 %1606 }
 0x1f7   : > { %v1612_v14 = vadd.f32 %v1607_v29, %v1602_v27  ;;  %v1553_v29 = vmul.f32 %v4746_v11, %v1551_v0  ;;  %v3643_v27 = vld [vmem:[#allocation2 + $0x8] sm:$0xff] }
 0x1f8   : > { %448 = vrot.lane.b32.xlu1 %v444_v53, %s5434_s1  ;;  %v1581_v53 = vmul.f32 %v4758_v17, %v1579_v36  ;;  %v403_v0 = vmul.f32 %v3643_v27, %v401_v10  ;;  %v953_v36 = vmul.f32 %v4611_v43, %v951_v41  ;;  %v967_v10 = vmul.f32 %v4628_v15, %v965_v26 }
 0x1f9   : > { %v1615_v52 = vsel %vm1614_vm3, %v1612_v14, 0.0  ;;  %v3644_v14 = vld [vmem:[#allocation2 + $0x20] sm:$0xff]  ;;  %v1379_v41 = vmul.f32 %v4736_v21, %v1377_v24 }
 0x1fa   : > { %v1609_v56 = vpop.permute.xlu1 %1608 }
 0x1fb   : > { %v1613_v25 = vadd.f32 %v1609_v56, %v1603_v35  ;;  %v417_v35 = vmul.f32 %v3644_v14, %v415_v19  ;;  %v981_v19 = vmul.f32 %v4642_v48, %v979_v44 }
 0x1fc   : > { %970 = vrot.lane.b32.xlu1 %v966_v46, %s5434_s1 }
 0x1fd   : > { %v1616_v5 = vsel %vm1614_vm3, %v1613_v25, 0.0 }
 0x1fe   : > { %v1617_v47 = vadd.f32 %v1616_v5, %v1615_v52 }
 0x200   : > { %984 = vrot.lane.b32.xlu1 %v980_v37, %s5434_s1  ;;  %1618 = vadd.xlane.f32.xlu0 %v1617_v47 }
 0x204   : > { %782 = vrot.lane.b32.xlu1 %v778_v7, %s5434_s1 }
 0x208   : > { %796 = vrot.lane.b32.xlu1 %v792_v39, %s5434_s1 }
 0x20c   : > { %1382 = vrot.lane.b32.xlu1 %v1378_v51, %s5434_s1 }
 0x216   : > { %608 = vrot.lane.b32.xlu0 %v4189_v32, %s5434_s1  ;;  %v1127_v32 = vmul.f32 %v4628_v15, %v5439_v9 }
 0x21a   : > { %1258 = vrot.lane.b32.xlu0 %v1253_v54, %s5434_s1 }
 0x21e   : > { %1104 = vrot.lane.b32.xlu0 %v1099_v58, %s5434_s1 }
 0x222   : > { %1118 = vrot.lane.b32.xlu0 %v1113_v4, %s5434_s1 }
 0x226   : > { %1132 = vrot.lane.b32.xlu0 %v1127_v32, %s5434_s1 }
 0x22a   : > { %1544 = vrot.lane.b32.xlu0 %v1539_v30, %s5434_s1  ;;  %v1023_v30 = vstv %s3179_s5  ;;  %s3148_s5 = sld [smem:[#allocation7 + $0x45]] }
 0x22b   : > { %v1024_v27 = vmul.f32 %v4599_v12, %v1023_v30 }
 0x22e   : > { %1146 = vrot.lane.b32.xlu0 %v1141_v50, %s5434_s1 }
 0x232   : > { %1558 = vrot.lane.b32.xlu0 %v1553_v29, %s5434_s1 }
 0x236   : > { %1572 = vrot.lane.b32.xlu0 %v1567_v40, %s5434_s1 }
 0x23a   : > { %1586 = vrot.lane.b32.xlu0 %v1581_v53, %s5434_s1  ;;  %v1018_v53 = vmul.f32 %v4574_v60, %v1017_v23 }
 0x23e   : > { %408 = vrot.lane.b32.xlu0 %v403_v0, %s5434_s1  ;;  %v1029_v0 = vstv %s3180_s23  ;;  %s3149_s23 = sld [smem:[#allocation7 + $0x47]] }
 0x242   : > { %422 = vrot.lane.b32.xlu0 %v417_v35, %s5434_s1  ;;  %v1035_v35 = vstv %s3181_s20  ;;  %s5031_s20 = sld [smem:[#allocation7 + $0x11]] }
 0x246   : > { %944 = vrot.lane.b32.xlu0 %v939_v61, %s5434_s1  ;;  %v1019_v61 = vmul.f32 %v4588_v63, %v1017_v23 }
 0x24a   : > { %436 = vrot.lane.b32.xlu0 %v4225_v57, %s5434_s1  ;;  %v793_v57 = vmul.f32 %v4611_v43, %v791_v16 }
 0x24e   : > { %958 = vrot.lane.b32.xlu0 %v953_v36, %s5434_s1  ;;  %v1025_v36 = vmul.f32 %v4611_v43, %v1023_v30  ;;  %v863_v30 = vstv %s4825_s30  ;;  %s5042_s30 = sld [smem:[#allocation7 + $0x13]] }
 0x252   : > { %450 = vrot.lane.b32.xlu0 %v4232_v59, %s5434_s1  ;;  %v567_v59 = vpop.permute.xlu1 %566 }
 0x253   : > { %v572_v40 = vadd.f32 %v567_v59, %v4193_v33  ;;  %v1036_v59 = vmul.f32 %v4636_v28, %v1035_v35 }
 0x256   : > { %972 = vrot.lane.b32.xlu0 %v967_v10, %s5434_s1  ;;  %v569_v26 = vpop.permute.xlu1 %568 }
 0x25a   : > { %986 = vrot.lane.b32.xlu0 %v981_v19, %s5434_s1  ;;  %v581_v56 = vpop.permute.xlu1 %580  ;;  %v1030_v19 = vmul.f32 %v4621_v55, %v1029_v0 }
 0x25b   : > { %v586_v14 = vadd.f32 %v581_v56, %v572_v40  ;;  %v1027_v56 = vadd.f32 %v1025_v36, %v1019_v61 }
 0x25e   : > { %784 = vrot.lane.b32.xlu0 %v779_v38, %s5434_s1  ;;  %v4794_v46 = vpop.permute.xlu1 %582  ;;  %v1031_v38 = vmul.f32 %v4628_v15, %v1029_v0 }
 0x262   : > { %798 = vrot.lane.b32.xlu0 %v793_v57, %s5434_s1  ;;  %v595_v25 = vpop.permute.xlu1 %594 }
 0x263   : > { %v600_v10 = vadd.f32 %v595_v25, %v586_v14 }
 0x266   : > { %1384 = vrot.lane.b32.xlu0 %v1379_v41, %s5434_s1  ;;  %v4796_v52 = vpop.permute.xlu1 %596  ;;  %v1026_v41 = vadd.f32 %v1024_v27, %v1018_v53 }
 0x26a   : > { %v4798_v1 = vpop.permute.xlu1 %1214 }
 0x26e   : > { %v4800_v24 = vpop.permute.xlu1 %1216 }
 0x272   : > { %v4802_v51 = vpop.permute.xlu1 %610 }
 0x276   : > { %v4804_v54 = vpop.permute.xlu1 %1228 }
 0x27a   : > { %v4806_v20 = vpop.permute.xlu1 %1230 }
 0x27e   : > { %v4808_v58 = vpop.permute.xlu1 %1242 }
 0x282   : > { %v4810_v31 = vpop.permute.xlu1 %1244 }
 0x286   : > { %v4812_v9 = vpop.permute.xlu1 %1256 }
 0x28a   : > { %v4818_v50 = vpop.permute.xlu1 %1102 }
 0x28d   : > { %v1619_v44 = vpop.xlane.xlu0 %1618 }
 0x28e   : > { %v1620_v5 = vrot.slane %v1619_v44, 4  ;;  %v4831_v33 = vpop.permute.xlu1 %1116 }
 0x290   : > { %v1621_v37 = vadd.f32 %v1620_v5, %v1619_v44  ;;  %v857_v44 = vstv %s4816_s16  ;;  %v1037_v5 = vmul.f32 %v4642_v48, %v1035_v35  ;;  %s5035_s16 = sld [smem:[#allocation7 + $0x51]] }
 0x291   : > { %v609_v4 = vpop.permute.xlu0 %608  ;;  %v858_v23 = vmul.f32 %v4574_v60, %v857_v44 }
 0x292   : > { %v1622_v47 = vrot.slane %v1621_v37, 2  ;;  %v614_v25 = vadd.f32 %v609_v4, %v600_v10 }
 0x294   : > { %v1623_v7 = vadd.f32 %v1622_v47, %v1621_v37 }
 0x295   : > { %v4814_v32 = vpop.permute.xlu0 %1258 }
 0x296   : > { %v1624_v16 = vrot.slane %v1623_v7, 1 }
 0x298   : > { %v1625_v39 = vadd.f32 %v1624_v16, %v1623_v7  ;;  %v573_v7 = vadd.f32 %v569_v26, %v4197_v34  ;;  %v1032_v16 = vadd.f32 %v1030_v19, %v1026_v41  ;;  %v4858_v34 = vpop.permute.xlu1 %1130  ;;  %v860_v26 = vadd.f32 %v858_v23, %v614_v25 }
 0x299   : > { %v4820_v29 = vpop.permute.xlu0 %1104  ;;  %v864_v19 = vmul.f32 %v4599_v12, %v863_v30  ;;  %v805_v41 = vstv %s4840_s6  ;;  %s5053_s6 = sld [smem:[#allocation7 + $0x55]] }
 0x29a   : > { %3505 = vpush %v1625_v39  ;;  %v1033_v39 = vadd.f32 %v1031_v38, %v1027_v56  ;;  %v587_v53 = vadd.f32 %v4794_v46, %v573_v7  ;;  %v1038_v27 = vadd.f32 %v1036_v59, %v1032_v16  ;;  %v875_v7 = vstv %s4860_s4  ;;  %s5064_s4 = sld [smem:[#allocation7 + $0x57]] }
 0x29b   : > { %v806_v16 = vmul.f32 %v4621_v55, %v805_v41 }
 0x29c   : > { %v1039_v0 = vadd.f32 %v1037_v5, %v1033_v39  ;;  %v601_v61 = vadd.f32 %v4796_v52, %v587_v53  ;;  %v1220_v36 = vadd.f32 %v4798_v1, %v1038_v27  ;;  %v866_v1 = vadd.f32 %v864_v19, %v860_v26 }
 0x29d   : > { %v4833_v57 = vpop.permute.xlu0 %1118  ;;  %v1391_v39 = vstv %s4864_s29  ;;  %v865_v27 = vmul.f32 %v4611_v43, %v863_v30 }
 0x29e   : > { %v1221_v10 = vadd.f32 %v4800_v24, %v1039_v0  ;;  %v1234_v38 = vadd.f32 %v4804_v54, %v1220_v36  ;;  %v4898_v54 = vpop.permute.xlu1 %1542  ;;  %v4928_v36 = vld [vmem:[#allocation2 + $0x1a] sm:$0xff] }
 0x29f   : > { %v1392_v30 = vmul.f32 %v4928_v36, %v1391_v39 }
 0x2a0   : > { %v1235_v52 = vadd.f32 %v4806_v20, %v1221_v10  ;;  %v1248_v5 = vadd.f32 %v4808_v58, %v1234_v38  ;;  %v819_v10 = vstv %s4890_s19 }
 0x2a1   : > { %v4862_v14 = vpop.permute.xlu0 %1132 }
 0x2a2   : > { %v1249_v25 = vadd.f32 %v4810_v31, %v1235_v52  ;;  %v1262_v31 = vadd.f32 %v4812_v9, %v1248_v5  ;;  %v1145_v9 = vpop.permute.xlu1 %1144  ;;  %v820_v5 = vmul.f32 %v4636_v28, %v819_v10 }
 0x2a4   : > { %v1263_v53 = vadd.f32 %v4814_v32, %v1249_v25  ;;  %v1393_v32 = vmul.f32 %v4746_v11, %v1391_v39  ;;  %v1405_v25 = vstv %s4914_s27 }
 0x2a5   : > { %v4900_v56 = vpop.permute.xlu0 %1544 }
 0x2a6   : > { %v1557_v39 = vpop.permute.xlu1 %1556 }
 0x2cb   : > { %s3506_s28 = spop %3505 }
 0x2cc   : > { %v1627_v37 = vstv %s3506_s28  ;;  %s5045_s28 = sld [smem:[#allocation7 + $0x53]] }
 0x2cd   : > { %v4842_v47 = vmul.f32 0.0009765625, %v1627_v37  ;;  %v1457_v37 = vstv %s4847_s17  ;;  %s5059_s17 = sld [smem:[#allocation7 + $0x17]] }
 0x2ce   : > { %v1458_v0 = vmul.f32 %v4714_v22, %v1457_v37  ;;  %v1459_v26 = vmul.f32 %v4736_v21, %v1457_v37 }
 0x2cf   : > { %v4851_v40 = vsub.f32 %v4383_v2, %v4842_v47  ;;  %v4855_v4 = vsub.f32 %v4377_v49, %v4842_v47  ;;  %v4872_v46 = vsub.f32 %v4392_v62, %v4842_v47  ;;  %v4876_v35 = vsub.f32 %v4388_v45, %v4842_v47 }
 0x2d0   : > { %v615_v62 = vadd.f32 %v4802_v51, %v601_v61  ;;  %v869_v45 = vstv %s4838_s3  ;;  %v859_v51 = vmul.f32 %v4588_v63, %v857_v44  ;;  %v807_v44 = vmul.f32 %v4628_v15, %v805_v41  ;;  %v1147_v61 = vpop.permute.xlu0 %1146  ;;  %s5049_s3 = sld [smem:[#allocation7 + $0x15]] }
 0x2d1   : > { %5441 = vst [vmem:[#allocation13_spill] sm:$0xff] %v4851_v40  ;;  %5442 = vst [vmem:[#allocation14_spill] sm:$0xff] %v4855_v4  ;;  %v1650_v2 = vmul.f32 %v4851_v40, %v4851_v40  ;;  %v1649_v49 = vmul.f32 %v4855_v4, %v4855_v4  ;;  %v1694_v24 = vmul.f32 %v4872_v46, %v4872_v46 }
 0x2d2   : > { %v1693_v59 = vmul.f32 %v4876_v35, %v4876_v35  ;;  %v870_v20 = vmul.f32 %v4621_v55, %v869_v45  ;;  %v861_v58 = vadd.f32 %v859_v51, %v615_v62  ;;  %v1460_v62 = vadd.f32 %v1458_v0, %v1262_v31 }
 0x2d3   : > { %1655 = vrot.lane.b32.xlu0 %v1650_v2, %s5434_s1  ;;  %1653 = vrot.lane.b32.xlu1 %v1649_v49, %s5434_s1  ;;  %v876_v2 = vmul.f32 %v4636_v28, %v875_v7  ;;  %v1463_v49 = vstv %s4886_s7  ;;  %v1461_v38 = vadd.f32 %v1459_v26, %v1263_v53  ;;  %v821_v51 = vmul.f32 %v4642_v48, %v819_v10  ;;  %v4956_v10 = vld [vmem:[#allocation2 + $0x4a] sm:$0xff] }
 0x2d4   : > { %v872_v23 = vadd.f32 %v870_v20, %v866_v1  ;;  %v867_v19 = vadd.f32 %v865_v27, %v861_v58  ;;  %v1464_v52 = vmul.f32 %v4928_v36, %v1463_v49  ;;  %v1465_v1 = vmul.f32 %v4746_v11, %v1463_v49  ;;  %v1559_v58 = vpop.permute.xlu0 %1558 }
 0x2d5   : > { %v1475_v27 = vstv %s4925_s24  ;;  %v1407_v0 = vmul.f32 %v4752_v3, %v1405_v25 }
 0x2d6   : > { %v878_v41 = vadd.f32 %v876_v2, %v872_v23  ;;  %v1466_v37 = vadd.f32 %v1464_v52, %v1460_v62  ;;  %v1467_v20 = vadd.f32 %v1465_v1, %v1461_v38  ;;  %v877_v23 = vmul.f32 %v4642_v48, %v875_v7  ;;  %v1571_v38 = vpop.permute.xlu1 %1570 }
 0x2d7   : > { %1699 = vrot.lane.b32.xlu0 %v1694_v24, %s5434_s1  ;;  %1697 = vrot.lane.b32.xlu1 %v1693_v59, %s5434_s1  ;;  %v871_v24 = vmul.f32 %v4628_v15, %v869_v45  ;;  %v1469_v59 = vstv %s4908_s0  ;;  %v4944_v45 = vld [vmem:[#allocation2 + $0x32] sm:$0xff]  ;;  %v1476_v7 = vmul.f32 %v4956_v10, %v1475_v27  ;;  %v1477_v62 = vmul.f32 %v4758_v17, %v1475_v27 }
 0x2d8   : > { %v1470_v31 = vmul.f32 %v4944_v45, %v1469_v59  ;;  %v1471_v53 = vmul.f32 %v4752_v3, %v1469_v59  ;;  %v1406_v26 = vmul.f32 %v4944_v45, %v1405_v25  ;;  %v5002_v27 = vsub.f32 %v4668_v6, %v4842_v47 }
 0x2da   : > { %v1472_v2 = vadd.f32 %v1470_v31, %v1466_v37  ;;  %5444 = vst [vmem:[#allocation16_spill] sm:$0xff] %v5002_v27 }
 0x2db   : > { %812 = vrot.lane.b32.xlu0 %v807_v44, %s5434_s1  ;;  %810 = vrot.lane.b32.xlu1 %v806_v16, %s5434_s1  ;;  %v873_v44 = vadd.f32 %v871_v24, %v867_v19  ;;  %v1108_v16 = vadd.f32 %v4818_v50, %v878_v41  ;;  %v1419_v50 = vstv %s4932_s25  ;;  %v1573_v41 = vpop.permute.xlu0 %1572 }
 0x2dc   : > { %v1421_v52 = vmul.f32 %v4758_v17, %v1419_v50  ;;  %v1420_v1 = vmul.f32 %v4956_v10, %v1419_v50  ;;  %v1478_v24 = vadd.f32 %v1476_v7, %v1472_v2  ;;  %v1631_v2 = vmul.f32 %v5002_v27, %v5002_v27 }
 0x2dd   : > { %v879_v49 = vadd.f32 %v877_v23, %v873_v44 }
 0x2de   : > { %v1633_v7 = vsel %vm1614_vm3, %v1631_v2, 0.0 }
 0x2df   : > { %1398 = vrot.lane.b32.xlu0 %v1393_v32, %s5434_s1  ;;  %1396 = vrot.lane.b32.xlu1 %v1392_v30, %s5434_s1  ;;  %v1473_v32 = vadd.f32 %v1471_v53, %v1467_v20  ;;  %v1122_v30 = vadd.f32 %v4831_v33, %v1108_v16  ;;  %v1109_v19 = vadd.f32 %v4820_v29, %v879_v49  ;;  %v1587_v31 = vpop.permute.xlu0 %1586 }
 0x2e0   : > { %v1548_v29 = vadd.f32 %v4898_v54, %v1478_v24 }
 0x2e1   : > { %v1123_v33 = vadd.f32 %v4833_v57, %v1109_v19  ;;  %v1479_v59 = vadd.f32 %v1477_v62, %v1473_v32  ;;  %v1585_v57 = vpop.permute.xlu1 %1584 }
 0x2e2   : > { %v1562_v37 = vadd.f32 %v1557_v39, %v1548_v29  ;;  %v4994_v39 = vsub.f32 %v4686_v13, %v4842_v47 }
 0x2e3   : > { %826 = vrot.lane.b32.xlu0 %v821_v51, %s5434_s1  ;;  %824 = vrot.lane.b32.xlu1 %v820_v5, %s5434_s1  ;;  %v1136_v51 = vadd.f32 %v4858_v34, %v1122_v30  ;;  %v1137_v5 = vadd.f32 %v4862_v14, %v1123_v33  ;;  %v1549_v25 = vadd.f32 %v4900_v56, %v1479_v59 }
 0x2e4   : > { %v1576_v23 = vadd.f32 %v1571_v38, %v1562_v37  ;;  %5443 = vst [vmem:[#allocation15_spill] sm:$0xff] %v4994_v39  ;;  %v1676_v53 = vmul.f32 %v4994_v39, %v4994_v39  ;;  %v703_v37 = vstv %s3147_s8 }
 0x2e5   : > { %v4972_v20 = vadd.f32 %v1147_v61, %v1137_v5  ;;  %v1563_v44 = vadd.f32 %v1559_v58, %v1549_v25  ;;  %v4974_v16 = vadd.f32 %v1145_v9, %v1136_v51  ;;  %v407_v56 = vpop.permute.xlu1 %406  ;;  %v409_v9 = vpop.permute.xlu0 %408  ;;  %v4990_v61 = vsub.f32 %v4681_v42, %v4842_v47 }
 0x2e6   : > { %v4980_v14 = vadd.f32 %v1585_v57, %v1576_v23  ;;  %v1678_v13 = vsel %vm1614_vm3, %v1676_v53, 0.0  ;;  %v697_v25 = vstv %s3146_s26  ;;  %v715_v23 = vstv %s3149_s23  ;;  %s3288_s23 = sshll.u32 %s3812_s13, 10  ;;  %s2982_s13 = scalar_lea.sflag [#allocation5], %s3918_s14 }
 0x2e7   : > { %1412 = vrot.lane.b32.xlu0 %v1407_v0, %s5434_s1  ;;  %1410 = vrot.lane.b32.xlu1 %v1406_v26, %s5434_s1  ;;  %v1577_v34 = vadd.f32 %v1573_v41, %v1563_v44  ;;  %v1675_v58 = vmul.f32 %v4990_v61, %v4990_v61  ;;  %v5006_v0 = vsub.f32 %v4675_v8, %v4842_v47  ;;  %v709_v44 = vstv %s3148_s5 }
 0x2e8   : > { %v698_v57 = vmul.f32 %v4574_v60, %v697_v25  ;;  %v710_v53 = vmul.f32 %v4621_v55, %v709_v44  ;;  %v711_v2 = vmul.f32 %v4628_v15, %v709_v44  ;;  %v5446_v44 = vld [vmem:[#allocation12_spill] sm:$0xff] }
 0x2e9   : > { %v4982_v54 = vadd.f32 %v1587_v31, %v1577_v34  ;;  %5445 = vst [vmem:[#allocation17_spill] sm:$0xff] %v5006_v0  ;;  %v421_v42 = vpop.permute.xlu1 %420  ;;  %v423_v26 = vpop.permute.xlu0 %422  ;;  %v1677_v50 = vsel %vm1614_vm3, %v1675_v58, 0.0  ;;  %v1632_v49 = vmul.f32 %v5006_v0, %v5006_v0  ;;  %v704_v31 = vmul.f32 %v4599_v12, %v703_v37 }
 0x2ea   : > { %v1679_v32 = vadd.f32 %v1678_v13, %v1677_v50  ;;  %v699_v34 = vmul.f32 %v4588_v63, %v697_v25  ;;  %v705_v58 = vmul.f32 %v4611_v43, %v703_v37  ;;  %v412_v37 = vadd.f32 %v407_v56, %v4249_v18 }
 0x2eb   : > { %1426 = vrot.lane.b32.xlu0 %v1421_v52, %s5434_s1  ;;  %1424 = vrot.lane.b32.xlu1 %v1420_v1, %s5434_s1  ;;  %v1634_v8 = vsel %vm1614_vm3, %v1632_v49, 0.0  ;;  %v706_v49 = vadd.f32 %v704_v31, %v698_v57  ;;  %v413_v57 = vadd.f32 %v409_v9, %v5446_v44  ;;  %v649_v18 = vstv %s5031_s20 }
 0x2ec   : > { %v1635_v47 = vadd.f32 %v1634_v8, %v1633_v7  ;;  %v707_v7 = vadd.f32 %v705_v58, %v699_v34  ;;  %v717_v8 = vmul.f32 %v4642_v48, %v715_v23  ;;  %v426_v4 = vadd.f32 %v421_v42, %v412_v37 }
 0x2ed   : > { %v943_v30 = vpop.permute.xlu1 %942  ;;  %v945_v6 = vpop.permute.xlu0 %944  ;;  %v1303_v37 = vstv %s5045_s28  ;;  %s5347_s28 = scalar_lea.hbm %s5397_s2, %s3288_s23 }
 0x2ee   : > { %v713_v25 = vadd.f32 %v711_v2, %v707_v7 }
 0x2ef   : > { %2301 = vrot.lane.b32.xlu1 %v4974_v16, %s5434_s1  ;;  %2303 = vrot.lane.b32.xlu0 %v4972_v20, %s5434_s1 }
 0x2f0   : > { %v719_v31 = vadd.f32 %v717_v8, %v713_v25 }
 0x2f1   : > { %v435_v19 = vpop.permute.xlu1 %434  ;;  %v437_v62 = vpop.permute.xlu0 %436 }
 0x2f2   : > { %v949_v34 = vadd.f32 %v945_v6, %v719_v31  ;;  %v440_v58 = vadd.f32 %v435_v19, %v426_v4  ;;  %v1297_v6 = vstv %s5035_s16  ;;  %v651_v19 = vmul.f32 %v4588_v63, %v649_v18 }
 0x2f3   : > { %2313 = vrot.lane.b32.xlu1 %v4980_v14, %s5434_s1  ;;  %2315 = vrot.lane.b32.xlu0 %v4982_v54, %s5434_s1  ;;  %v1299_v63 = vmul.f32 %v4736_v21, %v1297_v6  ;;  %v1305_v21 = vmul.f32 %v4746_v11, %v1303_v37 }
 0x2f5   : > { %v957_v38 = vpop.permute.xlu1 %956  ;;  %v959_v41 = vpop.permute.xlu0 %958 }
 0x2f9   : > { %v449_v52 = vpop.permute.xlu1 %448  ;;  %v451_v1 = vpop.permute.xlu0 %450 }
 0x2fa   : > { %v454_v42 = vadd.f32 %v449_v52, %v440_v58 }
 0x2fd   : > { %v971_v24 = vpop.permute.xlu1 %970  ;;  %v973_v33 = vpop.permute.xlu0 %972 }
 0x301   : > { %v985_v59 = vpop.permute.xlu1 %984  ;;  %v987_v51 = vpop.permute.xlu0 %986 }
 0x305   : > { %v5016_v29 = vpop.permute.xlu1 %782  ;;  %v5018_v5 = vpop.permute.xlu0 %784 }
 0x309   : > { %v5025_v50 = vpop.permute.xlu1 %796  ;;  %v5027_v13 = vpop.permute.xlu0 %798 }
 0x30d   : > { %v5037_v27 = vpop.permute.xlu1 %1382  ;;  %v5039_v40 = vpop.permute.xlu0 %1384 }
 0x312   : > { %1680 = vadd.xlane.f32.xlu0 %v1679_v32  ;;  %v716_v32 = vmul.f32 %v4636_v28, %v715_v23  ;;  %v427_v23 = vadd.f32 %v423_v26, %v413_v57 }
 0x317   : > { %1636 = vadd.xlane.f32.xlu1 %v1635_v47  ;;  %v712_v47 = vadd.f32 %v710_v53, %v706_v49  ;;  %v441_v49 = vadd.f32 %v437_v62, %v427_v23 }
 0x319   : > { %v718_v0 = vadd.f32 %v716_v32, %v712_v47  ;;  %v963_v32 = vadd.f32 %v959_v41, %v949_v34  ;;  %v455_v4 = vadd.f32 %v451_v1, %v441_v49  ;;  %v661_v34 = vstv %s5049_s3 }
 0x31b   : > { %v948_v39 = vadd.f32 %v943_v30, %v718_v0  ;;  %v650_v30 = vmul.f32 %v4574_v60, %v649_v18  ;;  %v653_v25 = vadd.f32 %v651_v19, %v455_v4  ;;  %v1309_v18 = vstv %s5053_s6  ;;  %s3773_s6 = smov [#allocation8]  }
 0x31d   : > { %v962_v53 = vadd.f32 %v957_v38, %v948_v39  ;;  %v977_v39 = vadd.f32 %v973_v33, %v963_v32  ;;  %v652_v1 = vadd.f32 %v650_v30, %v454_v42  ;;  %v1298_v33 = vmul.f32 %v4714_v22, %v1297_v6 }
 0x31e   : > { %v1304_v22 = vmul.f32 %v4928_v36, %v1303_v37  ;;  %v662_v32 = vmul.f32 %v4621_v55, %v661_v34  ;;  %v1315_v36 = vstv %s5064_s4 }
 0x31f   : > { %v976_v26 = vadd.f32 %v971_v24, %v962_v53  ;;  %v991_v8 = vadd.f32 %v987_v51, %v977_v39  ;;  %v655_v24 = vstv %s5042_s30 }
 0x320   : > { %v656_v44 = vmul.f32 %v4599_v12, %v655_v24  ;;  %v657_v31 = vmul.f32 %v4611_v43, %v655_v24 }
 0x321   : > { %v990_v41 = vadd.f32 %v985_v59, %v976_v26  ;;  %v1301_v23 = vadd.f32 %v1299_v63, %v991_v8  ;;  %v1311_v26 = vmul.f32 %v4752_v3, %v1309_v18 }
 0x322   : > { %v658_v58 = vadd.f32 %v656_v44, %v652_v1  ;;  %v659_v53 = vadd.f32 %v657_v31, %v653_v25 }
 0x323   : > { %v1300_v57 = vadd.f32 %v1298_v33, %v990_v41  ;;  %v1307_v12 = vadd.f32 %v1305_v21, %v1301_v23 }
 0x324   : > { %v664_v43 = vadd.f32 %v662_v32, %v658_v58 }
 0x325   : > { %v1306_v49 = vadd.f32 %v1304_v22, %v1300_v57  ;;  %v1313_v19 = vadd.f32 %v1311_v26, %v1307_v12 }
 0x345   : > { %v1654_v56 = vpop.permute.xlu1 %1653  ;;  %v1656_v2 = vpop.permute.xlu0 %1655 }
 0x346   : > { %v1659_v7 = vsel %vm1614_vm3, %v1654_v56, 0.0  ;;  %v1660_v9 = vsel %vm1614_vm3, %v1656_v2, 0.0 }
 0x347   : > { %v1661_v0 = vadd.f32 %v1660_v9, %v1659_v7  ;;  %v663_v7 = vmul.f32 %v4628_v15, %v661_v34  ;;  %v667_v9 = vstv %s5059_s17  ;;  %s3697_s17 = sshll.u32 %s3773_s6, 4  ;;  %s3698_s17 = int_to_ptr.vmem [resolvable:$false] %s3697_s17 }
 0x348   : > { %v668_v11 = vmul.f32 %v4636_v28, %v667_v9  ;;  %v669_v6 = vmul.f32 %v4642_v48, %v667_v9  ;;  %s3699_s4 = scalar_lea.vmem %s3698_s17, 2048 }
 0x349   : > { %v1698_v62 = vpop.permute.xlu1 %1697  ;;  %1662 = vadd.xlane.f32.xlu0 %v1661_v0  ;;  %v1700_v38 = vpop.permute.xlu0 %1699  ;;  %v1310_v0 = vmul.f32 %v4944_v45, %v1309_v18  ;;  %v665_v42 = vadd.f32 %v663_v7, %v659_v53 }
 0x34a   : > { %v1703_v47 = vsel %vm1614_vm3, %v1698_v62, 0.0  ;;  %v1704_v52 = vsel %vm1614_vm3, %v1700_v38, 0.0  ;;  %v670_v55 = vadd.f32 %v668_v11, %v664_v43  ;;  %v1316_v62 = vmul.f32 %v4956_v10, %v1315_v36 }
 0x34b   : > { %v1705_v60 = vadd.f32 %v1704_v52, %v1703_v47  ;;  %v1312_v30 = vadd.f32 %v1310_v0, %v1306_v49  ;;  %v671_v15 = vadd.f32 %v669_v6, %v665_v42  ;;  %v1317_v38 = vmul.f32 %v4758_v17, %v1315_v36 }
 0x34c   : > { %v788_v8 = vadd.f32 %v5016_v29, %v670_v55 }
 0x34d   : > { %v811_v59 = vpop.permute.xlu1 %810  ;;  %1706 = vadd.xlane.f32.xlu0 %v1705_v60  ;;  %v813_v51 = vpop.permute.xlu0 %812  ;;  %v1318_v3 = vadd.f32 %v1316_v62, %v1312_v30  ;;  %v789_v47 = vadd.f32 %v5018_v5, %v671_v15  ;;  %v1319_v52 = vadd.f32 %v1317_v38, %v1313_v19 }
 0x34e   : > { %v802_v28 = vadd.f32 %v5025_v50, %v788_v8 }
 0x34f   : > { %v1388_v24 = vadd.f32 %v5037_v27, %v1318_v3  ;;  %v803_v48 = vadd.f32 %v5027_v13, %v789_v47  ;;  %v1389_v60 = vadd.f32 %v5039_v40, %v1319_v52 }
 0x350   : > { %v816_v33 = vadd.f32 %v811_v59, %v802_v28 }
 0x351   : > { %v1397_v56 = vpop.permute.xlu1 %1396  ;;  %v1399_v2 = vpop.permute.xlu0 %1398  ;;  %v817_v17 = vadd.f32 %v813_v51, %v803_v48 }
 0x352   : > { %v1402_v25 = vadd.f32 %v1397_v56, %v1388_v24  ;;  %v1403_v63 = vadd.f32 %v1399_v2, %v1389_v60 }
 0x355   : > { %v825_v4 = vpop.permute.xlu1 %824  ;;  %v827_v39 = vpop.permute.xlu0 %826 }
 0x356   : > { %v5088_v37 = vadd.f32 %v825_v4, %v816_v33  ;;  %v5090_v29 = vadd.f32 %v827_v39, %v817_v17 }
 0x359   : > { %v1411_v41 = vpop.permute.xlu1 %1410  ;;  %v1413_v45 = vpop.permute.xlu0 %1412 }
 0x35a   : > { %v1416_v5 = vadd.f32 %v1411_v41, %v1402_v25  ;;  %v1417_v44 = vadd.f32 %v1413_v45, %v1403_v63 }
 0x35d   : > { %v1425_v10 = vpop.permute.xlu1 %1424  ;;  %v1427_v1 = vpop.permute.xlu0 %1426 }
 0x35e   : > { %v5092_v31 = vadd.f32 %v1425_v10, %v1416_v5  ;;  %v5094_v27 = vadd.f32 %v1427_v1, %v1417_v44 }
 0x361   : > { %v2302_v57 = vpop.permute.xlu1 %2301  ;;  %v2304_v50 = vpop.permute.xlu0 %2303 }
 0x362   : > { %v2307_v40 = vadd.f32 %v2302_v57, %v5088_v37  ;;  %v2308_v13 = vadd.f32 %v2304_v50, %v5090_v29 }
 0x364   : > { %v2309_v59 = vadd.f32 %v2307_v40, %v5092_v31  ;;  %v2310_v51 = vadd.f32 %v2308_v13, %v5094_v27 }
 0x365   : > { %v2314_v23 = vpop.permute.xlu1 %2313  ;;  %v2316_v34 = vpop.permute.xlu0 %2315 }
 0x366   : > { %v2319_v58 = vadd.f32 %v2314_v23, %v2309_v59  ;;  %v2320_v22 = vadd.f32 %v2316_v34, %v2310_v51 }
 0x368   : > { %v2321_v53 = vsel %vm1614_vm3, %v2319_v58, 0.0  ;;  %v2322_v21 = vsel %vm1614_vm3, %v2320_v22, 0.0  ;;  %v190_v22 = vlaneseq }
 0x369   : > { %v2323_v18 = vadd.f32 %v2322_v21, %v2321_v53 }
 0x36a   : > { %v5108_v21 = vshrl.u32 %v190_v22, 7 }
 0x36b   : > { %2324 = vadd.xlane.f32.xlu1 %v2323_v18 }
 0x39f   : > { %v1681_v43 = vpop.xlane.xlu0 %1680 }
 0x3a0   : > { %v1682_v0 = vrot.slane %v1681_v43, 4 }
 0x3a2   : > { %v1683_v42 = vadd.f32 %v1682_v0, %v1681_v43  ;;  %v5127_v43 = vand.u32 127, %v190_v22 }
 0x3a4   : > { %v1637_v56 = vpop.xlane.xlu1 %1636  ;;  %v1684_v26 = vrot.slane %v1683_v42, 2 }
 0x3a5   : > { %v1638_v2 = vrot.slane %v1637_v56, 4 }
 0x3a6   : > { %v1685_v30 = vadd.f32 %v1684_v26, %v1683_v42 }
 0x3a7   : > { %v1639_v49 = vadd.f32 %v1638_v2, %v1637_v56 }
 0x3a8   : > { %v1686_v15 = vrot.slane %v1685_v30, 1 }
 0x3a9   : > { %v1640_v32 = vrot.slane %v1639_v49, 2 }
 0x3aa   : > { %v1687_v3 = vadd.f32 %v1686_v15, %v1685_v30 }
 0x3ab   : > { %v1641_v12 = vadd.f32 %v1640_v32, %v1639_v49 }
 0x3ad   : > { %v1642_v7 = vrot.slane %v1641_v12, 1 }
 0x3af   : > { %v1643_v9 = vadd.f32 %v1642_v7, %v1641_v12 }
 0x3b1   : > { %3507 = vpush %v1643_v9 }
 0x3d6   : > { %v1663_v36 = vpop.xlane.xlu0 %1662 }
 0x3d7   : > { %v1664_v4 = vrot.slane %v1663_v36, 4 }
 0x3d9   : > { %v1665_v39 = vadd.f32 %v1664_v4, %v1663_v36 }
 0x3da   : > { %v1707_v11 = vpop.xlane.xlu0 %1706 }
 0x3db   : > { %v1666_v6 = vrot.slane %v1665_v39, 2  ;;  %v1708_v19 = vrot.slane %v1707_v11, 4 }
 0x3dd   : > { %v1709_v55 = vadd.f32 %v1708_v19, %v1707_v11  ;;  %v1667_v62 = vadd.f32 %v1666_v6, %v1665_v39 }
 0x3df   : > { %v1710_v38 = vrot.slane %v1709_v55, 2  ;;  %v1668_v41 = vrot.slane %v1667_v62, 1 }
 0x3e1   : > { %v1669_v45 = vadd.f32 %v1668_v41, %v1667_v62  ;;  %v1711_v8 = vadd.f32 %v1710_v38, %v1709_v55  ;;  %v3772_v55 = vmov 1.0|1.0  }
 0x3e2   : > { %s3508_s29 = spop %3507 }
 0x3e3   : > { %3509 = vpush %v1669_v45  ;;  %v1712_v47 = vrot.slane %v1711_v8, 1  ;;  %v1645_v17 = vstv %s3508_s29 }
 0x3e4   : > { %3511 = vpush %v1687_v3 }
 0x3e5   : > { %v1713_v52 = vadd.f32 %v1712_v47, %v1711_v8 }
 0x3e7   : > { %3513 = vpush %v1713_v52 }
 0x3f8   : > { %v2325_v28 = vpop.xlane.xlu1 %2324 }
 0x3f9   : > { %v2326_v24 = vrot.slane %v2325_v28, 4 }
 0x3fb   : > { %v2327_v48 = vadd.f32 %v2326_v24, %v2325_v28 }
 0x3fd   : > { %v2328_v60 = vrot.slane %v2327_v48, 2 }
 0x3ff   : > { %v2329_v10 = vadd.f32 %v2328_v60, %v2327_v48  ;;  %v5451_v60 = vld [vmem:[#allocation15_spill] sm:$0xff] }
 0x401   : > { %v2330_v1 = vrot.slane %v2329_v10, 1 }
 0x403   : > { %v2331_v33 = vadd.f32 %v2330_v1, %v2329_v10 }
 0x405   : > { %3515 = vpush %v2331_v33  ;;  %v5452_v33 = vld [vmem:[#allocation14_spill] sm:$0xff] }
 0x414   : > { %s3510_s7 = spop %3509 }
 0x415   : > { %v1671_v25 = vstv %s3510_s7  ;;  %s3512_s19 = spop %3511 }
 0x416   : > { %v1672_v63 = vadd.f32 %v1671_v25, %v1645_v17  ;;  %v1689_v5 = vstv %s3512_s19 }
 0x418   : > { %v1690_v44 = vadd.f32 %v1689_v5, %v1672_v63  ;;  %s3514_s0 = spop %3513 }
 0x419   : > { %v1715_v57 = vstv %s3514_s0 }
 0x41a   : > { %v1716_v50 = vadd.f32 %v1715_v57, %v1690_v44 }
 0x41c   : > { %v1717_v40 = vmul.f32 0.0009765625, %v1716_v50 }
 0x41e   : > { %v1718_v13 = vadd.f32 1e-05, %v1717_v40 }
 0x420   : > { %3590 = vrsqrt.f32 %v1718_v13 }
 0x42a   : > { %v5102_v59 = vpop.eup %3590 }
 0x42b   : > { %v1922_v51 = vmul.f32 %v5102_v59, %v4876_v35  ;;  %v1923_v23 = vmul.f32 %v5102_v59, %v4872_v46  ;;  %v5117_v35 = vadd.s32 8, %v5108_v21  ;;  %v223_v46 = vmul.u32 2, %v5108_v21 }
 0x42c   : > { %v1911_v10 = vmul.f32 %v5102_v59, %v5451_v60  ;;  %v1732_v17 = vmul.f32 %v5102_v59, %v5452_v33 }
 0x42d   : > { %v1926_v34 = vmul.f32 0.70710677, %v1922_v51  ;;  %v1927_v58 = vmul.f32 0.70710677, %v1923_v23  ;;  %v224_v0 = vmul.u32 2, %v5117_v35  ;;  %v231_v42 = vadd.s32 1, %v223_v46 }
 0x42e   : > { %vm225_vm4 = vcmp.eq.s32.totalorder %v5127_v43, %v223_v46  ;;  %v1925_v39 = vmul.f32 0.5, %v1923_v23  ;;  %v1915_v1 = vmul.f32 0.70710677, %v1911_v10  ;;  %v1736_v25 = vmul.f32 0.70710677, %v1732_v17 }
 0x42f   : > { %3592 = verf.f32 %v1926_v34  ;;  %v232_v4 = vadd.s32 1, %v224_v0  ;;  %vm233_vm5 = vcmp.eq.s32.totalorder %v5127_v43, %v231_v42  ;;  %vm226_vm6 = vcmp.eq.s32.totalorder %v5127_v43, %v224_v0 }
 0x430   : > { %3594 = verf.f32 %v1927_v58  ;;  %vm5140_vm8 = vmpackc.low %vm226_vm6, %vm225_vm4  ;;  %v1734_v0 = vmul.f32 0.5, %v1732_v17 }
 0x431   : > { %vm234_vm7 = vcmp.eq.s32.totalorder %v5127_v43, %v232_v4 }
 0x432   : > { %vm5144_vm9 = vmpackc.low %vm234_vm7, %vm233_vm5 }
 0x433   : > { %3450 = vmatprep.subr.msk.bf16.mxu1 %vm5144_vm9, %v3772_v55  ;;  %3442 = vmatprep.subr.msk.bf16.mxu0 %vm5144_vm9, %v3772_v55 }
 0x434   : > { %3452 = vmatpush3.bf16.msk.msra.mxu1 %vm5144_vm9, %v3772_v55  ;;  %3444 = vmatpush3.bf16.msk.msra.mxu0 %vm5144_vm9, %v3772_v55 }
 0x435   : > { %3454 = vmatprep.subr.msk.bf16.mxu1 %vm5140_vm8, %v3772_v55  ;;  %3446 = vmatprep.subr.msk.bf16.mxu0 %vm5140_vm8, %v3772_v55 }
 0x436   : > { %s3516_s27 = spop %3515 }
 0x437   : > { %v2333_v53 = vstv %s3516_s27 }
 0x438   : > { %v2334_v18 = vmul.f32 0.0009765625, %v2333_v53 }
 0x439   : > { %v3593_v56 = vpop.eup %3592 }
 0x43a   : > { %v5111_v2 = vsub.f32 %v4972_v20, %v2334_v18  ;;  %v5114_v49 = vsub.f32 %v4974_v16, %v2334_v18  ;;  %v5125_v7 = vsub.f32 %v4980_v14, %v2334_v18  ;;  %v1930_v9 = vadd.f32 1.0, %v3593_v56  ;;  %v3595_v20 = vpop.eup %3594 }
 0x43b   : > { %v1924_v16 = vmul.f32 0.5, %v1922_v51  ;;  %v1931_v14 = vadd.f32 1.0, %v3595_v20  ;;  %v5149_v19 = vsub.f32 %v4982_v54, %v2334_v18  ;;  %v5174_v62 = vsub.f32 %v5088_v37, %v2334_v18 }
 0x43c   : > { %v2356_v32 = vmul.f32 %v5111_v2, %v5111_v2  ;;  %v2355_v12 = vmul.f32 %v5114_v49, %v5114_v49  ;;  %v2399_v26 = vmul.f32 %v5125_v7, %v5125_v7  ;;  %v5177_v15 = vsub.f32 %v5090_v29, %v2334_v18 }
 0x43d   : > { %v1932_v36 = vmul.f32 %v1930_v9, %v1924_v16  ;;  %v1933_v6 = vmul.f32 %v1931_v14, %v1925_v39  ;;  %v2400_v54 = vmul.f32 %v5149_v19, %v5149_v19  ;;  %v2337_v38 = vmul.f32 %v5174_v62, %v5174_v62 }
 0x43e   : > { %2361 = vrot.lane.b32.xlu1 %v2356_v32, %s5434_s1  ;;  %2359 = vrot.lane.b32.xlu0 %v2355_v12, %s5434_s1  ;;  %v2338_v41 = vmul.f32 %v5177_v15, %v5177_v15  ;;  %v5184_v45 = vsub.f32 %v5092_v31, %v2334_v18  ;;  %v5187_v8 = vsub.f32 %v5094_v27, %v2334_v18  ;;  %v1913_v12 = vmul.f32 0.5, %v1911_v10 }
 0x43f   : > { %v2339_v3 = vsel %vm1614_vm3, %v2337_v38, 0.0  ;;  %v1910_v27 = vmul.f32 %v5102_v59, %v4990_v61 }
 0x440   : > { %v2340_v37 = vsel %vm1614_vm3, %v2338_v41, 0.0  ;;  %v2381_v29 = vmul.f32 %v5184_v45, %v5184_v45  ;;  %v2382_v47 = vmul.f32 %v5187_v8, %v5187_v8 }
 0x441   : > { %v2341_v52 = vadd.f32 %v2340_v37, %v2339_v3  ;;  %v1914_v48 = vmul.f32 0.70710677, %v1910_v27  ;;  %v1912_v51 = vmul.f32 0.5, %v1910_v27  ;;  %v5216_v3 = vmul.u32 2, %v5127_v43 }
 0x442   : > { %2403 = vrot.lane.b32.xlu0 %v2399_v26, %s5434_s1  ;;  %1936 = vrot.lane.b32.xlu1 %v1932_v36, %s5434_s1  ;;  %v2383_v28 = vsel %vm1614_vm3, %v2381_v29, 0.0  ;;  %v2384_v24 = vsel %vm1614_vm3, %v2382_v47, 0.0  ;;  %v5453_v47 = vmov 0.0  }
 0x443   : > { %v2385_v31 = vadd.f32 %v2384_v24, %v2383_v28  ;;  %3596 = verf.f32 %v1914_v48  ;;  %v210_v37 = vadd.s32 1, %v5216_v3  ;;  %vm198_vm14 = vcmp.eq.s32.totalorder %v5108_v21, %v5216_v3 }
 0x444   : > { %3598 = verf.f32 %v1915_v1  ;;  %vm199_vm15 = vcmp.eq.s32.totalorder %v5117_v35, %v5216_v3 }
 0x445   : > { %3600 = verf.f32 %v1736_v25  ;;  %vm211_vm10 = vcmp.eq.s32.totalorder %v5108_v21, %v210_v37  ;;  %vm212_vm11 = vcmp.eq.s32.totalorder %v5117_v35, %v210_v37 }
 0x446   : > { %1938 = vrot.lane.b32.xlu1 %v1933_v6, %s5434_s1 }
 0x44a   : > { %2405 = vrot.lane.b32.xlu1 %v2400_v54, %s5434_s1 }
 0x44d   : > { %v3597_v44 = vpop.eup %3596 }
 0x44e   : > { %v1918_v13 = vadd.f32 1.0, %v3597_v44  ;;  %v3599_v23 = vpop.eup %3598 }
 0x44f   : > { %v1919_v53 = vadd.f32 1.0, %v3599_v23  ;;  %v3601_v18 = vpop.eup %3600 }
 0x450   : > { %v1920_v58 = vmul.f32 %v1918_v13, %v1912_v51  ;;  %v1740_v16 = vadd.f32 1.0, %v3601_v18 }
 0x451   : > { %v1921_v20 = vmul.f32 %v1919_v53, %v1913_v12 }
 0x452   : > { %v1742_v42 = vmul.f32 %v1740_v16, %v1734_v0  ;;  %v5454_v16 = vld [vmem:[#allocation13_spill] sm:$0xff] }
 0x453   : > { %v1733_v0 = vmul.f32 %v5102_v59, %v5454_v16 }
 0x461   : > { %2342 = vadd.xlane.f32.xlu0 %v2341_v52  ;;  %v5221_v52 = vsel %vm211_vm10, 1.0, %v5453_v47 }
 0x465   : > { %2386 = vadd.xlane.f32.xlu0 %v2385_v31 }
 0x4b0   : > { %v2362_v63 = vpop.permute.xlu1 %2361  ;;  %v2360_v5 = vpop.permute.xlu0 %2359 }
 0x4b1   : > { %v2366_v57 = vsel %vm1614_vm3, %v2362_v63, 0.0  ;;  %v2365_v50 = vsel %vm1614_vm3, %v2360_v5, 0.0 }
 0x4b2   : > { %v2367_v40 = vadd.f32 %v2366_v57, %v2365_v50 }
 0x4b4   : > { %2368 = vadd.xlane.f32.xlu1 %v2367_v40  ;;  %v1937_v61 = vpop.permute.xlu1 %1936  ;;  %v2404_v22 = vpop.permute.xlu0 %2403 }
 0x4b5   : > { %3363 = vmatprep.mubr.msk.f32.mxu1 %vm1614_vm3, %v1937_v61  ;;  %v2409_v46 = vsel %vm1614_vm3, %v2404_v22, 0.0 }
 0x4b8   : > { %v1939_v34 = vpop.permute.xlu1 %1938 }
 0x4b9   : > { %3364 = vmatmul.mubr.msk.f32.vlgmr.msra.gmra.mrb[0].mxu1 %vm1614_vm3, %v1939_v34 }
 0x4ba   : > { %3370 = vmatprep.mubr.msk.f32.mxu1 %vm1614_vm3, %v1920_v58  ;;  %3456 = vmatpush3.bf16.msk.msra.mxu1 %vm5140_vm8, %v3772_v55 }
 0x4bc   : > { %v2406_v56 = vpop.permute.xlu1 %2405 }
 0x4bd   : > { %v2410_v32 = vsel %vm1614_vm3, %v2406_v56, 0.0 }
 0x4be   : > { %v2411_v9 = vadd.f32 %v2410_v32, %v2409_v46  ;;  %v5227_v46 = vadd.s32 16, %v5108_v21 }
 0x4c0   : > { %2412 = vadd.xlane.f32.xlu0 %v2411_v9  ;;  %vm213_vm12 = vcmp.eq.s32.totalorder %v5227_v46, %v210_v37  ;;  %vm200_vm0 = vcmp.eq.s32.totalorder %v5227_v46, %v5216_v3 }
 0x4c1   : > { %3371 = vmatmul.mubr.msk.f32.vlgmr.msra.gmra.mrb[0].mxu1 %vm1614_vm3, %v1921_v20  ;;  %v5231_v20 = vadd.s32 24, %v5108_v21  ;;  %v3092_v21 = vsel %vm199_vm15, 1.0, %v5453_v47 }
 0x4c2   : > { %3377 = vmatprep.mubr.msk.f32.mxu1 %vm1614_vm3, %v5221_v52 }
 0x4c3   : > { %vm214_vm13 = vcmp.eq.s32.totalorder %v5231_v20, %v210_v37  ;;  %vm201_vm1 = vcmp.eq.s32.totalorder %v5231_v20, %v5216_v3 }
 0x4c4   : > { %v3094_v35 = vsel %vm201_vm1, 1.0, %v5453_v47 }
 0x4c5   : > { %1746 = vrot.lane.b32.xlu1 %v1742_v42, %s5434_s1  ;;  %v5237_v42 = vsel %vm212_vm11, 1.0, %v5453_v47 }
 0x4ee   : > { %v2343_v26 = vpop.xlane.xlu0 %2342 }
 0x4ef   : > { %v2344_v36 = vrot.slane %v2343_v26, 4 }
 0x4f1   : > { %v2345_v14 = vadd.f32 %v2344_v36, %v2343_v26  ;;  %v5240_v26 = vsel %vm213_vm12, 1.0, %v5453_v47 }
 0x4f2   : > { %v2387_v38 = vpop.xlane.xlu0 %2386 }
 0x4f3   : > { %v2346_v4 = vrot.slane %v2345_v14, 2  ;;  %v2388_v41 = vrot.slane %v2387_v38, 4 }
 0x4f5   : > { %v2347_v39 = vadd.f32 %v2346_v4, %v2345_v14  ;;  %v2389_v29 = vadd.f32 %v2388_v41, %v2387_v38  ;;  %v1737_v14 = vmul.f32 0.70710677, %v1733_v0  ;;  %v5251_v4 = vsel %vm214_vm13, 1.0, %v5453_v47 }
 0x4f7   : > { %v2348_v6 = vrot.slane %v2347_v39, 1  ;;  %v2390_v28 = vrot.slane %v2389_v29, 2 }
 0x4f9   : > { %v2349_v54 = vadd.f32 %v2348_v6, %v2347_v39  ;;  %v2391_v60 = vadd.f32 %v2390_v28, %v2389_v29 }
 0x4fb   : > { %3517 = vpush %v2349_v54  ;;  %v2392_v1 = vrot.slane %v2391_v60, 1 }
 0x4fd   : > { %v2393_v63 = vadd.f32 %v2392_v1, %v2391_v60 }
 0x52c   : > { %s3518_s24 = spop %3517 }
 0x52d   : > { %v2351_v51 = vstv %s3518_s24 }
 0x541   : > { %v2369_v24 = vpop.xlane.xlu1 %2368 }
 0x542   : > { %v2370_v31 = vrot.slane %v2369_v24, 4 }
 0x544   : > { %v2371_v27 = vadd.f32 %v2370_v31, %v2369_v24 }
 0x545   : > { %v1747_v48 = vpop.permute.xlu1 %1746 }
 0x546   : > { %v2372_v10 = vrot.slane %v2371_v27, 2  ;;  %3349 = vmatprep.mubr.msk.f32.mxu0 %vm1614_vm3, %v1747_v48 }
 0x548   : > { %v2373_v43 = vadd.f32 %v2372_v10, %v2371_v27 }
 0x54a   : > { %v2374_v33 = vrot.slane %v2373_v43, 1 }
 0x54c   : > { %v2375_v17 = vadd.f32 %v2374_v33, %v2373_v43 }
 0x54d   : > { %v2413_v25 = vpop.xlane.xlu0 %2412 }
 0x54e   : > { %v2414_v5 = vrot.slane %v2413_v25, 4  ;;  %3519 = vpush %v2375_v17 }
 0x54f   : > { %3521 = vpush %v2393_v63 }
 0x550   : > { %v2415_v44 = vadd.f32 %v2414_v5, %v2413_v25  ;;  %v1735_v25 = vmul.f32 0.5, %v1733_v0 }
 0x552   : > { %v2416_v57 = vrot.slane %v2415_v44, 2 }
 0x554   : > { %v2417_v50 = vadd.f32 %v2416_v57, %v2415_v44 }
 0x556   : > { %v2418_v40 = vrot.slane %v2417_v50, 1 }
 0x558   : > { %v2419_v61 = vadd.f32 %v2418_v40, %v2417_v50 }
 0x55a   : > { %3523 = vpush %v2419_v61 }
 0x57f   : > { %s3520_s25 = spop %3519 }
 0x580   : > { %v2377_v13 = vstv %s3520_s25  ;;  %s3522_s26 = spop %3521 }
 0x581   : > { %v2378_v23 = vadd.f32 %v2377_v13, %v2351_v51  ;;  %v2395_v34 = vstv %s3522_s26  ;;  %v5455_v13 = vld [vmem:[#allocation16_spill] sm:$0xff] }
 0x582   : > { %v1720_v51 = vmul.f32 %v5102_v59, %v5455_v13 }
 0x583   : > { %v2396_v58 = vadd.f32 %v2395_v34, %v2378_v23 }
 0x584   : > { %v1724_v34 = vmul.f32 0.70710677, %v1720_v51 }
 0x58b   : > { %s3524_s8 = spop %3523 }
 0x58c   : > { %v2421_v22 = vstv %s3524_s8 }
 0x58d   : > { %v2422_v53 = vadd.f32 %v2421_v22, %v2396_v58  ;;  %v5456_v22 = vld [vmem:[#allocation17_spill] sm:$0xff] }
 0x58f   : > { %v2423_v18 = vmul.f32 0.0009765625, %v2422_v53  ;;  %v1721_v53 = vmul.f32 %v5102_v59, %v5456_v22 }
 0x591   : > { %v2424_v56 = vadd.f32 1e-05, %v2423_v18 }
 0x593   : > { %3602 = vrsqrt.f32 %v2424_v56  ;;  %v1725_v56 = vmul.f32 0.70710677, %v1721_v53 }
 0x594   : > { %v3372_v32 = vpop.f32.mrb[0].mxu1  ;;  %3604 = verf.f32 %v1737_v14 }
 0x595   : > { %v2091_v12 = vpop.f32.mrb[1].mxu1 }
 0x596   : > { %v3457_v9 = vpack.c.bf16 %v3372_v32, %v2091_v12 }
 0x598   : > { %3458 = vmatprep.subr.bf16.mxu1 %v3457_v9 }
 0x599   : > { %3460 = vmatpush3.bf16.msra.mxu1 %v3457_v9 }
 0x59a   : > { %3466 = vmatprep.subr.msk.bf16.mxu1 %vm5144_vm9, %v3772_v55 }
 0x59c   : > { %3378 = vmatmul.mubr.msk.f32.vlgmr.msra.gmra.mrb[2].mxu1 %vm1614_vm3, %v5237_v42 }
 0x59d   : > { %v3603_v36 = vpop.eup %3602  ;;  %3380 = vmatprep.mubr.msk.f32.mxu1 %vm1614_vm3, %v5240_v26  ;;  %3468 = vmatpush3.bf16.msk.msra.mxu1 %vm5144_vm9, %v3772_v55 }
 0x59e   : > { %v2438_v39 = vmul.f32 %v3603_v36, %v5114_v49  ;;  %v2439_v6 = vmul.f32 %v3603_v36, %v5111_v2  ;;  %v2628_v54 = vmul.f32 %v3603_v36, %v5125_v7  ;;  %3470 = vmatprep.subr.msk.bf16.mxu1 %vm5140_vm8, %v3772_v55  ;;  %v2629_v38 = vmul.f32 %v3603_v36, %v5149_v19  ;;  %v3605_v2 = vpop.eup %3604 }
 0x59f   : > { %v1741_v1 = vadd.f32 1.0, %v3605_v2  ;;  %v2426_v40 = vmul.f32 %v3603_v36, %v5174_v62  ;;  %v2427_v23 = vmul.f32 %v3603_v36, %v5177_v15  ;;  %v2616_v18 = vmul.f32 %v3603_v36, %v5184_v45 }
 0x5a0   : > { %v2442_v41 = vmul.f32 0.70710677, %v2438_v39  ;;  %v2443_v37 = vmul.f32 0.70710677, %v2439_v6  ;;  %3381 = vmatmul.mubr.msk.f32.gmra.mrb[4].mxu1 %vm1614_vm3, %v5251_v4  ;;  %v2632_v29 = vmul.f32 0.70710677, %v2628_v54  ;;  %v2617_v62 = vmul.f32 %v3603_v36, %v5187_v8 }
 0x5a1   : > { %v2633_v49 = vmul.f32 0.70710677, %v2629_v38  ;;  %v2440_v24 = vmul.f32 0.5, %v2438_v39  ;;  %v2441_v48 = vmul.f32 0.5, %v2439_v6  ;;  %v2630_v17 = vmul.f32 0.5, %v2628_v54 }
 0x5a2   : > { %3606 = verf.f32 %v2442_v41  ;;  %v1743_v5 = vmul.f32 %v1741_v1, %v1735_v25  ;;  %v2631_v57 = vmul.f32 0.5, %v2629_v38  ;;  %v2430_v61 = vmul.f32 0.70710677, %v2426_v40 }
 0x5a3   : > { %3608 = verf.f32 %v2443_v37  ;;  %v2431_v58 = vmul.f32 0.70710677, %v2427_v23  ;;  %v2620_v32 = vmul.f32 0.70710677, %v2616_v18  ;;  %v2428_v15 = vmul.f32 0.5, %v2426_v40 }
 0x5a4   : > { %3610 = verf.f32 %v2632_v29  ;;  %v2621_v0 = vmul.f32 0.70710677, %v2617_v62  ;;  %v1722_v45 = vmul.f32 0.5, %v1720_v51  ;;  %v2429_v29 = vmul.f32 0.5, %v2427_v23 }
 0x5a5   : > { %3612 = verf.f32 %v2633_v49  ;;  %v3093_v40 = vsel %vm200_vm0, 1.0, %v5453_v47 }
 0x5a6   : > { %3614 = verf.f32 %v2430_v61 }
 0x5a7   : > { %3616 = verf.f32 %v1724_v34 }
 0x5a8   : > { %3618 = verf.f32 %v2431_v58 }
 0x5a9   : > { %3620 = verf.f32 %v1725_v56 }
 0x5aa   : > { %3622 = verf.f32 %v2620_v32 }
 0x5ab   : > { %3624 = verf.f32 %v2621_v0 }
 0x5ac   : > { %v3607_v7 = vpop.eup %3606 }
 0x5ad   : > { %v3609_v28 = vpop.eup %3608  ;;  %v2446_v31 = vadd.f32 1.0, %v3607_v7 }
 0x5ae   : > { %v3611_v27 = vpop.eup %3610  ;;  %v2447_v19 = vadd.f32 1.0, %v3609_v28 }
 0x5af   : > { %v2448_v60 = vmul.f32 %v2446_v31, %v2440_v24  ;;  %v2636_v10 = vadd.f32 1.0, %v3611_v27  ;;  %v3613_v33 = vpop.eup %3612  ;;  %v1723_v24 = vmul.f32 0.5, %v1721_v53  ;;  %v2618_v31 = vmul.f32 0.5, %v2616_v18 }
 0x5b0   : > { %v2449_v43 = vmul.f32 %v2447_v19, %v2441_v48  ;;  %v2637_v44 = vadd.f32 1.0, %v3613_v33  ;;  %v3615_v12 = vpop.eup %3614 }
 0x5b1   : > { %2452 = vrot.lane.b32.xlu0 %v2448_v60, %s5434_s1  ;;  %v2638_v63 = vmul.f32 %v2636_v10, %v2630_v17  ;;  %v2434_v9 = vadd.f32 1.0, %v3615_v12  ;;  %v3617_v16 = vpop.eup %3616  ;;  %v2619_v10 = vmul.f32 0.5, %v2617_v62 }
 0x5b2   : > { %2454 = vrot.lane.b32.xlu1 %v2449_v43, %s5434_s1  ;;  %v2639_v50 = vmul.f32 %v2637_v44, %v2631_v57  ;;  %v3619_v39 = vpop.eup %3618  ;;  %v1728_v54 = vadd.f32 1.0, %v3617_v16 }
 0x5b3   : > { %v2436_v59 = vmul.f32 %v2434_v9, %v2428_v15  ;;  %v2435_v8 = vadd.f32 1.0, %v3619_v39  ;;  %v3621_v36 = vpop.eup %3620 }
 0x5b4   : > { %v1730_v41 = vmul.f32 %v1728_v54, %v1722_v45  ;;  %v3623_v37 = vpop.eup %3622  ;;  %v1729_v2 = vadd.f32 1.0, %v3621_v36 }
 0x5b5   : > { %2642 = vrot.lane.b32.xlu0 %v2638_v63, %s5434_s1  ;;  %v2437_v49 = vmul.f32 %v2435_v8, %v2429_v29  ;;  %v2624_v7 = vadd.f32 1.0, %v3623_v37  ;;  %v3625_v48 = vpop.eup %3624  ;;  %v3091_v63 = vsel %vm198_vm14, 1.0, %v5453_v47 }
 0x5b6   : > { %1748 = vrot.lane.b32.xlu1 %v1743_v5, %s5434_s1  ;;  %v1731_v27 = vmul.f32 %v1729_v2, %v1723_v24  ;;  %v2625_v30 = vadd.f32 1.0, %v3625_v48 }
 0x5b7   : > { %v2626_v60 = vmul.f32 %v2624_v7, %v2618_v31 }
 0x5b8   : > { %v2627_v43 = vmul.f32 %v2625_v30, %v2619_v10 }
 0x5ba   : > { %2644 = vrot.lane.b32.xlu1 %v2639_v50, %s5434_s1  ;;  %s5457_s1 = sshll.u32 %s3918_s14, 6 }
 0x5bb   : > { %s175_s5 = scalar_lea.vmem [#allocation8], %s5457_s1 }
 0x5bc   : > { %s2995_s20 = sshll.u32 %s175_s5, 4  ;;  %s5349_s20 = int_to_ptr.vmem [resolvable:$true] %s2995_s20 }
 0x5bd   : > { %s3693_s3 = scalar_lea.vmem %s5349_s20, 1024  ;;  %p3700_p10 = scmp.lt.s32.totalorder %s5349_s20, %s3698_s17 }
 0x5be   : > { %p3694_p5 = scmp.ne.s32.totalorder %s5349_s20, %s3693_s3  ;;  %p3701_p1 = scmp.lt.s32.totalorder %s3699_s4, %s3693_s3 }
 0x5c0   : > { %p3695_p8 = pnand %p3694_p5, %p5458_p12  ;;  %p3702_p4 = por %p3701_p1, %p3700_p10 }
 0x5c2   : > { %p3696_p9 = pneg %p3695_p8 }
 0x5c4   : > { %p3703_p11 = pnand %p3702_p4, %p3696_p9 }
 0x623   : > { %v2453_v14 = vpop.permute.xlu0 %2452 }
 0x624   : > { %v2455_v6 = vpop.permute.xlu1 %2454  ;;  %3397 = vmatprep.mubr.msk.f32.mxu1 %vm1614_vm3, %v2453_v14 }
 0x625   : > { %3398 = vmatmul.mubr.msk.f32.vlgmr.msra.gmra.mrb[6].mxu1 %vm1614_vm3, %v2455_v6 }
 0x626   : > { %3404 = vmatprep.mubr.msk.f32.mxu1 %vm1614_vm3, %v2436_v59  ;;  %3472 = vmatpush3.bf16.msk.msra.mxu1 %vm5140_vm8, %v3772_v55 }
 0x627   : > { %3474 = vmatprep.subr.msk.bf16.mxu1 %vm5144_vm9, %v3772_v55  ;;  %v2643_v28 = vpop.permute.xlu0 %2642 }
 0x628   : > { %v1749_v38 = vpop.permute.xlu1 %1748 }
 0x629   : > { %3350 = vmatmul.mubr.msk.f32.vlgmr.msra.gmra.mrb[0].mxu0 %vm1614_vm3, %v1749_v38 }
 0x62a   : > { %3356 = vmatprep.mubr.msk.f32.mxu0 %vm1614_vm3, %v1730_v41  ;;  %3448 = vmatpush3.bf16.msk.msra.mxu0 %vm5140_vm8, %v3772_v55 }
 0x62c   : > { %v2645_v19 = vpop.permute.xlu1 %2644 }
 0x62d   : > { %3405 = vmatmul.mubr.msk.f32.vlgmr.msra.gmra.mrb[6].mxu1 %vm1614_vm3, %v2437_v49 }
 0x62e   : > { %3476 = vmatpush3.bf16.msk.msra.mxu1 %vm5144_vm9, %v3772_v55  ;;  %3411 = vmatprep.mubr.msk.f32.mxu1 %vm1614_vm3, %v2643_v28 }
 0x62f   : > { %3478 = vmatprep.subr.msk.bf16.mxu1 %vm5140_vm8, %v3772_v55 }
 0x631   : > { %3357 = vmatmul.mubr.msk.f32.vlgmr.msra.gmra.mrb[0].mxu0 %vm1614_vm3, %v1731_v27  ;;  %3412 = vmatmul.mubr.msk.f32.vlgmr.msra.gmra.mrb[8].mxu1 %vm1614_vm3, %v2645_v19 }
 0x632   : > { %3418 = vmatprep.mubr.msk.f32.mxu1 %vm1614_vm3, %v2626_v60  ;;  %3480 = vmatpush3.bf16.msk.msra.mxu1 %vm5140_vm8, %v3772_v55 }
 0x633   : > { %3387 = vmatprep.mubr.msk.f32.mxu0 %vm1614_vm3, %v3091_v63 }
 0x639   : > { %3419 = vmatmul.mubr.msk.f32.vlgmr.msra.gmra.mrb[8].mxu1 %vm1614_vm3, %v2627_v43 }
 0x66f   : > { %v3379_v1 = vpop.f32.mrb[2].mxu1 }
 0x670   : > { %v2178_v33 = vpop.f32.mrb[3].mxu1 }
 0x673   : > { %v3382_v17 = vpop.f32.mrb[4].mxu1 }
 0x674   : > { %v2188_v25 = vpop.f32.mrb[5].mxu1 }
 0x700   : > { %v3406_v5 = vpop.f32.mrb[6].mxu1 }
 0x701   : > { %v2607_v44 = vpop.f32.mrb[7].mxu1 }
 0x702   : > { %v3485_v11 = vpack.c.bf16 %v3406_v5, %v2607_v44 }
 0x704   : > { %v3358_v55 = vpop.f32.mrb[0].mxu0 }
 0x705   : > { %v1901_v57 = vpop.f32.mrb[1].mxu0 }
 0x706   : > { %v3461_v50 = vpack.c.bf16 %v3358_v55, %v1901_v57 }
 0x708   : > { %3462 = vmatprep.subr.bf16.mxu0 %v3461_v50 }
 0x709   : > { %3464 = vmatpush3.bf16.msra.mxu0 %v3461_v50 }
 0x70c   : > { %3388 = vmatmul.mubr.msk.f32.vlgmr.msra.gmra.mrb[2].mxu0 %vm1614_vm3, %v3092_v21  ;;  %v3420_v61 = vpop.f32.mrb[8].mxu1 }
 0x70d   : > { %v2797_v13 = vpop.f32.mrb[9].mxu1  ;;  %3390 = vmatprep.mubr.msk.f32.mxu0 %vm1614_vm3, %v3093_v40 }
 0x70e   : > { %v3481_v51 = vpack.c.bf16 %v3420_v61, %v2797_v13 }
 0x710   : > { %3391 = vmatmul.mubr.msk.f32.gmra.mrb[4].mxu0 %vm1614_vm3, %v3094_v35  ;;  %3482 = vmatprep.subr.bf16.mxu0 %v3481_v51 }
 0x711   : > { %3484 = vmatpush3.bf16.msra.mxu0 %v3481_v51  ;;  %3425 = vmatprep.mubr.msk.f32.mxu0 %vm1614_vm3, %v5221_v52 }
 0x712   : > { %3486 = vmatprep.subr.bf16.mxu0 %v3485_v11 }
 0x714   : > { %3426 = vmatmul.mubr.msk.f32.vlgmr.msra.gmra.mrb[6].mxu0 %vm1614_vm3, %v5237_v42 }
 0x715   : > { %3488 = vmatpush3.bf16.msra.mxu0 %v3485_v11  ;;  %3428 = vmatprep.mubr.msk.f32.mxu0 %vm1614_vm3, %v5240_v26 }
 0x718   : > { %3429 = vmatmul.mubr.msk.f32.gmra.mrb[8].mxu0 %vm1614_vm3, %v5251_v4 }
 0x719   : > { %3435 = vmatprep.mubr.msk.f32.mxu0 %vm1614_vm3, %v3091_v63 }
 0x71c   : > { %3436 = vmatmul.mubr.msk.f32.vlgmr.msra.gmra.mrb[6].mxu0 %vm1614_vm3, %v3092_v21 }
 0x71d   : > { %3438 = vmatprep.mubr.msk.f32.mxu0 %vm1614_vm3, %v3093_v40 }
 0x720   : > { %3439 = vmatmul.mubr.msk.f32.gmra.mrb[8].mxu0 %vm1614_vm3, %v3094_v35 }
 0x7df   : > { %v3389_v3 = vpop.f32.mrb[2].mxu0 }
 0x7e0   : > { %v2281_v47 = vadd.f32 %v3389_v3, %v3379_v1  ;;  %v2275_v52 = vpop.f32.mrb[3].mxu0 }
 0x7e1   : > { %v2276_v46 = vadd.f32 %v2275_v52, %v2178_v33 }
 0x7e2   : > { %2296 = vst.msk [vmem:[%s175_s5 + $0x8] sm:$0xff] %vm2294_vm2, %v2281_v47 }
 0x7e3   : > { %2295 = vst.msk [vmem:[%s175_s5] sm:$0xff] %vm2294_vm2, %v2276_v46  ;;  %v3392_v20 = vpop.f32.mrb[4].mxu0 }
 0x7e4   : > { %v2291_v42 = vadd.f32 %v3392_v20, %v3382_v17  ;;  %v2285_v26 = vpop.f32.mrb[5].mxu0 }
 0x7e5   : > { %v2286_v4 = vadd.f32 %v2285_v26, %v2188_v25 }
 0x7e6   : > { %2298 = vst.msk [vmem:[%s175_s5 + $0x18] sm:$0xff] %vm2294_vm2, %v2291_v42 }
 0x7e7   : > { %2297 = vst.msk [vmem:[%s175_s5 + $0x10] sm:$0xff] %vm2294_vm2, %v2286_v4 }
 0x7ef   : > { %v3437_v23 = vpop.f32.mrb[6].mxu0 }
 0x7f0   : > { %3279 = vst.msk [vmem:[%s175_s5 + $0x28] sm:$0xff] %vm2294_vm2, %v3437_v23  ;;  %v2957_v34 = vpop.f32.mrb[7].mxu0 }
 0x7f1   : > { %3278 = vst.msk [vmem:[%s175_s5 + $0x20] sm:$0xff] %vm2294_vm2, %v2957_v34 }
 0x7f3   : > { %v3440_v58 = vpop.f32.mrb[8].mxu0 }
 0x7f4   : > { %3281 = vst.msk [vmem:[%s175_s5 + $0x38] sm:$0xff] %vm2294_vm2, %v3440_v58  ;;  %v2967_v22 = vpop.f32.mrb[9].mxu0 }
 0x7f5   : > { %3280 = vst.msk [vmem:[%s175_s5 + $0x30] sm:$0xff] %vm2294_vm2, %v2967_v22 }
 0x7f6   : > { %3706 = shalt.err (!%p3703_p11)
}
 0x7f7   : > { %s3707_s29 = scalar_lea.hbm %s5347_s28, 1024  ;;  %s3711_s0 = scalar_lea.hbm %s5397_s2, 2048 }
 0x7f8   : > { %p3708_p0 = scmp.ne.s32.totalorder %s5347_s28, %s3707_s29  ;;  %p3712_p6 = scmp.lt.u32.totalorder %s5347_s28, %s5397_s2 }
 0x7f9   : > { %p3713_p3 = scmp.lt.u32.totalorder %s3711_s0, %s3707_s29  ;;  %p3715_p5 = scmp.lt.u32.totalorder %s3707_s29, %s5347_s28 }
 0x7fa   : > { %p3709_p2 = pnand %p3708_p0, %p5458_p12 }
 0x7fb   : > { %p3714_p13 = por %p3713_p3, %p3712_p6 }
 0x7fc   : > { %p3710_p7 = pneg %p3709_p2 }
 0x7fd   : > { %p3716_p8 = por %p3715_p5, %p3714_p13 }
 0x7ff   : > { %p3717_p9 = pnand %p3716_p8, %p3710_p7 }
 0x801   : > { %3720 = shalt.err (!%p3717_p9)
}
 0x802   : > { %s3774_s25 = smov 128   ;;  %s3775_s26 = smov 8  }
 0x803   : > { %3531 = dma.vmem_to_hbm [thread:$0]  (%p5458_p12), %s5349_s20, 1024, %s5347_s28, %s2982_s13, %s3774_s25, %s3774_s25, %s3775_s26  }
 0x804 PF: > { %s3010_s8 = sand.u32 1, %s3751_s9   ;;  %p5459_p10 = scmp.ne.s32.totalorder %s5423_s22, 0 }
 0x805   : > { %p5460_p1 = scmp.ge.s32.totalorder %s3763_s12, 2  ;;  %s3011_s1 = scalar_lea.sflag [#allocation5], %s3010_s8 }
 0x807   : > { %p3542_p4 = pnand %p5460_p1, %p5459_p10 }
 0x809   : > { %3746 = dma.done.wait (!%p3542_p4), %s3011_s1, 1024  }
 0x80a   : > { %3748 = vsyncadd (!%p3542_p4), %s3011_s1, 4294966272  ;;  %p16_p11 = scmp.ge.s32.totalorder %s3816_s15, 4   ;;  %s5461_s9 = smov %s3755_s10 }
 0x80b   : > { %s5462_s10 = smov %s3759_s11  ;;  %s5463_s11 = smov %s3828_s18 }
 0x80c   : > { %s5464_s12 = smov %s3816_s15  ;;  %18 = sbr.rel (!%p16_p11) target bundleno = 9 (0x9), region = 79 }
 0x813   :  { %3016 = vsyncpa [#allocation4], 1 }
 0x814   :  { %3018 = vsyncpa [#allocation4 + $0x1], 1 }
 0x815   :  { %3019 = vsyncpa [#allocation5], 1 }
 0x816   :  { %3021 = vsyncpa [#allocation5 + $0x1], 1 }
 0x817   :  { %3022 = vsyncpa [#allocation6], 1 }
 0x818   :  { %3024 = vsyncpa [#allocation6 + $0x1], 1 }

</bundles_post_ra>
